<compile_context>
chip_gen: v5e
topology: v5e:2x2
jax: 0.10.0
libtpu: 0.0.40
codegen_flags: <defaults>
</compile_context>

<pallas_src>
import functools
import math

import jax
import jax.numpy as jnp
from jax import lax
from jax.experimental import pallas as pl
from jax.experimental.pallas import tpu as pltpu

EPS = 1e-6          # matches LayerNorm(features, eps=1e-06)
BF = jnp.bfloat16   # MXU operand dtype
NEG_INF = -1e9      # masked_fill value from the reference attention


# ----------------------------- in-kernel math -------------------------------

def _ln_math(x, a, b):
    """PyTorch-style LayerNorm of the reference module:
    a * (x - mean) / (std + eps) + b, with Bessel-corrected std (divide D-1).
    All statistics in f32."""
    mean = jnp.mean(x, axis=-1, keepdims=True)
    diff = x - mean
    var = jnp.sum(diff * diff, axis=-1, keepdims=True) / (x.shape[-1] - 1)
    std = jnp.sqrt(var)
    return a * diff / (std + EPS) + b


def _mha_core(x, q, k, v, bias, wo_ref, bo_ref, o_ref, heads_ref, *, h, dk):
    """Shared multi-head attention core.

    q: (tq, D) f32 (already scaled), k/v: (Tk, D) f32, bias: (tq|1, Tk) f32.
    Head outputs land in heads_ref (tq, D) f32 scratch; Wo is one full-depth
    GEMM; residual add with x fused in the epilogue (lane-dense store).
    """
    for head in range(h):                      # static unroll over heads
        sl = slice(head * dk, (head + 1) * dk)
        # q @ k^T via dot_general contracting last dims (no transpose).
        s = lax.dot_general(q[:, sl].astype(BF), k[:, sl].astype(BF),
                            (((1,), (1,)), ((), ())),
                            preferred_element_type=jnp.float32)   # (tq, Tk)
        s = s + bias                            # additive mask bias (hoisted compare)
        s = s - jnp.max(s, axis=-1, keepdims=True)
        p = jnp.exp(s)
        p = p * pl.reciprocal(jnp.sum(p, axis=-1, keepdims=True), approx=True)
        heads_ref[:, sl] = jnp.dot(p.astype(BF), v[:, sl].astype(BF),
                                   preferred_element_type=jnp.float32)
    # Single full-depth output projection.
    ctx = jnp.dot(heads_ref[...].astype(BF), wo_ref[...],
                  preferred_element_type=jnp.float32)             # (tq, D)
    o_ref[0] = (x + ctx + bo_ref[...]).astype(o_ref.dtype)


# ----------------------------- Pallas kernels -------------------------------

def _self_attn_kernel(x_ref, bias_ref, ln_a_ref, ln_b_ref,
                      wqkv_ref, bqkv_ref, wo_ref, bo_ref,
                      o_ref, heads_ref, *, h, scale):
    """Self-attention sublayer: LN -> fused QKV GEMM -> MHA -> Wo -> residual.
    K/V source is the same LayerNorm'd block as Q (no duplicate DMA / LN)."""
    x = x_ref[0].astype(jnp.float32)            # (tq, D)
    d = x.shape[-1]
    dk = d // h
    y = _ln_math(x, ln_a_ref[...], ln_b_ref[...])
    qkv = jnp.dot(y.astype(BF), wqkv_ref[...],
                  preferred_element_type=jnp.float32) + bqkv_ref[...]   # (tq, 3D)
    q = qkv[:, :d] * scale
    k = qkv[:, d:2 * d]
    v = qkv[:, 2 * d:]
    bias = bias_ref[0].astype(jnp.float32)
    _mha_core(x, q, k, v, bias, wo_ref, bo_ref, o_ref, heads_ref, h=h, dk=dk)


def _cross_attn_kernel(x_ref, kv_ref, bias_ref, ln_a_ref, ln_b_ref,
                       wq_ref, bq_ref, wkv_ref, bkv_ref, wo_ref, bo_ref,
                       o_ref, heads_ref, *, h, scale, normalize_kv):
    """Attention sublayer with a separate K/V source (source-attention, or
    self-attention when the query axis is tiled)."""
    x = x_ref[0].astype(jnp.float32)            # (tq, D)
    d = x.shape[-1]
    dk = d // h
    y = _ln_math(x, ln_a_ref[...], ln_b_ref[...])
    kv_in = kv_ref[0].astype(jnp.float32)       # (Tk, D)
    kv = _ln_math(kv_in, ln_a_ref[...], ln_b_ref[...]) if normalize_kv else kv_in
    q = (jnp.dot(y.astype(BF), wq_ref[...],
                 preferred_element_type=jnp.float32) + bq_ref[...]) * scale
    kvp = jnp.dot(kv.astype(BF), wkv_ref[...],
                  preferred_element_type=jnp.float32) + bkv_ref[...]    # (Tk, 2D)
    k = kvp[:, :d]
    v = kvp[:, d:]
    bias = bias_ref[0].astype(jnp.float32)
    _mha_core(x, q, k, v, bias, wo_ref, bo_ref, o_ref, heads_ref, h=h, dk=dk)


def _ffn_sublayer_kernel(x_ref, ln_a_ref, ln_b_ref,
                         w1_ref, b1_ref, w2_ref, b2_ref,
                         *rest, apply_final_ln):
    """Row tile: LN -> W1 -> ReLU -> W2 -> residual add.
    When apply_final_ln, the decoder's final LayerNorm is fused in the epilogue."""
    if apply_final_ln:
        fin_a_ref, fin_b_ref, o_ref = rest
    else:
        (o_ref,) = rest
    x = x_ref[...].astype(jnp.float32)                          # (tm, D)
    y = _ln_math(x, ln_a_ref[...], ln_b_ref[...])
    hid = jnp.dot(y.astype(BF), w1_ref[...],
                  preferred_element_type=jnp.float32) + b1_ref[...]
    hid = jnp.maximum(hid, 0.0)                                 # ReLU
    out = jnp.dot(hid.astype(BF), w2_ref[...],
                  preferred_element_type=jnp.float32) + b2_ref[...]
    res = x + out
    if apply_final_ln:
        res = _ln_math(res, fin_a_ref[...], fin_b_ref[...])
    o_ref[...] = res.astype(o_ref.dtype)


# ------------------------------ JAX wrappers ---------------------------------

def _vmem_limit(est_bytes):
    """Scoped-VMEM request from actual block sizes (headroom, capped for v7x)."""
    return int(min(64 * 1024 * 1024, max(32 * 1024 * 1024, 2 * est_bytes)))


def _q_tile(tq_total):
    """Query tile: full sequence when small, else a 256/512-aligned divisor."""
    if tq_total <= 512:
        return tq_total
    for t in (512, 256, 128, 64):
        if tq_total % t == 0:
            return t
    return tq_total


def _row_tile(n_rows, d, dff):
    """FFN row tile: as large as VMEM reasonably permits (mem-bound kernel)."""
    budget = 8 * 1024 * 1024
    per_row = 12 * d + 8 * dff              # rough f32 working-set bytes per row
    cap = max(256, min(2048, budget // max(per_row, 1)))
    if n_rows <= cap:
        return n_rows
    for t in (2048, 1024, 512, 256, 128, 64, 32, 16, 8):
        if t <= cap and n_rows % t == 0:
            return t
    return n_rows


def _attention_sublayer(x, kv, bias, ln_a, ln_b, ap, h, *, self_attention):
    """x + MHA(LN(x), kv, mask) as one fused pallas_call, grid=(B, Tq//tq)."""
    B, Tq, D = x.shape
    Tk = kv.shape[1]
    dk = D // h
    scale = 1.0 / math.sqrt(dk)
    tq = _q_tile(Tq)
    n_q = Tq // tq

    mb, mq, _ = bias.shape
    blk_mq = tq if mq != 1 else 1
    if mb == 1 and mq == 1:
        bias_map = lambda b, qi: (0, 0, 0)
    elif mb == 1:
        bias_map = lambda b, qi: (0, qi, 0)
    elif mq == 1:
        bias_map = lambda b, qi: (b, 0, 0)
    else:
        bias_map = lambda b, qi: (b, qi, 0)

    const = lambda b, qi: (0, 0)
    # Grid-invariant weight blocks: single-buffered (no point double-buffering).
    wspec = lambda shp: pl.BlockSpec(shp, const, pipeline_mode=pl.Buffered(1))
    vspec = lambda shp: pl.BlockSpec(shp, const)
    x_spec = pl.BlockSpec((1, tq, D), lambda b, qi: (b, qi, 0))
    out_spec = pl.BlockSpec((1, tq, D), lambda b, qi: (b, qi, 0))
    bias_spec = pl.BlockSpec((1, blk_mq, Tk), bias_map)
    scratch = [pltpu.VMEM((tq, D), jnp.float32)]     # concatenated head outputs

    if self_attention and n_q == 1:
        # Single query tile: reuse LN(x) as K/V source, fully fused QKV GEMM.
        kernel = functools.partial(_self_attn_kernel, h=h, scale=scale)
        in_specs = [x_spec, bias_spec, vspec((1, D)), vspec((1, D)),
                    wspec((D, 3 * D)), vspec((1, 3 * D)),
                    wspec((D, D)), vspec((1, D))]
        operands = (x, bias, ln_a, ln_b, ap["wqkv"], ap["bqkv"], ap["wo"], ap["bo"])
        w_bytes = 4 * D * D * 2 + 4 * D * 4
        kv_bytes = 0
    else:
        if self_attention:
            wq, bq = ap["wqkv"][:, :D], ap["bqkv"][:, :D]
            wkv, bkv = ap["wqkv"][:, D:], ap["bqkv"][:, D:]
        else:
            wq, bq, wkv, bkv = ap["wq"], ap["bq"], ap["wkv"], ap["bkv"]
        kernel = functools.partial(_cross_attn_kernel, h=h, scale=scale,
                                   normalize_kv=self_attention)
        kv_spec = pl.BlockSpec((1, Tk, D), lambda b, qi: (b, 0, 0))
        in_specs = [x_spec, kv_spec, bias_spec, vspec((1, D)), vspec((1, D)),
                    wspec((D, D)), vspec((1, D)),
                    wspec((D, 2 * D)), vspec((1, 2 * D)),
                    wspec((D, D)), vspec((1, D))]
        operands = (x, kv, bias, ln_a, ln_b, wq, bq, wkv, bkv, ap["wo"], ap["bo"])
        w_bytes = 4 * D * D * 2 + 4 * D * 4
        kv_bytes = 2 * Tk * D * 2

    est = (2 * tq * D * 2 + kv_bytes + 2 * blk_mq * Tk * 4 + w_bytes
           + 2 * tq * D * 2 + tq * D * 4
           + (tq + 2 * Tk) * D * 4 + 2 * tq * Tk * 4)

    return pl.pallas_call(
        kernel,
        out_shape=jax.ShapeDtypeStruct((B, Tq, D), BF),
        grid=(B, n_q),
        in_specs=in_specs,
        out_specs=out_spec,
        scratch_shapes=scratch,
        compiler_params=pltpu.CompilerParams(
            dimension_semantics=("parallel", "parallel"),
            vmem_limit_bytes=_vmem_limit(est)),
    )(*operands)


def _ffn_sublayer(x, ln_a, ln_b, w1, b1, w2, b2, *, final_ln=None):
    """x + FFN(LN(x)); one fused pallas_call tiled over B*T rows.
    Optionally fuses the decoder's final LayerNorm into the epilogue."""
    B, T, D = x.shape
    Dff = w1.shape[1]
    BT = B * T
    tm = _row_tile(BT, D, Dff)
    x2 = x.reshape(BT, D)
    apply_final = final_ln is not None
    out_dtype = jnp.float32 if apply_final else BF
    out_isz = 4 if apply_final else 2

    const = lambda i: (0, 0)
    in_specs = [
        pl.BlockSpec((tm, D), lambda i: (i, 0)),
        pl.BlockSpec((1, D), const),
        pl.BlockSpec((1, D), const),
        pl.BlockSpec((D, Dff), const, pipeline_mode=pl.Buffered(1)),
        pl.BlockSpec((1, Dff), const),
        pl.BlockSpec((Dff, D), const, pipeline_mode=pl.Buffered(1)),
        pl.BlockSpec((1, D), const),
    ]
    operands = [x2, ln_a, ln_b, w1, b1, w2, b2]
    if apply_final:
        fa, fb = final_ln
        in_specs += [pl.BlockSpec((1, D), const), pl.BlockSpec((1, D), const)]
        operands += [fa, fb]

    est = (2 * tm * D * 2 + 2 * tm * D * out_isz
           + 2 * D * Dff * 2 + (Dff + 5 * D) * 4
           + tm * (2 * D + Dff) * 4)

    kernel = functools.partial(_ffn_sublayer_kernel, apply_final_ln=apply_final)
    out = pl.pallas_call(
        kernel,
        out_shape=jax.ShapeDtypeStruct((BT, D), out_dtype),
        grid=(BT // tm,),
        in_specs=in_specs,
        out_specs=pl.BlockSpec((tm, D), lambda i: (i, 0)),
        compiler_params=pltpu.CompilerParams(
            dimension_semantics=("parallel",),
            vmem_limit_bytes=_vmem_limit(int(est))),
    )(*operands)
    return out.reshape(B, T, D)


def decoder_forward(params, x, memory, src_mask, tgt_mask, h):
    """Decoder.forward: N decoder layers, then the final LayerNorm (fused into
    the last FFN sublayer). Each layer is 3 fused pallas_calls."""
    x = x.astype(BF)
    memory = memory.astype(BF)
    # Hoisted mask compare: additive bias, reused by every layer (never
    # broadcast to [B*h, Tq, Tk] in HBM).
    tgt_bias = jnp.where(tgt_mask == 0, NEG_INF, 0.0).astype(jnp.float32)
    src_bias = jnp.where(src_mask == 0, NEG_INF, 0.0).astype(jnp.float32)

    layers = params["layers"]          # Decoder always has N >= 1 layers.
    n = len(layers)
    for i, lp in enumerate(layers):
        # SublayerConnection (pre-norm residual): x + sublayer(norm(x)), dropout off.
        x = _attention_sublayer(x, x, tgt_bias, lp["ln1_a"], lp["ln1_b"],
                                lp["self_attn"], h, self_attention=True)
        x = _attention_sublayer(x, memory, src_bias, lp["ln2_a"], lp["ln2_b"],
                                lp["src_attn"], h, self_attention=False)
        final_ln = (params["norm_a"], params["norm_b"]) if i == n - 1 else None
        x = _ffn_sublayer(x, lp["ln3_a"], lp["ln3_b"],
                          lp["w1"], lp["b1"], lp["w2"], lp["b2"],
                          final_ln=final_ln)
    return x


# ------------------------------ parameter init ------------------------------

def init_attn_params(key, D):
    ks = jax.random.split(key, 4)
    s = 1.0 / (D ** 0.5)
    return {
        "wq": jax.random.normal(ks[0], (D, D), jnp.float32) * s,
        "bq": jnp.zeros((D,), jnp.float32),
        "wk": jax.random.normal(ks[1], (D, D), jnp.float32) * s,
        "bk": jnp.zeros((D,), jnp.float32),
        "wv": jax.random.normal(ks[2], (D, D), jnp.float32) * s,
        "bv": jnp.zeros((D,), jnp.float32),
        "wo": jax.random.normal(ks[3], (D, D), jnp.float32) * s,
        "bo": jnp.zeros((D,), jnp.float32),
    }


def init_layer_params(key, D, Dff):
    ks = jax.random.split(key, 4)
    return {
        "self_attn": init_attn_params(ks[0], D),
        "src_attn": init_attn_params(ks[1], D),
        "w1": jax.random.normal(ks[2], (D, Dff), jnp.float32) / (D ** 0.5),
        "b1": jnp.zeros((Dff,), jnp.float32),
        "w2": jax.random.normal(ks[3], (Dff, D), jnp.float32) / (Dff ** 0.5),
        "b2": jnp.zeros((D,), jnp.float32),
        "ln1_a": jnp.ones((D,), jnp.float32), "ln1_b": jnp.zeros((D,), jnp.float32),
        "ln2_a": jnp.ones((D,), jnp.float32), "ln2_b": jnp.zeros((D,), jnp.float32),
        "ln3_a": jnp.ones((D,), jnp.float32), "ln3_b": jnp.zeros((D,), jnp.float32),
    }


def init_decoder_params(key, N, D, Dff):
    ks = jax.random.split(key, N)
    return {
        "layers": [init_layer_params(ks[i], D, Dff) for i in range(N)],
        "norm_a": jnp.ones((D,), jnp.float32),
        "norm_b": jnp.zeros((D,), jnp.float32),
    }


def prepare_decoder_params(raw):
    """One-time preparation: bf16 matmul weights (fused QKV / KV concat),
    f32 biases & LayerNorm params reshaped to (1, D) kernel blocks."""
    def row(v):
        return v.reshape(1, -1).astype(jnp.float32)

    def attn_self(ap):
        return {
            "wqkv": jnp.concatenate([ap["wq"], ap["wk"], ap["wv"]], axis=1).astype(BF),
            "bqkv": jnp.concatenate([ap["bq"], ap["bk"], ap["bv"]]).reshape(1, -1).astype(jnp.float32),
            "wo": ap["wo"].astype(BF),
            "bo": row(ap["bo"]),
        }

    def attn_cross(ap):
        return {
            "wq": ap["wq"].astype(BF),
            "bq": row(ap["bq"]),
            "wkv": jnp.concatenate([ap["wk"], ap["wv"]], axis=1).astype(BF),
            "bkv": jnp.concatenate([ap["bk"], ap["bv"]]).reshape(1, -1).astype(jnp.float32),
            "wo": ap["wo"].astype(BF),
            "bo": row(ap["bo"]),
        }

    layers = []
    for lp in raw["layers"]:
        layers.append({
            "self_attn": attn_self(lp["self_attn"]),
            "src_attn": attn_cross(lp["src_attn"]),
            "w1": lp["w1"].astype(BF), "b1": row(lp["b1"]),
            "w2": lp["w2"].astype(BF), "b2": row(lp["b2"]),
            "ln1_a": row(lp["ln1_a"]), "ln1_b": row(lp["ln1_b"]),
            "ln2_a": row(lp["ln2_a"]), "ln2_b": row(lp["ln2_b"]),
            "ln3_a": row(lp["ln3_a"]), "ln3_b": row(lp["ln3_b"]),
        })
    return {"layers": layers,
            "norm_a": row(raw["norm_a"]), "norm_b": row(raw["norm_b"])}


# ---------------------------------- main -------------------------------------

if __name__ == "__main__":
    B, T_TGT, T_SRC, D, H, DFF, N_LAYERS = 2, 8, 8, 32, 4, 64, 2

    root = jax.random.PRNGKey(0)
    k_params, k_x, k_mem = jax.random.split(root, 3)

    raw_params = init_decoder_params(k_params, N_LAYERS, D, DFF)
    params = prepare_decoder_params(raw_params)   # bf16 weights, fused QKV/KV

    x = jax.random.normal(k_x, (B, T_TGT, D), jnp.float32)         # decoder input
    memory = jax.random.normal(k_mem, (B, T_SRC, D), jnp.float32)  # encoder output

    # tgt_mask: causal (subsequent) mask [1, T, T]; src_mask: all-visible [B, 1, Ts]
    tgt_mask = jnp.tril(jnp.ones((1, T_TGT, T_TGT), jnp.float32))
    src_mask = jnp.ones((B, 1, T_SRC), jnp.float32)

    fwd = jax.jit(decoder_forward, static_argnames=("h",))
    out = fwd(params, x, memory, src_mask, tgt_mask, h=H)
    out = jax.block_until_ready(out)

    assert out.shape == (B, T_TGT, D)
    assert out.dtype == jnp.float32
    assert bool(jnp.all(jnp.isfinite(out)))
    print("KERNEL_OK")
</pallas_src>

<mosaic_0001>
module attributes {stable_mosaic.version = 11 : i64} {
  func.func @_cross_attn_kernel(%arg0: i32, %arg1: i32, %arg2: memref<1x8x32xbf16, #tpu.memory_space<vmem>>, %arg3: memref<1x8x32xbf16, #tpu.memory_space<vmem>>, %arg4: memref<1x1x8xf32, #tpu.memory_space<vmem>>, %arg5: memref<1x32xf32, #tpu.memory_space<vmem>>, %arg6: memref<1x32xf32, #tpu.memory_space<vmem>>, %arg7: memref<32x32xbf16, #tpu.memory_space<vmem>>, %arg8: memref<1x32xf32, #tpu.memory_space<vmem>>, %arg9: memref<32x64xbf16, #tpu.memory_space<vmem>>, %arg10: memref<1x64xf32, #tpu.memory_space<vmem>>, %arg11: memref<32x32xbf16, #tpu.memory_space<vmem>>, %arg12: memref<1x32xf32, #tpu.memory_space<vmem>>, %arg13: memref<1x8x32xbf16, #tpu.memory_space<vmem>>, %arg14: memref<8x32xf32, #tpu.memory_space<vmem>>) attributes {dimension_semantics = [#tpu.dimension_semantics<parallel>, #tpu.dimension_semantics<parallel>], iteration_bounds = array<i64: 2, 1>, scalar_prefetch = 0 : i64, scratch_operands = 1 : i64, tpu.core_type = #tpu.core_type<tc>, window_params = [{transform_indices = @transform_0, window_bounds = array<i64: 1, 8, 32>}, {transform_indices = @transform_1, window_bounds = array<i64: 1, 8, 32>}, {transform_indices = @transform_2, window_bounds = array<i64: 1, 1, 8>}, {pipeline_mode = #tpu.pipeline_mode<synchronous>, transform_indices = @transform_3, window_bounds = array<i64: 1, 32>}, {pipeline_mode = #tpu.pipeline_mode<synchronous>, transform_indices = @transform_4, window_bounds = array<i64: 1, 32>}, {pipeline_mode = #tpu.pipeline_mode<synchronous>, transform_indices = @transform_5, window_bounds = array<i64: 32, 32>}, {pipeline_mode = #tpu.pipeline_mode<synchronous>, transform_indices = @transform_6, window_bounds = array<i64: 1, 32>}, {pipeline_mode = #tpu.pipeline_mode<synchronous>, transform_indices = @transform_7, window_bounds = array<i64: 32, 64>}, {pipeline_mode = #tpu.pipeline_mode<synchronous>, transform_indices = @transform_8, window_bounds = array<i64: 1, 64>}, {pipeline_mode = #tpu.pipeline_mode<synchronous>, transform_indices = @transform_9, window_bounds = array<i64: 32, 32>}, {pipeline_mode = #tpu.pipeline_mode<synchronous>, transform_indices = @transform_10, window_bounds = array<i64: 1, 32>}, {transform_indices = @transform_11, window_bounds = array<i64: 1, 8, 32>}]} {
    %c0 = arith.constant 0 : index
    %c0_0 = arith.constant 0 : index
    %c0_1 = arith.constant 0 : index
    %0 = vector.load %arg2[%c0, %c0_0, %c0_1] : memref<1x8x32xbf16, #tpu.memory_space<vmem>>, vector<1x8x32xbf16>
    %1 = vector.shape_cast %0 : vector<1x8x32xbf16> to vector<8x32xbf16>
    %2 = arith.extf %1 : vector<8x32xbf16> to vector<8x32xf32>
    %c0_2 = arith.constant 0 : index
    %c0_3 = arith.constant 0 : index
    %3 = vector.load %arg5[%c0_2, %c0_3] : memref<1x32xf32, #tpu.memory_space<vmem>>, vector<1x32xf32>
    %c0_4 = arith.constant 0 : index
    %c0_5 = arith.constant 0 : index
    %4 = vector.load %arg6[%c0_4, %c0_5] : memref<1x32xf32, #tpu.memory_space<vmem>>, vector<1x32xf32>
    %cst = arith.constant dense<0.000000e+00> : vector<8xf32>
    %5 = vector.multi_reduction <add>, %2, %cst [1] : vector<8x32xf32> to vector<8xf32>
    %6 = vector.shape_cast %5 : vector<8xf32> to vector<8x1xf32>
    %cst_6 = arith.constant 3.200000e+01 : f32
    %7 = vector.broadcast %cst_6 : f32 to vector<8x1xf32>
    %8 = arith.divf %6, %7 : vector<8x1xf32>
    %9 = vector.broadcast %8 : vector<8x1xf32> to vector<8x32xf32>
    %10 = arith.subf %2, %9 : vector<8x32xf32>
    %11 = arith.mulf %10, %10 : vector<8x32xf32>
    %cst_7 = arith.constant dense<0.000000e+00> : vector<8xf32>
    %12 = vector.multi_reduction <add>, %11, %cst_7 [1] : vector<8x32xf32> to vector<8xf32>
    %13 = vector.shape_cast %12 : vector<8xf32> to vector<8x1xf32>
    %cst_8 = arith.constant 3.100000e+01 : f32
    %14 = vector.broadcast %cst_8 : f32 to vector<8x1xf32>
    %15 = arith.divf %13, %14 : vector<8x1xf32>
    %16 = math.sqrt %15 : vector<8x1xf32>
    %17 = vector.broadcast %3 : vector<1x32xf32> to vector<8x32xf32>
    %18 = arith.mulf %17, %10 : vector<8x32xf32>
    %cst_9 = arith.constant 9.99999997E-7 : f32
    %19 = vector.broadcast %cst_9 : f32 to vector<8x1xf32>
    %20 = arith.addf %16, %19 : vector<8x1xf32>
    %21 = vector.broadcast %20 : vector<8x1xf32> to vector<8x32xf32>
    %22 = arith.divf %18, %21 : vector<8x32xf32>
    %23 = vector.broadcast %4 : vector<1x32xf32> to vector<8x32xf32>
    %24 = arith.addf %22, %23 : vector<8x32xf32>
    %c0_10 = arith.constant 0 : index
    %c0_11 = arith.constant 0 : index
    %c0_12 = arith.constant 0 : index
    %25 = vector.load %arg3[%c0_10, %c0_11, %c0_12] : memref<1x8x32xbf16, #tpu.memory_space<vmem>>, vector<1x8x32xbf16>
    %26 = vector.shape_cast %25 : vector<1x8x32xbf16> to vector<8x32xbf16>
    %27 = arith.extf %26 : vector<8x32xbf16> to vector<8x32xf32>
    %28 = arith.truncf %24 : vector<8x32xf32> to vector<8x32xbf16>
    %c0_13 = arith.constant 0 : index
    %c0_14 = arith.constant 0 : index
    %29 = vector.load %arg7[%c0_13, %c0_14] : memref<32x32xbf16, #tpu.memory_space<vmem>>, vector<32x32xbf16>
    %cst_15 = arith.constant dense<0.000000e+00> : vector<8x32xf32>
    %30 = tpu.matmul %28, %29, %cst_15 {dimension_numbers = #tpu.dot_dimension_numbers<[1], [0], [0], [1], [0, 0, 1, 1], [], []>} : vector<8x32xbf16>, vector<32x32xbf16>, vector<8x32xf32> -> vector<8x32xf32>
    %c0_16 = arith.constant 0 : index
    %c0_17 = arith.constant 0 : index
    %31 = vector.load %arg8[%c0_16, %c0_17] : memref<1x32xf32, #tpu.memory_space<vmem>>, vector<1x32xf32>
    %32 = vector.broadcast %31 : vector<1x32xf32> to vector<8x32xf32>
    %33 = arith.addf %30, %32 : vector<8x32xf32>
    %cst_18 = arith.constant 0.353553385 : f32
    %34 = vector.broadcast %cst_18 : f32 to vector<8x32xf32>
    %35 = arith.mulf %33, %34 : vector<8x32xf32>
    %36 = arith.truncf %27 : vector<8x32xf32> to vector<8x32xbf16>
    %c0_19 = arith.constant 0 : index
    %c0_20 = arith.constant 0 : index
    %37 = vector.load %arg9[%c0_19, %c0_20] : memref<32x64xbf16, #tpu.memory_space<vmem>>, vector<32x64xbf16>
    %cst_21 = arith.constant dense<0.000000e+00> : vector<8x64xf32>
    %38 = tpu.matmul %36, %37, %cst_21 {dimension_numbers = #tpu.dot_dimension_numbers<[1], [0], [0], [1], [0, 0, 1, 1], [], []>} : vector<8x32xbf16>, vector<32x64xbf16>, vector<8x64xf32> -> vector<8x64xf32>
    %c0_22 = arith.constant 0 : index
    %c0_23 = arith.constant 0 : index
    %39 = vector.load %arg10[%c0_22, %c0_23] : memref<1x64xf32, #tpu.memory_space<vmem>>, vector<1x64xf32>
    %40 = vector.broadcast %39 : vector<1x64xf32> to vector<8x64xf32>
    %41 = arith.addf %38, %40 : vector<8x64xf32>
    %42 = vector.extract_strided_slice %41 {offsets = [0, 0], sizes = [8, 32], strides = [1, 1]} : vector<8x64xf32> to vector<8x32xf32>
    %43 = vector.extract_strided_slice %41 {offsets = [0, 32], sizes = [8, 32], strides = [1, 1]} : vector<8x64xf32> to vector<8x32xf32>
    %c0_24 = arith.constant 0 : index
    %c0_25 = arith.constant 0 : index
    %c0_26 = arith.constant 0 : index
    %44 = vector.load %arg4[%c0_24, %c0_25, %c0_26] : memref<1x1x8xf32, #tpu.memory_space<vmem>>, vector<1x1x8xf32>
    %45 = vector.shape_cast %44 : vector<1x1x8xf32> to vector<1x8xf32>
    %46 = vector.extract_strided_slice %35 {offsets = [0, 0], sizes = [8, 8], strides = [1, 1]} : vector<8x32xf32> to vector<8x8xf32>
    %47 = arith.truncf %46 : vector<8x8xf32> to vector<8x8xbf16>
    %48 = vector.extract_strided_slice %42 {offsets = [0, 0], sizes = [8, 8], strides = [1, 1]} : vector<8x32xf32> to vector<8x8xf32>
    %49 = arith.truncf %48 : vector<8x8xf32> to vector<8x8xbf16>
    %cst_27 = arith.constant dense<0.000000e+00> : vector<8x8xf32>
    %50 = tpu.matmul %47, %49, %cst_27 {dimension_numbers = #tpu.dot_dimension_numbers<[1], [1], [0], [0], [0, 0, 1, 0], [], []>} : vector<8x8xbf16>, vector<8x8xbf16>, vector<8x8xf32> -> vector<8x8xf32>
    %51 = vector.broadcast %45 : vector<1x8xf32> to vector<8x8xf32>
    %52 = arith.addf %50, %51 : vector<8x8xf32>
    %cst_28 = arith.constant dense<0xFF800000> : vector<8xf32>
    %53 = vector.multi_reduction <maximumf>, %52, %cst_28 [1] : vector<8x8xf32> to vector<8xf32>
    %54 = vector.shape_cast %53 : vector<8xf32> to vector<8x1xf32>
    %55 = vector.broadcast %54 : vector<8x1xf32> to vector<8x8xf32>
    %56 = arith.subf %52, %55 : vector<8x8xf32>
    %57 = math.exp %56 : vector<8x8xf32>
    %cst_29 = arith.constant dense<0.000000e+00> : vector<8xf32>
    %58 = vector.multi_reduction <add>, %57, %cst_29 [1] : vector<8x8xf32> to vector<8xf32>
    %59 = vector.shape_cast %58 : vector<8xf32> to vector<8x1xf32>
    %60 = tpu.reciprocal %59 {approx = true} : vector<8x1xf32> -> vector<8x1xf32>
    %61 = vector.broadcast %60 : vector<8x1xf32> to vector<8x8xf32>
    %62 = arith.mulf %57, %61 : vector<8x8xf32>
    %63 = arith.truncf %62 : vector<8x8xf32> to vector<8x8xbf16>
    %64 = vector.extract_strided_slice %43 {offsets = [0, 0], sizes = [8, 8], strides = [1, 1]} : vector<8x32xf32> to vector<8x8xf32>
    %65 = arith.truncf %64 : vector<8x8xf32> to vector<8x8xbf16>
    %cst_30 = arith.constant dense<0.000000e+00> : vector<8x8xf32>
    %66 = tpu.matmul %63, %65, %cst_30 {dimension_numbers = #tpu.dot_dimension_numbers<[1], [0], [0], [1], [0, 0, 1, 1], [], []>} : vector<8x8xbf16>, vector<8x8xbf16>, vector<8x8xf32> -> vector<8x8xf32>
    %c0_31 = arith.constant 0 : index
    %c0_32 = arith.constant 0 : index
    %67 = vector.load %arg14[%c0_31, %c0_32] : memref<8x32xf32, #tpu.memory_space<vmem>>, vector<8x8xf32>
    tpu.vector_store %arg14[%c0_31, %c0_32], %66 {strides = array<i32>} : memref<8x32xf32, #tpu.memory_space<vmem>>, vector<8x8xf32>,
    %68 = vector.extract_strided_slice %35 {offsets = [0, 8], sizes = [8, 8], strides = [1, 1]} : vector<8x32xf32> to vector<8x8xf32>
    %69 = arith.truncf %68 : vector<8x8xf32> to vector<8x8xbf16>
    %70 = vector.extract_strided_slice %42 {offsets = [0, 8], sizes = [8, 8], strides = [1, 1]} : vector<8x32xf32> to vector<8x8xf32>
    %71 = arith.truncf %70 : vector<8x8xf32> to vector<8x8xbf16>
    %cst_33 = arith.constant dense<0.000000e+00> : vector<8x8xf32>
    %72 = tpu.matmul %69, %71, %cst_33 {dimension_numbers = #tpu.dot_dimension_numbers<[1], [1], [0], [0], [0, 0, 1, 0], [], []>} : vector<8x8xbf16>, vector<8x8xbf16>, vector<8x8xf32> -> vector<8x8xf32>
    %73 = vector.broadcast %45 : vector<1x8xf32> to vector<8x8xf32>
    %74 = arith.addf %72, %73 : vector<8x8xf32>
    %cst_34 = arith.constant dense<0xFF800000> : vector<8xf32>
    %75 = vector.multi_reduction <maximumf>, %74, %cst_34 [1] : vector<8x8xf32> to vector<8xf32>
    %76 = vector.shape_cast %75 : vector<8xf32> to vector<8x1xf32>
    %77 = vector.broadcast %76 : vector<8x1xf32> to vector<8x8xf32>
    %78 = arith.subf %74, %77 : vector<8x8xf32>
    %79 = math.exp %78 : vector<8x8xf32>
    %cst_35 = arith.constant dense<0.000000e+00> : vector<8xf32>
    %80 = vector.multi_reduction <add>, %79, %cst_35 [1] : vector<8x8xf32> to vector<8xf32>
    %81 = vector.shape_cast %80 : vector<8xf32> to vector<8x1xf32>
    %82 = tpu.reciprocal %81 {approx = true} : vector<8x1xf32> -> vector<8x1xf32>
    %83 = vector.broadcast %82 : vector<8x1xf32> to vector<8x8xf32>
    %84 = arith.mulf %79, %83 : vector<8x8xf32>
    %85 = arith.truncf %84 : vector<8x8xf32> to vector<8x8xbf16>
    %86 = vector.extract_strided_slice %43 {offsets = [0, 8], sizes = [8, 8], strides = [1, 1]} : vector<8x32xf32> to vector<8x8xf32>
    %87 = arith.truncf %86 : vector<8x8xf32> to vector<8x8xbf16>
    %cst_36 = arith.constant dense<0.000000e+00> : vector<8x8xf32>
    %88 = tpu.matmul %85, %87, %cst_36 {dimension_numbers = #tpu.dot_dimension_numbers<[1], [0], [0], [1], [0, 0, 1, 1], [], []>} : vector<8x8xbf16>, vector<8x8xbf16>, vector<8x8xf32> -> vector<8x8xf32>
    %c0_37 = arith.constant 0 : index
    %c8 = arith.constant 8 : index
    %89 = vector.load %arg14[%c0_37, %c8] : memref<8x32xf32, #tpu.memory_space<vmem>>, vector<8x8xf32>
    tpu.vector_store %arg14[%c0_37, %c8], %88 {strides = array<i32>} : memref<8x32xf32, #tpu.memory_space<vmem>>, vector<8x8xf32>,
    %90 = vector.extract_strided_slice %35 {offsets = [0, 16], sizes = [8, 8], strides = [1, 1]} : vector<8x32xf32> to vector<8x8xf32>
    %91 = arith.truncf %90 : vector<8x8xf32> to vector<8x8xbf16>
    %92 = vector.extract_strided_slice %42 {offsets = [0, 16], sizes = [8, 8], strides = [1, 1]} : vector<8x32xf32> to vector<8x8xf32>
    %93 = arith.truncf %92 : vector<8x8xf32> to vector<8x8xbf16>
    %cst_38 = arith.constant dense<0.000000e+00> : vector<8x8xf32>
    %94 = tpu.matmul %91, %93, %cst_38 {dimension_numbers = #tpu.dot_dimension_numbers<[1], [1], [0], [0], [0, 0, 1, 0], [], []>} : vector<8x8xbf16>, vector<8x8xbf16>, vector<8x8xf32> -> vector<8x8xf32>
    %95 = vector.broadcast %45 : vector<1x8xf32> to vector<8x8xf32>
    %96 = arith.addf %94, %95 : vector<8x8xf32>
    %cst_39 = arith.constant dense<0xFF800000> : vector<8xf32>
    %97 = vector.multi_reduction <maximumf>, %96, %cst_39 [1] : vector<8x8xf32> to vector<8xf32>
    %98 = vector.shape_cast %97 : vector<8xf32> to vector<8x1xf32>
    %99 = vector.broadcast %98 : vector<8x1xf32> to vector<8x8xf32>
    %100 = arith.subf %96, %99 : vector<8x8xf32>
    %101 = math.exp %100 : vector<8x8xf32>
    %cst_40 = arith.constant dense<0.000000e+00> : vector<8xf32>
    %102 = vector.multi_reduction <add>, %101, %cst_40 [1] : vector<8x8xf32> to vector<8xf32>
    %103 = vector.shape_cast %102 : vector<8xf32> to vector<8x1xf32>
    %104 = tpu.reciprocal %103 {approx = true} : vector<8x1xf32> -> vector<8x1xf32>
    %105 = vector.broadcast %104 : vector<8x1xf32> to vector<8x8xf32>
    %106 = arith.mulf %101, %105 : vector<8x8xf32>
    %107 = arith.truncf %106 : vector<8x8xf32> to vector<8x8xbf16>
    %108 = vector.extract_strided_slice %43 {offsets = [0, 16], sizes = [8, 8], strides = [1, 1]} : vector<8x32xf32> to vector<8x8xf32>
    %109 = arith.truncf %108 : vector<8x8xf32> to vector<8x8xbf16>
    %cst_41 = arith.constant dense<0.000000e+00> : vector<8x8xf32>
    %110 = tpu.matmul %107, %109, %cst_41 {dimension_numbers = #tpu.dot_dimension_numbers<[1], [0], [0], [1], [0, 0, 1, 1], [], []>} : vector<8x8xbf16>, vector<8x8xbf16>, vector<8x8xf32> -> vector<8x8xf32>
    %c0_42 = arith.constant 0 : index
    %c16 = arith.constant 16 : index
    %111 = vector.load %arg14[%c0_42, %c16] : memref<8x32xf32, #tpu.memory_space<vmem>>, vector<8x8xf32>
    tpu.vector_store %arg14[%c0_42, %c16], %110 {strides = array<i32>} : memref<8x32xf32, #tpu.memory_space<vmem>>, vector<8x8xf32>,
    %112 = vector.extract_strided_slice %35 {offsets = [0, 24], sizes = [8, 8], strides = [1, 1]} : vector<8x32xf32> to vector<8x8xf32>
    %113 = arith.truncf %112 : vector<8x8xf32> to vector<8x8xbf16>
    %114 = vector.extract_strided_slice %42 {offsets = [0, 24], sizes = [8, 8], strides = [1, 1]} : vector<8x32xf32> to vector<8x8xf32>
    %115 = arith.truncf %114 : vector<8x8xf32> to vector<8x8xbf16>
    %cst_43 = arith.constant dense<0.000000e+00> : vector<8x8xf32>
    %116 = tpu.matmul %113, %115, %cst_43 {dimension_numbers = #tpu.dot_dimension_numbers<[1], [1], [0], [0], [0, 0, 1, 0], [], []>} : vector<8x8xbf16>, vector<8x8xbf16>, vector<8x8xf32> -> vector<8x8xf32>
    %117 = vector.broadcast %45 : vector<1x8xf32> to vector<8x8xf32>
    %118 = arith.addf %116, %117 : vector<8x8xf32>
    %cst_44 = arith.constant dense<0xFF800000> : vector<8xf32>
    %119 = vector.multi_reduction <maximumf>, %118, %cst_44 [1] : vector<8x8xf32> to vector<8xf32>
    %120 = vector.shape_cast %119 : vector<8xf32> to vector<8x1xf32>
    %121 = vector.broadcast %120 : vector<8x1xf32> to vector<8x8xf32>
    %122 = arith.subf %118, %121 : vector<8x8xf32>
    %123 = math.exp %122 : vector<8x8xf32>
    %cst_45 = arith.constant dense<0.000000e+00> : vector<8xf32>
    %124 = vector.multi_reduction <add>, %123, %cst_45 [1] : vector<8x8xf32> to vector<8xf32>
    %125 = vector.shape_cast %124 : vector<8xf32> to vector<8x1xf32>
    %126 = tpu.reciprocal %125 {approx = true} : vector<8x1xf32> -> vector<8x1xf32>
    %127 = vector.broadcast %126 : vector<8x1xf32> to vector<8x8xf32>
    %128 = arith.mulf %123, %127 : vector<8x8xf32>
    %129 = arith.truncf %128 : vector<8x8xf32> to vector<8x8xbf16>
    %130 = vector.extract_strided_slice %43 {offsets = [0, 24], sizes = [8, 8], strides = [1, 1]} : vector<8x32xf32> to vector<8x8xf32>
    %131 = arith.truncf %130 : vector<8x8xf32> to vector<8x8xbf16>
    %cst_46 = arith.constant dense<0.000000e+00> : vector<8x8xf32>
    %132 = tpu.matmul %129, %131, %cst_46 {dimension_numbers = #tpu.dot_dimension_numbers<[1], [0], [0], [1], [0, 0, 1, 1], [], []>} : vector<8x8xbf16>, vector<8x8xbf16>, vector<8x8xf32> -> vector<8x8xf32>
    %c0_47 = arith.constant 0 : index
    %c24 = arith.constant 24 : index
    %133 = vector.load %arg14[%c0_47, %c24] : memref<8x32xf32, #tpu.memory_space<vmem>>, vector<8x8xf32>
    tpu.vector_store %arg14[%c0_47, %c24], %132 {strides = array<i32>} : memref<8x32xf32, #tpu.memory_space<vmem>>, vector<8x8xf32>,
    %c0_48 = arith.constant 0 : index
    %c0_49 = arith.constant 0 : index
    %134 = vector.load %arg14[%c0_48, %c0_49] : memref<8x32xf32, #tpu.memory_space<vmem>>, vector<8x32xf32>
    %135 = arith.truncf %134 : vector<8x32xf32> to vector<8x32xbf16>
    %c0_50 = arith.constant 0 : index
    %c0_51 = arith.constant 0 : index
    %136 = vector.load %arg11[%c0_50, %c0_51] : memref<32x32xbf16, #tpu.memory_space<vmem>>, vector<32x32xbf16>
    %cst_52 = arith.constant dense<0.000000e+00> : vector<8x32xf32>
    %137 = tpu.matmul %135, %136, %cst_52 {dimension_numbers = #tpu.dot_dimension_numbers<[1], [0], [0], [1], [0, 0, 1, 1], [], []>} : vector<8x32xbf16>, vector<32x32xbf16>, vector<8x32xf32> -> vector<8x32xf32>
    %138 = arith.addf %2, %137 : vector<8x32xf32>
    %c0_53 = arith.constant 0 : index
    %c0_54 = arith.constant 0 : index
    %139 = vector.load %arg12[%c0_53, %c0_54] : memref<1x32xf32, #tpu.memory_space<vmem>>, vector<1x32xf32>
    %140 = vector.broadcast %139 : vector<1x32xf32> to vector<8x32xf32>
    %141 = arith.addf %138, %140 : vector<8x32xf32>
    %142 = arith.truncf %141 : vector<8x32xf32> to vector<8x32xbf16>
    %c0_55 = arith.constant 0 : index
    %c0_56 = arith.constant 0 : index
    %c0_57 = arith.constant 0 : index
    %143 = vector.load %arg13[%c0_55, %c0_56, %c0_57] : memref<1x8x32xbf16, #tpu.memory_space<vmem>>, vector<1x8x32xbf16>
    %144 = vector.shape_cast %143 : vector<1x8x32xbf16> to vector<8x32xbf16>
    %145 = vector.shape_cast %142 : vector<8x32xbf16> to vector<1x8x32xbf16>
    tpu.vector_store %arg13[%c0_55, %c0_56, %c0_57], %145 {strides = array<i32>} : memref<1x8x32xbf16, #tpu.memory_space<vmem>>, vector<1x8x32xbf16>,
    return
  }
  func.func @transform_0(%arg0: i32, %arg1: i32) -> (i32, i32, i32) {
    %c0_i32 = arith.constant 0 : i32
    %c0_i32_0 = arith.constant 0 : i32
    return %arg0, %arg1, %c0_i32 : i32, i32, i32
  }
  func.func @transform_1(%arg0: i32, %arg1: i32) -> (i32, i32, i32) {
    %c0_i32 = arith.constant 0 : i32
    %c0_i32_0 = arith.constant 0 : i32
    %c0_i32_1 = arith.constant 0 : i32
    return %arg0, %c0_i32, %c0_i32_0 : i32, i32, i32
  }
  func.func @transform_2(%arg0: i32, %arg1: i32) -> (i32, i32, i32) {
    %c0_i32 = arith.constant 0 : i32
    %c0_i32_0 = arith.constant 0 : i32
    %c0_i32_1 = arith.constant 0 : i32
    return %arg0, %c0_i32, %c0_i32_0 : i32, i32, i32
  }
  func.func @transform_3(%arg0: i32, %arg1: i32) -> (i32, i32) {
    %c0_i32 = arith.constant 0 : i32
    %c0_i32_0 = arith.constant 0 : i32
    %c0_i32_1 = arith.constant 0 : i32
    return %c0_i32, %c0_i32_0 : i32, i32
  }
  func.func @transform_4(%arg0: i32, %arg1: i32) -> (i32, i32) {
    %c0_i32 = arith.constant 0 : i32
    %c0_i32_0 = arith.constant 0 : i32
    %c0_i32_1 = arith.constant 0 : i32
    return %c0_i32, %c0_i32_0 : i32, i32
  }
  func.func @transform_5(%arg0: i32, %arg1: i32) -> (i32, i32) {
    %c0_i32 = arith.constant 0 : i32
    %c0_i32_0 = arith.constant 0 : i32
    %c0_i32_1 = arith.constant 0 : i32
    return %c0_i32, %c0_i32_0 : i32, i32
  }
  func.func @transform_6(%arg0: i32, %arg1: i32) -> (i32, i32) {
    %c0_i32 = arith.constant 0 : i32
    %c0_i32_0 = arith.constant 0 : i32
    %c0_i32_1 = arith.constant 0 : i32
    return %c0_i32, %c0_i32_0 : i32, i32
  }
  func.func @transform_7(%arg0: i32, %arg1: i32) -> (i32, i32) {
    %c0_i32 = arith.constant 0 : i32
    %c0_i32_0 = arith.constant 0 : i32
    %c0_i32_1 = arith.constant 0 : i32
    return %c0_i32, %c0_i32_0 : i32, i32
  }
  func.func @transform_8(%arg0: i32, %arg1: i32) -> (i32, i32) {
    %c0_i32 = arith.constant 0 : i32
    %c0_i32_0 = arith.constant 0 : i32
    %c0_i32_1 = arith.constant 0 : i32
    return %c0_i32, %c0_i32_0 : i32, i32
  }
  func.func @transform_9(%arg0: i32, %arg1: i32) -> (i32, i32) {
    %c0_i32 = arith.constant 0 : i32
    %c0_i32_0 = arith.constant 0 : i32
    %c0_i32_1 = arith.constant 0 : i32
    return %c0_i32, %c0_i32_0 : i32, i32
  }
  func.func @transform_10(%arg0: i32, %arg1: i32) -> (i32, i32) {
    %c0_i32 = arith.constant 0 : i32
    %c0_i32_0 = arith.constant 0 : i32
    %c0_i32_1 = arith.constant 0 : i32
    return %c0_i32, %c0_i32_0 : i32, i32
  }
  func.func @transform_11(%arg0: i32, %arg1: i32) -> (i32, i32, i32) {
    %c0_i32 = arith.constant 0 : i32
    %c0_i32_0 = arith.constant 0 : i32
    return %arg0, %arg1, %c0_i32 : i32, i32, i32
  }
}

module attributes {stable_mosaic.version = 11 : i64} {
  func.func @_self_attn_kernel(%arg0: i32, %arg1: i32, %arg2: memref<1x8x32xbf16, #tpu.memory_space<vmem>>, %arg3: memref<1x8x8xf32, #tpu.memory_space<vmem>>, %arg4: memref<1x32xf32, #tpu.memory_space<vmem>>, %arg5: memref<1x32xf32, #tpu.memory_space<vmem>>, %arg6: memref<32x96xbf16, #tpu.memory_space<vmem>>, %arg7: memref<1x96xf32, #tpu.memory_space<vmem>>, %arg8: memref<32x32xbf16, #tpu.memory_space<vmem>>, %arg9: memref<1x32xf32, #tpu.memory_space<vmem>>, %arg10: memref<1x8x32xbf16, #tpu.memory_space<vmem>>, %arg11: memref<8x32xf32, #tpu.memory_space<vmem>>) attributes {dimension_semantics = [#tpu.dimension_semantics<parallel>, #tpu.dimension_semantics<parallel>], iteration_bounds = array<i64: 2, 1>, scalar_prefetch = 0 : i64, scratch_operands = 1 : i64, tpu.core_type = #tpu.core_type<tc>, window_params = [{transform_indices = @transform_0, window_bounds = array<i64: 1, 8, 32>}, {transform_indices = @transform_1, window_bounds = array<i64: 1, 8, 8>}, {pipeline_mode = #tpu.pipeline_mode<synchronous>, transform_indices = @transform_2, window_bounds = array<i64: 1, 32>}, {pipeline_mode = #tpu.pipeline_mode<synchronous>, transform_indices = @transform_3, window_bounds = array<i64: 1, 32>}, {pipeline_mode = #tpu.pipeline_mode<synchronous>, transform_indices = @transform_4, window_bounds = array<i64: 32, 96>}, {pipeline_mode = #tpu.pipeline_mode<synchronous>, transform_indices = @transform_5, window_bounds = array<i64: 1, 96>}, {pipeline_mode = #tpu.pipeline_mode<synchronous>, transform_indices = @transform_6, window_bounds = array<i64: 32, 32>}, {pipeline_mode = #tpu.pipeline_mode<synchronous>, transform_indices = @transform_7, window_bounds = array<i64: 1, 32>}, {transform_indices = @transform_8, window_bounds = array<i64: 1, 8, 32>}]} {
    %c0 = arith.constant 0 : index
    %c0_0 = arith.constant 0 : index
    %c0_1 = arith.constant 0 : index
    %0 = vector.load %arg2[%c0, %c0_0, %c0_1] : memref<1x8x32xbf16, #tpu.memory_space<vmem>>, vector<1x8x32xbf16>
    %1 = vector.shape_cast %0 : vector<1x8x32xbf16> to vector<8x32xbf16>
    %2 = arith.extf %1 : vector<8x32xbf16> to vector<8x32xf32>
    %c0_2 = arith.constant 0 : index
    %c0_3 = arith.constant 0 : index
    %3 = vector.load %arg4[%c0_2, %c0_3] : memref<1x32xf32, #tpu.memory_space<vmem>>, vector<1x32xf32>
    %c0_4 = arith.constant 0 : index
    %c0_5 = arith.constant 0 : index
    %4 = vector.load %arg5[%c0_4, %c0_5] : memref<1x32xf32, #tpu.memory_space<vmem>>, vector<1x32xf32>
    %cst = arith.constant dense<0.000000e+00> : vector<8xf32>
    %5 = vector.multi_reduction <add>, %2, %cst [1] : vector<8x32xf32> to vector<8xf32>
    %6 = vector.shape_cast %5 : vector<8xf32> to vector<8x1xf32>
    %cst_6 = arith.constant 3.200000e+01 : f32
    %7 = vector.broadcast %cst_6 : f32 to vector<8x1xf32>
    %8 = arith.divf %6, %7 : vector<8x1xf32>
    %9 = vector.broadcast %8 : vector<8x1xf32> to vector<8x32xf32>
    %10 = arith.subf %2, %9 : vector<8x32xf32>
    %11 = arith.mulf %10, %10 : vector<8x32xf32>
    %cst_7 = arith.constant dense<0.000000e+00> : vector<8xf32>
    %12 = vector.multi_reduction <add>, %11, %cst_7 [1] : vector<8x32xf32> to vector<8xf32>
    %13 = vector.shape_cast %12 : vector<8xf32> to vector<8x1xf32>
    %cst_8 = arith.constant 3.100000e+01 : f32
    %14 = vector.broadcast %cst_8 : f32 to vector<8x1xf32>
    %15 = arith.divf %13, %14 : vector<8x1xf32>
    %16 = math.sqrt %15 : vector<8x1xf32>
    %17 = vector.broadcast %3 : vector<1x32xf32> to vector<8x32xf32>
    %18 = arith.mulf %17, %10 : vector<8x32xf32>
    %cst_9 = arith.constant 9.99999997E-7 : f32
    %19 = vector.broadcast %cst_9 : f32 to vector<8x1xf32>
    %20 = arith.addf %16, %19 : vector<8x1xf32>
    %21 = vector.broadcast %20 : vector<8x1xf32> to vector<8x32xf32>
    %22 = arith.divf %18, %21 : vector<8x32xf32>
    %23 = vector.broadcast %4 : vector<1x32xf32> to vector<8x32xf32>
    %24 = arith.addf %22, %23 : vector<8x32xf32>
    %25 = arith.truncf %24 : vector<8x32xf32> to vector<8x32xbf16>
    %c0_10 = arith.constant 0 : index
    %c0_11 = arith.constant 0 : index
    %26 = vector.load %arg6[%c0_10, %c0_11] : memref<32x96xbf16, #tpu.memory_space<vmem>>, vector<32x96xbf16>
    %cst_12 = arith.constant dense<0.000000e+00> : vector<8x96xf32>
    %27 = tpu.matmul %25, %26, %cst_12 {dimension_numbers = #tpu.dot_dimension_numbers<[1], [0], [0], [1], [0, 0, 1, 1], [], []>} : vector<8x32xbf16>, vector<32x96xbf16>, vector<8x96xf32> -> vector<8x96xf32>
    %c0_13 = arith.constant 0 : index
    %c0_14 = arith.constant 0 : index
    %28 = vector.load %arg7[%c0_13, %c0_14] : memref<1x96xf32, #tpu.memory_space<vmem>>, vector<1x96xf32>
    %29 = vector.broadcast %28 : vector<1x96xf32> to vector<8x96xf32>
    %30 = arith.addf %27, %29 : vector<8x96xf32>
    %31 = vector.extract_strided_slice %30 {offsets = [0, 0], sizes = [8, 32], strides = [1, 1]} : vector<8x96xf32> to vector<8x32xf32>
    %cst_15 = arith.constant 0.353553385 : f32
    %32 = vector.broadcast %cst_15 : f32 to vector<8x32xf32>
    %33 = arith.mulf %31, %32 : vector<8x32xf32>
    %34 = vector.extract_strided_slice %30 {offsets = [0, 32], sizes = [8, 32], strides = [1, 1]} : vector<8x96xf32> to vector<8x32xf32>
    %35 = vector.extract_strided_slice %30 {offsets = [0, 64], sizes = [8, 32], strides = [1, 1]} : vector<8x96xf32> to vector<8x32xf32>
    %c0_16 = arith.constant 0 : index
    %c0_17 = arith.constant 0 : index
    %c0_18 = arith.constant 0 : index
    %36 = vector.load %arg3[%c0_16, %c0_17, %c0_18] : memref<1x8x8xf32, #tpu.memory_space<vmem>>, vector<1x8x8xf32>
    %37 = vector.shape_cast %36 : vector<1x8x8xf32> to vector<8x8xf32>
    %38 = vector.extract_strided_slice %33 {offsets = [0, 0], sizes = [8, 8], strides = [1, 1]} : vector<8x32xf32> to vector<8x8xf32>
    %39 = arith.truncf %38 : vector<8x8xf32> to vector<8x8xbf16>
    %40 = vector.extract_strided_slice %34 {offsets = [0, 0], sizes = [8, 8], strides = [1, 1]} : vector<8x32xf32> to vector<8x8xf32>
    %41 = arith.truncf %40 : vector<8x8xf32> to vector<8x8xbf16>
    %cst_19 = arith.constant dense<0.000000e+00> : vector<8x8xf32>
    %42 = tpu.matmul %39, %41, %cst_19 {dimension_numbers = #tpu.dot_dimension_numbers<[1], [1], [0], [0], [0, 0, 1, 0], [], []>} : vector<8x8xbf16>, vector<8x8xbf16>, vector<8x8xf32> -> vector<8x8xf32>
    %43 = arith.addf %42, %37 : vector<8x8xf32>
    %cst_20 = arith.constant dense<0xFF800000> : vector<8xf32>
    %44 = vector.multi_reduction <maximumf>, %43, %cst_20 [1] : vector<8x8xf32> to vector<8xf32>
    %45 = vector.shape_cast %44 : vector<8xf32> to vector<8x1xf32>
    %46 = vector.broadcast %45 : vector<8x1xf32> to vector<8x8xf32>
    %47 = arith.subf %43, %46 : vector<8x8xf32>
    %48 = math.exp %47 : vector<8x8xf32>
    %cst_21 = arith.constant dense<0.000000e+00> : vector<8xf32>
    %49 = vector.multi_reduction <add>, %48, %cst_21 [1] : vector<8x8xf32> to vector<8xf32>
    %50 = vector.shape_cast %49 : vector<8xf32> to vector<8x1xf32>
    %51 = tpu.reciprocal %50 {approx = true} : vector<8x1xf32> -> vector<8x1xf32>
    %52 = vector.broadcast %51 : vector<8x1xf32> to vector<8x8xf32>
    %53 = arith.mulf %48, %52 : vector<8x8xf32>
    %54 = arith.truncf %53 : vector<8x8xf32> to vector<8x8xbf16>
    %55 = vector.extract_strided_slice %35 {offsets = [0, 0], sizes = [8, 8], strides = [1, 1]} : vector<8x32xf32> to vector<8x8xf32>
    %56 = arith.truncf %55 : vector<8x8xf32> to vector<8x8xbf16>
    %cst_22 = arith.constant dense<0.000000e+00> : vector<8x8xf32>
    %57 = tpu.matmul %54, %56, %cst_22 {dimension_numbers = #tpu.dot_dimension_numbers<[1], [0], [0], [1], [0, 0, 1, 1], [], []>} : vector<8x8xbf16>, vector<8x8xbf16>, vector<8x8xf32> -> vector<8x8xf32>
    %c0_23 = arith.constant 0 : index
    %c0_24 = arith.constant 0 : index
    %58 = vector.load %arg11[%c0_23, %c0_24] : memref<8x32xf32, #tpu.memory_space<vmem>>, vector<8x8xf32>
    tpu.vector_store %arg11[%c0_23, %c0_24], %57 {strides = array<i32>} : memref<8x32xf32, #tpu.memory_space<vmem>>, vector<8x8xf32>,
    %59 = vector.extract_strided_slice %33 {offsets = [0, 8], sizes = [8, 8], strides = [1, 1]} : vector<8x32xf32> to vector<8x8xf32>
    %60 = arith.truncf %59 : vector<8x8xf32> to vector<8x8xbf16>
    %61 = vector.extract_strided_slice %34 {offsets = [0, 8], sizes = [8, 8], strides = [1, 1]} : vector<8x32xf32> to vector<8x8xf32>
    %62 = arith.truncf %61 : vector<8x8xf32> to vector<8x8xbf16>
    %cst_25 = arith.constant dense<0.000000e+00> : vector<8x8xf32>
    %63 = tpu.matmul %60, %62, %cst_25 {dimension_numbers = #tpu.dot_dimension_numbers<[1], [1], [0], [0], [0, 0, 1, 0], [], []>} : vector<8x8xbf16>, vector<8x8xbf16>, vector<8x8xf32> -> vector<8x8xf32>
    %64 = arith.addf %63, %37 : vector<8x8xf32>
    %cst_26 = arith.constant dense<0xFF800000> : vector<8xf32>
    %65 = vector.multi_reduction <maximumf>, %64, %cst_26 [1] : vector<8x8xf32> to vector<8xf32>
    %66 = vector.shape_cast %65 : vector<8xf32> to vector<8x1xf32>
    %67 = vector.broadcast %66 : vector<8x1xf32> to vector<8x8xf32>
    %68 = arith.subf %64, %67 : vector<8x8xf32>
    %69 = math.exp %68 : vector<8x8xf32>
    %cst_27 = arith.constant dense<0.000000e+00> : vector<8xf32>
    %70 = vector.multi_reduction <add>, %69, %cst_27 [1] : vector<8x8xf32> to vector<8xf32>
    %71 = vector.shape_cast %70 : vector<8xf32> to vector<8x1xf32>
    %72 = tpu.reciprocal %71 {approx = true} : vector<8x1xf32> -> vector<8x1xf32>
    %73 = vector.broadcast %72 : vector<8x1xf32> to vector<8x8xf32>
    %74 = arith.mulf %69, %73 : vector<8x8xf32>
    %75 = arith.truncf %74 : vector<8x8xf32> to vector<8x8xbf16>
    %76 = vector.extract_strided_slice %35 {offsets = [0, 8], sizes = [8, 8], strides = [1, 1]} : vector<8x32xf32> to vector<8x8xf32>
    %77 = arith.truncf %76 : vector<8x8xf32> to vector<8x8xbf16>
    %cst_28 = arith.constant dense<0.000000e+00> : vector<8x8xf32>
    %78 = tpu.matmul %75, %77, %cst_28 {dimension_numbers = #tpu.dot_dimension_numbers<[1], [0], [0], [1], [0, 0, 1, 1], [], []>} : vector<8x8xbf16>, vector<8x8xbf16>, vector<8x8xf32> -> vector<8x8xf32>
    %c0_29 = arith.constant 0 : index
    %c8 = arith.constant 8 : index
    %79 = vector.load %arg11[%c0_29, %c8] : memref<8x32xf32, #tpu.memory_space<vmem>>, vector<8x8xf32>
    tpu.vector_store %arg11[%c0_29, %c8], %78 {strides = array<i32>} : memref<8x32xf32, #tpu.memory_space<vmem>>, vector<8x8xf32>,
    %80 = vector.extract_strided_slice %33 {offsets = [0, 16], sizes = [8, 8], strides = [1, 1]} : vector<8x32xf32> to vector<8x8xf32>
    %81 = arith.truncf %80 : vector<8x8xf32> to vector<8x8xbf16>
    %82 = vector.extract_strided_slice %34 {offsets = [0, 16], sizes = [8, 8], strides = [1, 1]} : vector<8x32xf32> to vector<8x8xf32>
    %83 = arith.truncf %82 : vector<8x8xf32> to vector<8x8xbf16>
    %cst_30 = arith.constant dense<0.000000e+00> : vector<8x8xf32>
    %84 = tpu.matmul %81, %83, %cst_30 {dimension_numbers = #tpu.dot_dimension_numbers<[1], [1], [0], [0], [0, 0, 1, 0], [], []>} : vector<8x8xbf16>, vector<8x8xbf16>, vector<8x8xf32> -> vector<8x8xf32>
    %85 = arith.addf %84, %37 : vector<8x8xf32>
    %cst_31 = arith.constant dense<0xFF800000> : vector<8xf32>
    %86 = vector.multi_reduction <maximumf>, %85, %cst_31 [1] : vector<8x8xf32> to vector<8xf32>
    %87 = vector.shape_cast %86 : vector<8xf32> to vector<8x1xf32>
    %88 = vector.broadcast %87 : vector<8x1xf32> to vector<8x8xf32>
    %89 = arith.subf %85, %88 : vector<8x8xf32>
    %90 = math.exp %89 : vector<8x8xf32>
    %cst_32 = arith.constant dense<0.000000e+00> : vector<8xf32>
    %91 = vector.multi_reduction <add>, %90, %cst_32 [1] : vector<8x8xf32> to vector<8xf32>
    %92 = vector.shape_cast %91 : vector<8xf32> to vector<8x1xf32>
    %93 = tpu.reciprocal %92 {approx = true} : vector<8x1xf32> -> vector<8x1xf32>
    %94 = vector.broadcast %93 : vector<8x1xf32> to vector<8x8xf32>
    %95 = arith.mulf %90, %94 : vector<8x8xf32>
    %96 = arith.truncf %95 : vector<8x8xf32> to vector<8x8xbf16>
    %97 = vector.extract_strided_slice %35 {offsets = [0, 16], sizes = [8, 8], strides = [1, 1]} : vector<8x32xf32> to vector<8x8xf32>
    %98 = arith.truncf %97 : vector<8x8xf32> to vector<8x8xbf16>
    %cst_33 = arith.constant dense<0.000000e+00> : vector<8x8xf32>
    %99 = tpu.matmul %96, %98, %cst_33 {dimension_numbers = #tpu.dot_dimension_numbers<[1], [0], [0], [1], [0, 0, 1, 1], [], []>} : vector<8x8xbf16>, vector<8x8xbf16>, vector<8x8xf32> -> vector<8x8xf32>
    %c0_34 = arith.constant 0 : index
    %c16 = arith.constant 16 : index
    %100 = vector.load %arg11[%c0_34, %c16] : memref<8x32xf32, #tpu.memory_space<vmem>>, vector<8x8xf32>
    tpu.vector_store %arg11[%c0_34, %c16], %99 {strides = array<i32>} : memref<8x32xf32, #tpu.memory_space<vmem>>, vector<8x8xf32>,
    %101 = vector.extract_strided_slice %33 {offsets = [0, 24], sizes = [8, 8], strides = [1, 1]} : vector<8x32xf32> to vector<8x8xf32>
    %102 = arith.truncf %101 : vector<8x8xf32> to vector<8x8xbf16>
    %103 = vector.extract_strided_slice %34 {offsets = [0, 24], sizes = [8, 8], strides = [1, 1]} : vector<8x32xf32> to vector<8x8xf32>
    %104 = arith.truncf %103 : vector<8x8xf32> to vector<8x8xbf16>
    %cst_35 = arith.constant dense<0.000000e+00> : vector<8x8xf32>
    %105 = tpu.matmul %102, %104, %cst_35 {dimension_numbers = #tpu.dot_dimension_numbers<[1], [1], [0], [0], [0, 0, 1, 0], [], []>} : vector<8x8xbf16>, vector<8x8xbf16>, vector<8x8xf32> -> vector<8x8xf32>
    %106 = arith.addf %105, %37 : vector<8x8xf32>
    %cst_36 = arith.constant dense<0xFF800000> : vector<8xf32>
    %107 = vector.multi_reduction <maximumf>, %106, %cst_36 [1] : vector<8x8xf32> to vector<8xf32>
    %108 = vector.shape_cast %107 : vector<8xf32> to vector<8x1xf32>
    %109 = vector.broadcast %108 : vector<8x1xf32> to vector<8x8xf32>
    %110 = arith.subf %106, %109 : vector<8x8xf32>
    %111 = math.exp %110 : vector<8x8xf32>
    %cst_37 = arith.constant dense<0.000000e+00> : vector<8xf32>
    %112 = vector.multi_reduction <add>, %111, %cst_37 [1] : vector<8x8xf32> to vector<8xf32>
    %113 = vector.shape_cast %112 : vector<8xf32> to vector<8x1xf32>
    %114 = tpu.reciprocal %113 {approx = true} : vector<8x1xf32> -> vector<8x1xf32>
    %115 = vector.broadcast %114 : vector<8x1xf32> to vector<8x8xf32>
    %116 = arith.mulf %111, %115 : vector<8x8xf32>
    %117 = arith.truncf %116 : vector<8x8xf32> to vector<8x8xbf16>
    %118 = vector.extract_strided_slice %35 {offsets = [0, 24], sizes = [8, 8], strides = [1, 1]} : vector<8x32xf32> to vector<8x8xf32>
    %119 = arith.truncf %118 : vector<8x8xf32> to vector<8x8xbf16>
    %cst_38 = arith.constant dense<0.000000e+00> : vector<8x8xf32>
    %120 = tpu.matmul %117, %119, %cst_38 {dimension_numbers = #tpu.dot_dimension_numbers<[1], [0], [0], [1], [0, 0, 1, 1], [], []>} : vector<8x8xbf16>, vector<8x8xbf16>, vector<8x8xf32> -> vector<8x8xf32>
    %c0_39 = arith.constant 0 : index
    %c24 = arith.constant 24 : index
    %121 = vector.load %arg11[%c0_39, %c24] : memref<8x32xf32, #tpu.memory_space<vmem>>, vector<8x8xf32>
    tpu.vector_store %arg11[%c0_39, %c24], %120 {strides = array<i32>} : memref<8x32xf32, #tpu.memory_space<vmem>>, vector<8x8xf32>,
    %c0_40 = arith.constant 0 : index
    %c0_41 = arith.constant 0 : index
    %122 = vector.load %arg11[%c0_40, %c0_41] : memref<8x32xf32, #tpu.memory_space<vmem>>, vector<8x32xf32>
    %123 = arith.truncf %122 : vector<8x32xf32> to vector<8x32xbf16>
    %c0_42 = arith.constant 0 : index
    %c0_43 = arith.constant 0 : index
    %124 = vector.load %arg8[%c0_42, %c0_43] : memref<32x32xbf16, #tpu.memory_space<vmem>>, vector<32x32xbf16>
    %cst_44 = arith.constant dense<0.000000e+00> : vector<8x32xf32>
    %125 = tpu.matmul %123, %124, %cst_44 {dimension_numbers = #tpu.dot_dimension_numbers<[1], [0], [0], [1], [0, 0, 1, 1], [], []>} : vector<8x32xbf16>, vector<32x32xbf16>, vector<8x32xf32> -> vector<8x32xf32>
    %126 = arith.addf %2, %125 : vector<8x32xf32>
    %c0_45 = arith.constant 0 : index
    %c0_46 = arith.constant 0 : index
    %127 = vector.load %arg9[%c0_45, %c0_46] : memref<1x32xf32, #tpu.memory_space<vmem>>, vector<1x32xf32>
    %128 = vector.broadcast %127 : vector<1x32xf32> to vector<8x32xf32>
    %129 = arith.addf %126, %128 : vector<8x32xf32>
    %130 = arith.truncf %129 : vector<8x32xf32> to vector<8x32xbf16>
    %c0_47 = arith.constant 0 : index
    %c0_48 = arith.constant 0 : index
    %c0_49 = arith.constant 0 : index
    %131 = vector.load %arg10[%c0_47, %c0_48, %c0_49] : memref<1x8x32xbf16, #tpu.memory_space<vmem>>, vector<1x8x32xbf16>
    %132 = vector.shape_cast %131 : vector<1x8x32xbf16> to vector<8x32xbf16>
    %133 = vector.shape_cast %130 : vector<8x32xbf16> to vector<1x8x32xbf16>
    tpu.vector_store %arg10[%c0_47, %c0_48, %c0_49], %133 {strides = array<i32>} : memref<1x8x32xbf16, #tpu.memory_space<vmem>>, vector<1x8x32xbf16>,
    return
  }
  func.func @transform_0(%arg0: i32, %arg1: i32) -> (i32, i32, i32) {
    %c0_i32 = arith.constant 0 : i32
    %c0_i32_0 = arith.constant 0 : i32
    return %arg0, %arg1, %c0_i32 : i32, i32, i32
  }
  func.func @transform_1(%arg0: i32, %arg1: i32) -> (i32, i32, i32) {
    %c0_i32 = arith.constant 0 : i32
    %c0_i32_0 = arith.constant 0 : i32
    %c0_i32_1 = arith.constant 0 : i32
    return %c0_i32, %arg1, %c0_i32_0 : i32, i32, i32
  }
  func.func @transform_2(%arg0: i32, %arg1: i32) -> (i32, i32) {
    %c0_i32 = arith.constant 0 : i32
    %c0_i32_0 = arith.constant 0 : i32
    %c0_i32_1 = arith.constant 0 : i32
    return %c0_i32, %c0_i32_0 : i32, i32
  }
  func.func @transform_3(%arg0: i32, %arg1: i32) -> (i32, i32) {
    %c0_i32 = arith.constant 0 : i32
    %c0_i32_0 = arith.constant 0 : i32
    %c0_i32_1 = arith.constant 0 : i32
    return %c0_i32, %c0_i32_0 : i32, i32
  }
  func.func @transform_4(%arg0: i32, %arg1: i32) -> (i32, i32) {
    %c0_i32 = arith.constant 0 : i32
    %c0_i32_0 = arith.constant 0 : i32
    %c0_i32_1 = arith.constant 0 : i32
    return %c0_i32, %c0_i32_0 : i32, i32
  }
  func.func @transform_5(%arg0: i32, %arg1: i32) -> (i32, i32) {
    %c0_i32 = arith.constant 0 : i32
    %c0_i32_0 = arith.constant 0 : i32
    %c0_i32_1 = arith.constant 0 : i32
    return %c0_i32, %c0_i32_0 : i32, i32
  }
  func.func @transform_6(%arg0: i32, %arg1: i32) -> (i32, i32) {
    %c0_i32 = arith.constant 0 : i32
    %c0_i32_0 = arith.constant 0 : i32
    %c0_i32_1 = arith.constant 0 : i32
    return %c0_i32, %c0_i32_0 : i32, i32
  }
  func.func @transform_7(%arg0: i32, %arg1: i32) -> (i32, i32) {
    %c0_i32 = arith.constant 0 : i32
    %c0_i32_0 = arith.constant 0 : i32
    %c0_i32_1 = arith.constant 0 : i32
    return %c0_i32, %c0_i32_0 : i32, i32
  }
  func.func @transform_8(%arg0: i32, %arg1: i32) -> (i32, i32, i32) {
    %c0_i32 = arith.constant 0 : i32
    %c0_i32_0 = arith.constant 0 : i32
    return %arg0, %arg1, %c0_i32 : i32, i32, i32
  }
}

module attributes {stable_mosaic.version = 11 : i64} {
  func.func @_ffn_sublayer_kernel(%arg0: i32, %arg1: memref<16x32xbf16, #tpu.memory_space<vmem>>, %arg2: memref<1x32xf32, #tpu.memory_space<vmem>>, %arg3: memref<1x32xf32, #tpu.memory_space<vmem>>, %arg4: memref<32x64xbf16, #tpu.memory_space<vmem>>, %arg5: memref<1x64xf32, #tpu.memory_space<vmem>>, %arg6: memref<64x32xbf16, #tpu.memory_space<vmem>>, %arg7: memref<1x32xf32, #tpu.memory_space<vmem>>, %arg8: memref<16x32xbf16, #tpu.memory_space<vmem>>) attributes {dimension_semantics = [#tpu.dimension_semantics<parallel>], iteration_bounds = array<i64: 1>, scalar_prefetch = 0 : i64, scratch_operands = 0 : i64, tpu.core_type = #tpu.core_type<tc>, window_params = [{transform_indices = @transform_0, window_bounds = array<i64: 16, 32>}, {pipeline_mode = #tpu.pipeline_mode<synchronous>, transform_indices = @transform_1, window_bounds = array<i64: 1, 32>}, {pipeline_mode = #tpu.pipeline_mode<synchronous>, transform_indices = @transform_2, window_bounds = array<i64: 1, 32>}, {pipeline_mode = #tpu.pipeline_mode<synchronous>, transform_indices = @transform_3, window_bounds = array<i64: 32, 64>}, {pipeline_mode = #tpu.pipeline_mode<synchronous>, transform_indices = @transform_4, window_bounds = array<i64: 1, 64>}, {pipeline_mode = #tpu.pipeline_mode<synchronous>, transform_indices = @transform_5, window_bounds = array<i64: 64, 32>}, {pipeline_mode = #tpu.pipeline_mode<synchronous>, transform_indices = @transform_6, window_bounds = array<i64: 1, 32>}, {transform_indices = @transform_7, window_bounds = array<i64: 16, 32>}]} {
    %c0 = arith.constant 0 : index
    %c0_0 = arith.constant 0 : index
    %0 = vector.load %arg1[%c0, %c0_0] : memref<16x32xbf16, #tpu.memory_space<vmem>>, vector<16x32xbf16>
    %1 = arith.extf %0 : vector<16x32xbf16> to vector<16x32xf32>
    %c0_1 = arith.constant 0 : index
    %c0_2 = arith.constant 0 : index
    %2 = vector.load %arg2[%c0_1, %c0_2] : memref<1x32xf32, #tpu.memory_space<vmem>>, vector<1x32xf32>
    %c0_3 = arith.constant 0 : index
    %c0_4 = arith.constant 0 : index
    %3 = vector.load %arg3[%c0_3, %c0_4] : memref<1x32xf32, #tpu.memory_space<vmem>>, vector<1x32xf32>
    %cst = arith.constant dense<0.000000e+00> : vector<16xf32>
    %4 = vector.multi_reduction <add>, %1, %cst [1] : vector<16x32xf32> to vector<16xf32>
    %5 = vector.shape_cast %4 : vector<16xf32> to vector<16x1xf32>
    %cst_5 = arith.constant 3.200000e+01 : f32
    %6 = vector.broadcast %cst_5 : f32 to vector<16x1xf32>
    %7 = arith.divf %5, %6 : vector<16x1xf32>
    %8 = vector.broadcast %7 : vector<16x1xf32> to vector<16x32xf32>
    %9 = arith.subf %1, %8 : vector<16x32xf32>
    %10 = arith.mulf %9, %9 : vector<16x32xf32>
    %cst_6 = arith.constant dense<0.000000e+00> : vector<16xf32>
    %11 = vector.multi_reduction <add>, %10, %cst_6 [1] : vector<16x32xf32> to vector<16xf32>
    %12 = vector.shape_cast %11 : vector<16xf32> to vector<16x1xf32>
    %cst_7 = arith.constant 3.100000e+01 : f32
    %13 = vector.broadcast %cst_7 : f32 to vector<16x1xf32>
    %14 = arith.divf %12, %13 : vector<16x1xf32>
    %15 = math.sqrt %14 : vector<16x1xf32>
    %16 = vector.broadcast %2 : vector<1x32xf32> to vector<16x32xf32>
    %17 = arith.mulf %16, %9 : vector<16x32xf32>
    %cst_8 = arith.constant 9.99999997E-7 : f32
    %18 = vector.broadcast %cst_8 : f32 to vector<16x1xf32>
    %19 = arith.addf %15, %18 : vector<16x1xf32>
    %20 = vector.broadcast %19 : vector<16x1xf32> to vector<16x32xf32>
    %21 = arith.divf %17, %20 : vector<16x32xf32>
    %22 = vector.broadcast %3 : vector<1x32xf32> to vector<16x32xf32>
    %23 = arith.addf %21, %22 : vector<16x32xf32>
    %24 = arith.truncf %23 : vector<16x32xf32> to vector<16x32xbf16>
    %c0_9 = arith.constant 0 : index
    %c0_10 = arith.constant 0 : index
    %25 = vector.load %arg4[%c0_9, %c0_10] : memref<32x64xbf16, #tpu.memory_space<vmem>>, vector<32x64xbf16>
    %cst_11 = arith.constant dense<0.000000e+00> : vector<16x64xf32>
    %26 = tpu.matmul %24, %25, %cst_11 {dimension_numbers = #tpu.dot_dimension_numbers<[1], [0], [0], [1], [0, 0, 1, 1], [], []>} : vector<16x32xbf16>, vector<32x64xbf16>, vector<16x64xf32> -> vector<16x64xf32>
    %c0_12 = arith.constant 0 : index
    %c0_13 = arith.constant 0 : index
    %27 = vector.load %arg5[%c0_12, %c0_13] : memref<1x64xf32, #tpu.memory_space<vmem>>, vector<1x64xf32>
    %28 = vector.broadcast %27 : vector<1x64xf32> to vector<16x64xf32>
    %29 = arith.addf %26, %28 : vector<16x64xf32>
    %cst_14 = arith.constant 0.000000e+00 : f32
    %30 = vector.broadcast %cst_14 : f32 to vector<16x64xf32>
    %31 = arith.maximumf %29, %30 : vector<16x64xf32>
    %32 = arith.truncf %31 : vector<16x64xf32> to vector<16x64xbf16>
    %c0_15 = arith.constant 0 : index
    %c0_16 = arith.constant 0 : index
    %33 = vector.load %arg6[%c0_15, %c0_16] : memref<64x32xbf16, #tpu.memory_space<vmem>>, vector<64x32xbf16>
    %cst_17 = arith.constant dense<0.000000e+00> : vector<16x32xf32>
    %34 = tpu.matmul %32, %33, %cst_17 {dimension_numbers = #tpu.dot_dimension_numbers<[1], [0], [0], [1], [0, 0, 1, 1], [], []>} : vector<16x64xbf16>, vector<64x32xbf16>, vector<16x32xf32> -> vector<16x32xf32>
    %c0_18 = arith.constant 0 : index
    %c0_19 = arith.constant 0 : index
    %35 = vector.load %arg7[%c0_18, %c0_19] : memref<1x32xf32, #tpu.memory_space<vmem>>, vector<1x32xf32>
    %36 = vector.broadcast %35 : vector<1x32xf32> to vector<16x32xf32>
    %37 = arith.addf %34, %36 : vector<16x32xf32>
    %38 = arith.addf %1, %37 : vector<16x32xf32>
    %39 = arith.truncf %38 : vector<16x32xf32> to vector<16x32xbf16>
    %c0_20 = arith.constant 0 : index
    %c0_21 = arith.constant 0 : index
    %40 = vector.load %arg8[%c0_20, %c0_21] : memref<16x32xbf16, #tpu.memory_space<vmem>>, vector<16x32xbf16>
    tpu.vector_store %arg8[%c0_20, %c0_21], %39 {strides = array<i32>} : memref<16x32xbf16, #tpu.memory_space<vmem>>, vector<16x32xbf16>,
    return
  }
  func.func @transform_0(%arg0: i32) -> (i32, i32) {
    %c0_i32 = arith.constant 0 : i32
    %c0_i32_0 = arith.constant 0 : i32
    return %arg0, %c0_i32 : i32, i32
  }
  func.func @transform_1(%arg0: i32) -> (i32, i32) {
    %c0_i32 = arith.constant 0 : i32
    %c0_i32_0 = arith.constant 0 : i32
    %c0_i32_1 = arith.constant 0 : i32
    return %c0_i32, %c0_i32_0 : i32, i32
  }
  func.func @transform_2(%arg0: i32) -> (i32, i32) {
    %c0_i32 = arith.constant 0 : i32
    %c0_i32_0 = arith.constant 0 : i32
    %c0_i32_1 = arith.constant 0 : i32
    return %c0_i32, %c0_i32_0 : i32, i32
  }
  func.func @transform_3(%arg0: i32) -> (i32, i32) {
    %c0_i32 = arith.constant 0 : i32
    %c0_i32_0 = arith.constant 0 : i32
    %c0_i32_1 = arith.constant 0 : i32
    return %c0_i32, %c0_i32_0 : i32, i32
  }
  func.func @transform_4(%arg0: i32) -> (i32, i32) {
    %c0_i32 = arith.constant 0 : i32
    %c0_i32_0 = arith.constant 0 : i32
    %c0_i32_1 = arith.constant 0 : i32
    return %c0_i32, %c0_i32_0 : i32, i32
  }
  func.func @transform_5(%arg0: i32) -> (i32, i32) {
    %c0_i32 = arith.constant 0 : i32
    %c0_i32_0 = arith.constant 0 : i32
    %c0_i32_1 = arith.constant 0 : i32
    return %c0_i32, %c0_i32_0 : i32, i32
  }
  func.func @transform_6(%arg0: i32) -> (i32, i32) {
    %c0_i32 = arith.constant 0 : i32
    %c0_i32_0 = arith.constant 0 : i32
    %c0_i32_1 = arith.constant 0 : i32
    return %c0_i32, %c0_i32_0 : i32, i32
  }
  func.func @transform_7(%arg0: i32) -> (i32, i32) {
    %c0_i32 = arith.constant 0 : i32
    %c0_i32_0 = arith.constant 0 : i32
    return %arg0, %c0_i32 : i32, i32
  }
}

module attributes {stable_mosaic.version = 11 : i64} {
  func.func @_self_attn_kernel(%arg0: i32, %arg1: i32, %arg2: memref<1x8x32xbf16, #tpu.memory_space<vmem>>, %arg3: memref<1x8x8xf32, #tpu.memory_space<vmem>>, %arg4: memref<1x32xf32, #tpu.memory_space<vmem>>, %arg5: memref<1x32xf32, #tpu.memory_space<vmem>>, %arg6: memref<32x96xbf16, #tpu.memory_space<vmem>>, %arg7: memref<1x96xf32, #tpu.memory_space<vmem>>, %arg8: memref<32x32xbf16, #tpu.memory_space<vmem>>, %arg9: memref<1x32xf32, #tpu.memory_space<vmem>>, %arg10: memref<1x8x32xbf16, #tpu.memory_space<vmem>>, %arg11: memref<8x32xf32, #tpu.memory_space<vmem>>) attributes {dimension_semantics = [#tpu.dimension_semantics<parallel>, #tpu.dimension_semantics<parallel>], iteration_bounds = array<i64: 2, 1>, scalar_prefetch = 0 : i64, scratch_operands = 1 : i64, tpu.core_type = #tpu.core_type<tc>, window_params = [{transform_indices = @transform_0, window_bounds = array<i64: 1, 8, 32>}, {transform_indices = @transform_1, window_bounds = array<i64: 1, 8, 8>}, {pipeline_mode = #tpu.pipeline_mode<synchronous>, transform_indices = @transform_2, window_bounds = array<i64: 1, 32>}, {pipeline_mode = #tpu.pipeline_mode<synchronous>, transform_indices = @transform_3, window_bounds = array<i64: 1, 32>}, {pipeline_mode = #tpu.pipeline_mode<synchronous>, transform_indices = @transform_4, window_bounds = array<i64: 32, 96>}, {pipeline_mode = #tpu.pipeline_mode<synchronous>, transform_indices = @transform_5, window_bounds = array<i64: 1, 96>}, {pipeline_mode = #tpu.pipeline_mode<synchronous>, transform_indices = @transform_6, window_bounds = array<i64: 32, 32>}, {pipeline_mode = #tpu.pipeline_mode<synchronous>, transform_indices = @transform_7, window_bounds = array<i64: 1, 32>}, {transform_indices = @transform_8, window_bounds = array<i64: 1, 8, 32>}]} {
    %c0 = arith.constant 0 : index
    %c0_0 = arith.constant 0 : index
    %c0_1 = arith.constant 0 : index
    %0 = vector.load %arg2[%c0, %c0_0, %c0_1] : memref<1x8x32xbf16, #tpu.memory_space<vmem>>, vector<1x8x32xbf16>
    %1 = vector.shape_cast %0 : vector<1x8x32xbf16> to vector<8x32xbf16>
    %2 = arith.extf %1 : vector<8x32xbf16> to vector<8x32xf32>
    %c0_2 = arith.constant 0 : index
    %c0_3 = arith.constant 0 : index
    %3 = vector.load %arg4[%c0_2, %c0_3] : memref<1x32xf32, #tpu.memory_space<vmem>>, vector<1x32xf32>
    %c0_4 = arith.constant 0 : index
    %c0_5 = arith.constant 0 : index
    %4 = vector.load %arg5[%c0_4, %c0_5] : memref<1x32xf32, #tpu.memory_space<vmem>>, vector<1x32xf32>
    %cst = arith.constant dense<0.000000e+00> : vector<8xf32>
    %5 = vector.multi_reduction <add>, %2, %cst [1] : vector<8x32xf32> to vector<8xf32>
    %6 = vector.shape_cast %5 : vector<8xf32> to vector<8x1xf32>
    %cst_6 = arith.constant 3.200000e+01 : f32
    %7 = vector.broadcast %cst_6 : f32 to vector<8x1xf32>
    %8 = arith.divf %6, %7 : vector<8x1xf32>
    %9 = vector.broadcast %8 : vector<8x1xf32> to vector<8x32xf32>
    %10 = arith.subf %2, %9 : vector<8x32xf32>
    %11 = arith.mulf %10, %10 : vector<8x32xf32>
    %cst_7 = arith.constant dense<0.000000e+00> : vector<8xf32>
    %12 = vector.multi_reduction <add>, %11, %cst_7 [1] : vector<8x32xf32> to vector<8xf32>
    %13 = vector.shape_cast %12 : vector<8xf32> to vector<8x1xf32>
    %cst_8 = arith.constant 3.100000e+01 : f32
    %14 = vector.broadcast %cst_8 : f32 to vector<8x1xf32>
    %15 = arith.divf %13, %14 : vector<8x1xf32>
    %16 = math.sqrt %15 : vector<8x1xf32>
    %17 = vector.broadcast %3 : vector<1x32xf32> to vector<8x32xf32>
    %18 = arith.mulf %17, %10 : vector<8x32xf32>
    %cst_9 = arith.constant 9.99999997E-7 : f32
    %19 = vector.broadcast %cst_9 : f32 to vector<8x1xf32>
    %20 = arith.addf %16, %19 : vector<8x1xf32>
    %21 = vector.broadcast %20 : vector<8x1xf32> to vector<8x32xf32>
    %22 = arith.divf %18, %21 : vector<8x32xf32>
    %23 = vector.broadcast %4 : vector<1x32xf32> to vector<8x32xf32>
    %24 = arith.addf %22, %23 : vector<8x32xf32>
    %25 = arith.truncf %24 : vector<8x32xf32> to vector<8x32xbf16>
    %c0_10 = arith.constant 0 : index
    %c0_11 = arith.constant 0 : index
    %26 = vector.load %arg6[%c0_10, %c0_11] : memref<32x96xbf16, #tpu.memory_space<vmem>>, vector<32x96xbf16>
    %cst_12 = arith.constant dense<0.000000e+00> : vector<8x96xf32>
    %27 = tpu.matmul %25, %26, %cst_12 {dimension_numbers = #tpu.dot_dimension_numbers<[1], [0], [0], [1], [0, 0, 1, 1], [], []>} : vector<8x32xbf16>, vector<32x96xbf16>, vector<8x96xf32> -> vector<8x96xf32>
    %c0_13 = arith.constant 0 : index
    %c0_14 = arith.constant 0 : index
    %28 = vector.load %arg7[%c0_13, %c0_14] : memref<1x96xf32, #tpu.memory_space<vmem>>, vector<1x96xf32>
    %29 = vector.broadcast %28 : vector<1x96xf32> to vector<8x96xf32>
    %30 = arith.addf %27, %29 : vector<8x96xf32>
    %31 = vector.extract_strided_slice %30 {offsets = [0, 0], sizes = [8, 32], strides = [1, 1]} : vector<8x96xf32> to vector<8x32xf32>
    %cst_15 = arith.constant 0.353553385 : f32
    %32 = vector.broadcast %cst_15 : f32 to vector<8x32xf32>
    %33 = arith.mulf %31, %32 : vector<8x32xf32>
    %34 = vector.extract_strided_slice %30 {offsets = [0, 32], sizes = [8, 32], strides = [1, 1]} : vector<8x96xf32> to vector<8x32xf32>
    %35 = vector.extract_strided_slice %30 {offsets = [0, 64], sizes = [8, 32], strides = [1, 1]} : vector<8x96xf32> to vector<8x32xf32>
    %c0_16 = arith.constant 0 : index
    %c0_17 = arith.constant 0 : index
    %c0_18 = arith.constant 0 : index
    %36 = vector.load %arg3[%c0_16, %c0_17, %c0_18] : memref<1x8x8xf32, #tpu.memory_space<vmem>>, vector<1x8x8xf32>
    %37 = vector.shape_cast %36 : vector<1x8x8xf32> to vector<8x8xf32>
    %38 = vector.extract_strided_slice %33 {offsets = [0, 0], sizes = [8, 8], strides = [1, 1]} : vector<8x32xf32> to vector<8x8xf32>
    %39 = arith.truncf %38 : vector<8x8xf32> to vector<8x8xbf16>
    %40 = vector.extract_strided_slice %34 {offsets = [0, 0], sizes = [8, 8], strides = [1, 1]} : vector<8x32xf32> to vector<8x8xf32>
    %41 = arith.truncf %40 : vector<8x8xf32> to vector<8x8xbf16>
    %cst_19 = arith.constant dense<0.000000e+00> : vector<8x8xf32>
    %42 = tpu.matmul %39, %41, %cst_19 {dimension_numbers = #tpu.dot_dimension_numbers<[1], [1], [0], [0], [0, 0, 1, 0], [], []>} : vector<8x8xbf16>, vector<8x8xbf16>, vector<8x8xf32> -> vector<8x8xf32>
    %43 = arith.addf %42, %37 : vector<8x8xf32>
    %cst_20 = arith.constant dense<0xFF800000> : vector<8xf32>
    %44 = vector.multi_reduction <maximumf>, %43, %cst_20 [1] : vector<8x8xf32> to vector<8xf32>
    %45 = vector.shape_cast %44 : vector<8xf32> to vector<8x1xf32>
    %46 = vector.broadcast %45 : vector<8x1xf32> to vector<8x8xf32>
    %47 = arith.subf %43, %46 : vector<8x8xf32>
    %48 = math.exp %47 : vector<8x8xf32>
    %cst_21 = arith.constant dense<0.000000e+00> : vector<8xf32>
    %49 = vector.multi_reduction <add>, %48, %cst_21 [1] : vector<8x8xf32> to vector<8xf32>
    %50 = vector.shape_cast %49 : vector<8xf32> to vector<8x1xf32>
    %51 = tpu.reciprocal %50 {approx = true} : vector<8x1xf32> -> vector<8x1xf32>
    %52 = vector.broadcast %51 : vector<8x1xf32> to vector<8x8xf32>
    %53 = arith.mulf %48, %52 : vector<8x8xf32>
    %54 = arith.truncf %53 : vector<8x8xf32> to vector<8x8xbf16>
    %55 = vector.extract_strided_slice %35 {offsets = [0, 0], sizes = [8, 8], strides = [1, 1]} : vector<8x32xf32> to vector<8x8xf32>
    %56 = arith.truncf %55 : vector<8x8xf32> to vector<8x8xbf16>
    %cst_22 = arith.constant dense<0.000000e+00> : vector<8x8xf32>
    %57 = tpu.matmul %54, %56, %cst_22 {dimension_numbers = #tpu.dot_dimension_numbers<[1], [0], [0], [1], [0, 0, 1, 1], [], []>} : vector<8x8xbf16>, vector<8x8xbf16>, vector<8x8xf32> -> vector<8x8xf32>
    %c0_23 = arith.constant 0 : index
    %c0_24 = arith.constant 0 : index
    %58 = vector.load %arg11[%c0_23, %c0_24] : memref<8x32xf32, #tpu.memory_space<vmem>>, vector<8x8xf32>
    tpu.vector_store %arg11[%c0_23, %c0_24], %57 {strides = array<i32>} : memref<8x32xf32, #tpu.memory_space<vmem>>, vector<8x8xf32>,
    %59 = vector.extract_strided_slice %33 {offsets = [0, 8], sizes = [8, 8], strides = [1, 1]} : vector<8x32xf32> to vector<8x8xf32>
    %60 = arith.truncf %59 : vector<8x8xf32> to vector<8x8xbf16>
    %61 = vector.extract_strided_slice %34 {offsets = [0, 8], sizes = [8, 8], strides = [1, 1]} : vector<8x32xf32> to vector<8x8xf32>
    %62 = arith.truncf %61 : vector<8x8xf32> to vector<8x8xbf16>
    %cst_25 = arith.constant dense<0.000000e+00> : vector<8x8xf32>
    %63 = tpu.matmul %60, %62, %cst_25 {dimension_numbers = #tpu.dot_dimension_numbers<[1], [1], [0], [0], [0, 0, 1, 0], [], []>} : vector<8x8xbf16>, vector<8x8xbf16>, vector<8x8xf32> -> vector<8x8xf32>
    %64 = arith.addf %63, %37 : vector<8x8xf32>
    %cst_26 = arith.constant dense<0xFF800000> : vector<8xf32>
    %65 = vector.multi_reduction <maximumf>, %64, %cst_26 [1] : vector<8x8xf32> to vector<8xf32>
    %66 = vector.shape_cast %65 : vector<8xf32> to vector<8x1xf32>
    %67 = vector.broadcast %66 : vector<8x1xf32> to vector<8x8xf32>
    %68 = arith.subf %64, %67 : vector<8x8xf32>
    %69 = math.exp %68 : vector<8x8xf32>
    %cst_27 = arith.constant dense<0.000000e+00> : vector<8xf32>
    %70 = vector.multi_reduction <add>, %69, %cst_27 [1] : vector<8x8xf32> to vector<8xf32>
    %71 = vector.shape_cast %70 : vector<8xf32> to vector<8x1xf32>
    %72 = tpu.reciprocal %71 {approx = true} : vector<8x1xf32> -> vector<8x1xf32>
    %73 = vector.broadcast %72 : vector<8x1xf32> to vector<8x8xf32>
    %74 = arith.mulf %69, %73 : vector<8x8xf32>
    %75 = arith.truncf %74 : vector<8x8xf32> to vector<8x8xbf16>
    %76 = vector.extract_strided_slice %35 {offsets = [0, 8], sizes = [8, 8], strides = [1, 1]} : vector<8x32xf32> to vector<8x8xf32>
    %77 = arith.truncf %76 : vector<8x8xf32> to vector<8x8xbf16>
    %cst_28 = arith.constant dense<0.000000e+00> : vector<8x8xf32>
    %78 = tpu.matmul %75, %77, %cst_28 {dimension_numbers = #tpu.dot_dimension_numbers<[1], [0], [0], [1], [0, 0, 1, 1], [], []>} : vector<8x8xbf16>, vector<8x8xbf16>, vector<8x8xf32> -> vector<8x8xf32>
    %c0_29 = arith.constant 0 : index
    %c8 = arith.constant 8 : index
    %79 = vector.load %arg11[%c0_29, %c8] : memref<8x32xf32, #tpu.memory_space<vmem>>, vector<8x8xf32>
    tpu.vector_store %arg11[%c0_29, %c8], %78 {strides = array<i32>} : memref<8x32xf32, #tpu.memory_space<vmem>>, vector<8x8xf32>,
    %80 = vector.extract_strided_slice %33 {offsets = [0, 16], sizes = [8, 8], strides = [1, 1]} : vector<8x32xf32> to vector<8x8xf32>
    %81 = arith.truncf %80 : vector<8x8xf32> to vector<8x8xbf16>
    %82 = vector.extract_strided_slice %34 {offsets = [0, 16], sizes = [8, 8], strides = [1, 1]} : vector<8x32xf32> to vector<8x8xf32>
    %83 = arith.truncf %82 : vector<8x8xf32> to vector<8x8xbf16>
    %cst_30 = arith.constant dense<0.000000e+00> : vector<8x8xf32>
    %84 = tpu.matmul %81, %83, %cst_30 {dimension_numbers = #tpu.dot_dimension_numbers<[1], [1], [0], [0], [0, 0, 1, 0], [], []>} : vector<8x8xbf16>, vector<8x8xbf16>, vector<8x8xf32> -> vector<8x8xf32>
    %85 = arith.addf %84, %37 : vector<8x8xf32>
    %cst_31 = arith.constant dense<0xFF800000> : vector<8xf32>
    %86 = vector.multi_reduction <maximumf>, %85, %cst_31 [1] : vector<8x8xf32> to vector<8xf32>
    %87 = vector.shape_cast %86 : vector<8xf32> to vector<8x1xf32>
    %88 = vector.broadcast %87 : vector<8x1xf32> to vector<8x8xf32>
    %89 = arith.subf %85, %88 : vector<8x8xf32>
    %90 = math.exp %89 : vector<8x8xf32>
    %cst_32 = arith.constant dense<0.000000e+00> : vector<8xf32>
    %91 = vector.multi_reduction <add>, %90, %cst_32 [1] : vector<8x8xf32> to vector<8xf32>
    %92 = vector.shape_cast %91 : vector<8xf32> to vector<8x1xf32>
    %93 = tpu.reciprocal %92 {approx = true} : vector<8x1xf32> -> vector<8x1xf32>
    %94 = vector.broadcast %93 : vector<8x1xf32> to vector<8x8xf32>
    %95 = arith.mulf %90, %94 : vector<8x8xf32>
    %96 = arith.truncf %95 : vector<8x8xf32> to vector<8x8xbf16>
    %97 = vector.extract_strided_slice %35 {offsets = [0, 16], sizes = [8, 8], strides = [1, 1]} : vector<8x32xf32> to vector<8x8xf32>
    %98 = arith.truncf %97 : vector<8x8xf32> to vector<8x8xbf16>
    %cst_33 = arith.constant dense<0.000000e+00> : vector<8x8xf32>
    %99 = tpu.matmul %96, %98, %cst_33 {dimension_numbers = #tpu.dot_dimension_numbers<[1], [0], [0], [1], [0, 0, 1, 1], [], []>} : vector<8x8xbf16>, vector<8x8xbf16>, vector<8x8xf32> -> vector<8x8xf32>
    %c0_34 = arith.constant 0 : index
    %c16 = arith.constant 16 : index
    %100 = vector.load %arg11[%c0_34, %c16] : memref<8x32xf32, #tpu.memory_space<vmem>>, vector<8x8xf32>
    tpu.vector_store %arg11[%c0_34, %c16], %99 {strides = array<i32>} : memref<8x32xf32, #tpu.memory_space<vmem>>, vector<8x8xf32>,
    %101 = vector.extract_strided_slice %33 {offsets = [0, 24], sizes = [8, 8], strides = [1, 1]} : vector<8x32xf32> to vector<8x8xf32>
    %102 = arith.truncf %101 : vector<8x8xf32> to vector<8x8xbf16>
    %103 = vector.extract_strided_slice %34 {offsets = [0, 24], sizes = [8, 8], strides = [1, 1]} : vector<8x32xf32> to vector<8x8xf32>
    %104 = arith.truncf %103 : vector<8x8xf32> to vector<8x8xbf16>
    %cst_35 = arith.constant dense<0.000000e+00> : vector<8x8xf32>
    %105 = tpu.matmul %102, %104, %cst_35 {dimension_numbers = #tpu.dot_dimension_numbers<[1], [1], [0], [0], [0, 0, 1, 0], [], []>} : vector<8x8xbf16>, vector<8x8xbf16>, vector<8x8xf32> -> vector<8x8xf32>
    %106 = arith.addf %105, %37 : vector<8x8xf32>
    %cst_36 = arith.constant dense<0xFF800000> : vector<8xf32>
    %107 = vector.multi_reduction <maximumf>, %106, %cst_36 [1] : vector<8x8xf32> to vector<8xf32>
    %108 = vector.shape_cast %107 : vector<8xf32> to vector<8x1xf32>
    %109 = vector.broadcast %108 : vector<8x1xf32> to vector<8x8xf32>
    %110 = arith.subf %106, %109 : vector<8x8xf32>
    %111 = math.exp %110 : vector<8x8xf32>
    %cst_37 = arith.constant dense<0.000000e+00> : vector<8xf32>
    %112 = vector.multi_reduction <add>, %111, %cst_37 [1] : vector<8x8xf32> to vector<8xf32>
    %113 = vector.shape_cast %112 : vector<8xf32> to vector<8x1xf32>
    %114 = tpu.reciprocal %113 {approx = true} : vector<8x1xf32> -> vector<8x1xf32>
    %115 = vector.broadcast %114 : vector<8x1xf32> to vector<8x8xf32>
    %116 = arith.mulf %111, %115 : vector<8x8xf32>
    %117 = arith.truncf %116 : vector<8x8xf32> to vector<8x8xbf16>
    %118 = vector.extract_strided_slice %35 {offsets = [0, 24], sizes = [8, 8], strides = [1, 1]} : vector<8x32xf32> to vector<8x8xf32>
    %119 = arith.truncf %118 : vector<8x8xf32> to vector<8x8xbf16>
    %cst_38 = arith.constant dense<0.000000e+00> : vector<8x8xf32>
    %120 = tpu.matmul %117, %119, %cst_38 {dimension_numbers = #tpu.dot_dimension_numbers<[1], [0], [0], [1], [0, 0, 1, 1], [], []>} : vector<8x8xbf16>, vector<8x8xbf16>, vector<8x8xf32> -> vector<8x8xf32>
    %c0_39 = arith.constant 0 : index
    %c24 = arith.constant 24 : index
    %121 = vector.load %arg11[%c0_39, %c24] : memref<8x32xf32, #tpu.memory_space<vmem>>, vector<8x8xf32>
    tpu.vector_store %arg11[%c0_39, %c24], %120 {strides = array<i32>} : memref<8x32xf32, #tpu.memory_space<vmem>>, vector<8x8xf32>,
    %c0_40 = arith.constant 0 : index
    %c0_41 = arith.constant 0 : index
    %122 = vector.load %arg11[%c0_40, %c0_41] : memref<8x32xf32, #tpu.memory_space<vmem>>, vector<8x32xf32>
    %123 = arith.truncf %122 : vector<8x32xf32> to vector<8x32xbf16>
    %c0_42 = arith.constant 0 : index
    %c0_43 = arith.constant 0 : index
    %124 = vector.load %arg8[%c0_42, %c0_43] : memref<32x32xbf16, #tpu.memory_space<vmem>>, vector<32x32xbf16>
    %cst_44 = arith.constant dense<0.000000e+00> : vector<8x32xf32>
    %125 = tpu.matmul %123, %124, %cst_44 {dimension_numbers = #tpu.dot_dimension_numbers<[1], [0], [0], [1], [0, 0, 1, 1], [], []>} : vector<8x32xbf16>, vector<32x32xbf16>, vector<8x32xf32> -> vector<8x32xf32>
    %126 = arith.addf %2, %125 : vector<8x32xf32>
    %c0_45 = arith.constant 0 : index
    %c0_46 = arith.constant 0 : index
    %127 = vector.load %arg9[%c0_45, %c0_46] : memref<1x32xf32, #tpu.memory_space<vmem>>, vector<1x32xf32>
    %128 = vector.broadcast %127 : vector<1x32xf32> to vector<8x32xf32>
    %129 = arith.addf %126, %128 : vector<8x32xf32>
    %130 = arith.truncf %129 : vector<8x32xf32> to vector<8x32xbf16>
    %c0_47 = arith.constant 0 : index
    %c0_48 = arith.constant 0 : index
    %c0_49 = arith.constant 0 : index
    %131 = vector.load %arg10[%c0_47, %c0_48, %c0_49] : memref<1x8x32xbf16, #tpu.memory_space<vmem>>, vector<1x8x32xbf16>
    %132 = vector.shape_cast %131 : vector<1x8x32xbf16> to vector<8x32xbf16>
    %133 = vector.shape_cast %130 : vector<8x32xbf16> to vector<1x8x32xbf16>
    tpu.vector_store %arg10[%c0_47, %c0_48, %c0_49], %133 {strides = array<i32>} : memref<1x8x32xbf16, #tpu.memory_space<vmem>>, vector<1x8x32xbf16>,
    return
  }
  func.func @transform_0(%arg0: i32, %arg1: i32) -> (i32, i32, i32) {
    %c0_i32 = arith.constant 0 : i32
    %c0_i32_0 = arith.constant 0 : i32
    return %arg0, %arg1, %c0_i32 : i32, i32, i32
  }
  func.func @transform_1(%arg0: i32, %arg1: i32) -> (i32, i32, i32) {
    %c0_i32 = arith.constant 0 : i32
    %c0_i32_0 = arith.constant 0 : i32
    %c0_i32_1 = arith.constant 0 : i32
    return %c0_i32, %arg1, %c0_i32_0 : i32, i32, i32
  }
  func.func @transform_2(%arg0: i32, %arg1: i32) -> (i32, i32) {
    %c0_i32 = arith.constant 0 : i32
    %c0_i32_0 = arith.constant 0 : i32
    %c0_i32_1 = arith.constant 0 : i32
    return %c0_i32, %c0_i32_0 : i32, i32
  }
  func.func @transform_3(%arg0: i32, %arg1: i32) -> (i32, i32) {
    %c0_i32 = arith.constant 0 : i32
    %c0_i32_0 = arith.constant 0 : i32
    %c0_i32_1 = arith.constant 0 : i32
    return %c0_i32, %c0_i32_0 : i32, i32
  }
  func.func @transform_4(%arg0: i32, %arg1: i32) -> (i32, i32) {
    %c0_i32 = arith.constant 0 : i32
    %c0_i32_0 = arith.constant 0 : i32
    %c0_i32_1 = arith.constant 0 : i32
    return %c0_i32, %c0_i32_0 : i32, i32
  }
  func.func @transform_5(%arg0: i32, %arg1: i32) -> (i32, i32) {
    %c0_i32 = arith.constant 0 : i32
    %c0_i32_0 = arith.constant 0 : i32
    %c0_i32_1 = arith.constant 0 : i32
    return %c0_i32, %c0_i32_0 : i32, i32
  }
  func.func @transform_6(%arg0: i32, %arg1: i32) -> (i32, i32) {
    %c0_i32 = arith.constant 0 : i32
    %c0_i32_0 = arith.constant 0 : i32
    %c0_i32_1 = arith.constant 0 : i32
    return %c0_i32, %c0_i32_0 : i32, i32
  }
  func.func @transform_7(%arg0: i32, %arg1: i32) -> (i32, i32) {
    %c0_i32 = arith.constant 0 : i32
    %c0_i32_0 = arith.constant 0 : i32
    %c0_i32_1 = arith.constant 0 : i32
    return %c0_i32, %c0_i32_0 : i32, i32
  }
  func.func @transform_8(%arg0: i32, %arg1: i32) -> (i32, i32, i32) {
    %c0_i32 = arith.constant 0 : i32
    %c0_i32_0 = arith.constant 0 : i32
    return %arg0, %arg1, %c0_i32 : i32, i32, i32
  }
}

module attributes {stable_mosaic.version = 11 : i64} {
  func.func @_cross_attn_kernel(%arg0: i32, %arg1: i32, %arg2: memref<1x8x32xbf16, #tpu.memory_space<vmem>>, %arg3: memref<1x8x32xbf16, #tpu.memory_space<vmem>>, %arg4: memref<1x1x8xf32, #tpu.memory_space<vmem>>, %arg5: memref<1x32xf32, #tpu.memory_space<vmem>>, %arg6: memref<1x32xf32, #tpu.memory_space<vmem>>, %arg7: memref<32x32xbf16, #tpu.memory_space<vmem>>, %arg8: memref<1x32xf32, #tpu.memory_space<vmem>>, %arg9: memref<32x64xbf16, #tpu.memory_space<vmem>>, %arg10: memref<1x64xf32, #tpu.memory_space<vmem>>, %arg11: memref<32x32xbf16, #tpu.memory_space<vmem>>, %arg12: memref<1x32xf32, #tpu.memory_space<vmem>>, %arg13: memref<1x8x32xbf16, #tpu.memory_space<vmem>>, %arg14: memref<8x32xf32, #tpu.memory_space<vmem>>) attributes {dimension_semantics = [#tpu.dimension_semantics<parallel>, #tpu.dimension_semantics<parallel>], iteration_bounds = array<i64: 2, 1>, scalar_prefetch = 0 : i64, scratch_operands = 1 : i64, tpu.core_type = #tpu.core_type<tc>, window_params = [{transform_indices = @transform_0, window_bounds = array<i64: 1, 8, 32>}, {transform_indices = @transform_1, window_bounds = array<i64: 1, 8, 32>}, {transform_indices = @transform_2, window_bounds = array<i64: 1, 1, 8>}, {pipeline_mode = #tpu.pipeline_mode<synchronous>, transform_indices = @transform_3, window_bounds = array<i64: 1, 32>}, {pipeline_mode = #tpu.pipeline_mode<synchronous>, transform_indices = @transform_4, window_bounds = array<i64: 1, 32>}, {pipeline_mode = #tpu.pipeline_mode<synchronous>, transform_indices = @transform_5, window_bounds = array<i64: 32, 32>}, {pipeline_mode = #tpu.pipeline_mode<synchronous>, transform_indices = @transform_6, window_bounds = array<i64: 1, 32>}, {pipeline_mode = #tpu.pipeline_mode<synchronous>, transform_indices = @transform_7, window_bounds = array<i64: 32, 64>}, {pipeline_mode = #tpu.pipeline_mode<synchronous>, transform_indices = @transform_8, window_bounds = array<i64: 1, 64>}, {pipeline_mode = #tpu.pipeline_mode<synchronous>, transform_indices = @transform_9, window_bounds = array<i64: 32, 32>}, {pipeline_mode = #tpu.pipeline_mode<synchronous>, transform_indices = @transform_10, window_bounds = array<i64: 1, 32>}, {transform_indices = @transform_11, window_bounds = array<i64: 1, 8, 32>}]} {
    %c0 = arith.constant 0 : index
    %c0_0 = arith.constant 0 : index
    %c0_1 = arith.constant 0 : index
    %0 = vector.load %arg2[%c0, %c0_0, %c0_1] : memref<1x8x32xbf16, #tpu.memory_space<vmem>>, vector<1x8x32xbf16>
    %1 = vector.shape_cast %0 : vector<1x8x32xbf16> to vector<8x32xbf16>
    %2 = arith.extf %1 : vector<8x32xbf16> to vector<8x32xf32>
    %c0_2 = arith.constant 0 : index
    %c0_3 = arith.constant 0 : index
    %3 = vector.load %arg5[%c0_2, %c0_3] : memref<1x32xf32, #tpu.memory_space<vmem>>, vector<1x32xf32>
    %c0_4 = arith.constant 0 : index
    %c0_5 = arith.constant 0 : index
    %4 = vector.load %arg6[%c0_4, %c0_5] : memref<1x32xf32, #tpu.memory_space<vmem>>, vector<1x32xf32>
    %cst = arith.constant dense<0.000000e+00> : vector<8xf32>
    %5 = vector.multi_reduction <add>, %2, %cst [1] : vector<8x32xf32> to vector<8xf32>
    %6 = vector.shape_cast %5 : vector<8xf32> to vector<8x1xf32>
    %cst_6 = arith.constant 3.200000e+01 : f32
    %7 = vector.broadcast %cst_6 : f32 to vector<8x1xf32>
    %8 = arith.divf %6, %7 : vector<8x1xf32>
    %9 = vector.broadcast %8 : vector<8x1xf32> to vector<8x32xf32>
    %10 = arith.subf %2, %9 : vector<8x32xf32>
    %11 = arith.mulf %10, %10 : vector<8x32xf32>
    %cst_7 = arith.constant dense<0.000000e+00> : vector<8xf32>
    %12 = vector.multi_reduction <add>, %11, %cst_7 [1] : vector<8x32xf32> to vector<8xf32>
    %13 = vector.shape_cast %12 : vector<8xf32> to vector<8x1xf32>
    %cst_8 = arith.constant 3.100000e+01 : f32
    %14 = vector.broadcast %cst_8 : f32 to vector<8x1xf32>
    %15 = arith.divf %13, %14 : vector<8x1xf32>
    %16 = math.sqrt %15 : vector<8x1xf32>
    %17 = vector.broadcast %3 : vector<1x32xf32> to vector<8x32xf32>
    %18 = arith.mulf %17, %10 : vector<8x32xf32>
    %cst_9 = arith.constant 9.99999997E-7 : f32
    %19 = vector.broadcast %cst_9 : f32 to vector<8x1xf32>
    %20 = arith.addf %16, %19 : vector<8x1xf32>
    %21 = vector.broadcast %20 : vector<8x1xf32> to vector<8x32xf32>
    %22 = arith.divf %18, %21 : vector<8x32xf32>
    %23 = vector.broadcast %4 : vector<1x32xf32> to vector<8x32xf32>
    %24 = arith.addf %22, %23 : vector<8x32xf32>
    %c0_10 = arith.constant 0 : index
    %c0_11 = arith.constant 0 : index
    %c0_12 = arith.constant 0 : index
    %25 = vector.load %arg3[%c0_10, %c0_11, %c0_12] : memref<1x8x32xbf16, #tpu.memory_space<vmem>>, vector<1x8x32xbf16>
    %26 = vector.shape_cast %25 : vector<1x8x32xbf16> to vector<8x32xbf16>
    %27 = arith.extf %26 : vector<8x32xbf16> to vector<8x32xf32>
    %28 = arith.truncf %24 : vector<8x32xf32> to vector<8x32xbf16>
    %c0_13 = arith.constant 0 : index
    %c0_14 = arith.constant 0 : index
    %29 = vector.load %arg7[%c0_13, %c0_14] : memref<32x32xbf16, #tpu.memory_space<vmem>>, vector<32x32xbf16>
    %cst_15 = arith.constant dense<0.000000e+00> : vector<8x32xf32>
    %30 = tpu.matmul %28, %29, %cst_15 {dimension_numbers = #tpu.dot_dimension_numbers<[1], [0], [0], [1], [0, 0, 1, 1], [], []>} : vector<8x32xbf16>, vector<32x32xbf16>, vector<8x32xf32> -> vector<8x32xf32>
    %c0_16 = arith.constant 0 : index
    %c0_17 = arith.constant 0 : index
    %31 = vector.load %arg8[%c0_16, %c0_17] : memref<1x32xf32, #tpu.memory_space<vmem>>, vector<1x32xf32>
    %32 = vector.broadcast %31 : vector<1x32xf32> to vector<8x32xf32>
    %33 = arith.addf %30, %32 : vector<8x32xf32>
    %cst_18 = arith.constant 0.353553385 : f32
    %34 = vector.broadcast %cst_18 : f32 to vector<8x32xf32>
    %35 = arith.mulf %33, %34 : vector<8x32xf32>
    %36 = arith.truncf %27 : vector<8x32xf32> to vector<8x32xbf16>
    %c0_19 = arith.constant 0 : index
    %c0_20 = arith.constant 0 : index
    %37 = vector.load %arg9[%c0_19, %c0_20] : memref<32x64xbf16, #tpu.memory_space<vmem>>, vector<32x64xbf16>
    %cst_21 = arith.constant dense<0.000000e+00> : vector<8x64xf32>
    %38 = tpu.matmul %36, %37, %cst_21 {dimension_numbers = #tpu.dot_dimension_numbers<[1], [0], [0], [1], [0, 0, 1, 1], [], []>} : vector<8x32xbf16>, vector<32x64xbf16>, vector<8x64xf32> -> vector<8x64xf32>
    %c0_22 = arith.constant 0 : index
    %c0_23 = arith.constant 0 : index
    %39 = vector.load %arg10[%c0_22, %c0_23] : memref<1x64xf32, #tpu.memory_space<vmem>>, vector<1x64xf32>
    %40 = vector.broadcast %39 : vector<1x64xf32> to vector<8x64xf32>
    %41 = arith.addf %38, %40 : vector<8x64xf32>
    %42 = vector.extract_strided_slice %41 {offsets = [0, 0], sizes = [8, 32], strides = [1, 1]} : vector<8x64xf32> to vector<8x32xf32>
    %43 = vector.extract_strided_slice %41 {offsets = [0, 32], sizes = [8, 32], strides = [1, 1]} : vector<8x64xf32> to vector<8x32xf32>
    %c0_24 = arith.constant 0 : index
    %c0_25 = arith.constant 0 : index
    %c0_26 = arith.constant 0 : index
    %44 = vector.load %arg4[%c0_24, %c0_25, %c0_26] : memref<1x1x8xf32, #tpu.memory_space<vmem>>, vector<1x1x8xf32>
    %45 = vector.shape_cast %44 : vector<1x1x8xf32> to vector<1x8xf32>
    %46 = vector.extract_strided_slice %35 {offsets = [0, 0], sizes = [8, 8], strides = [1, 1]} : vector<8x32xf32> to vector<8x8xf32>
    %47 = arith.truncf %46 : vector<8x8xf32> to vector<8x8xbf16>
    %48 = vector.extract_strided_slice %42 {offsets = [0, 0], sizes = [8, 8], strides = [1, 1]} : vector<8x32xf32> to vector<8x8xf32>
    %49 = arith.truncf %48 : vector<8x8xf32> to vector<8x8xbf16>
    %cst_27 = arith.constant dense<0.000000e+00> : vector<8x8xf32>
    %50 = tpu.matmul %47, %49, %cst_27 {dimension_numbers = #tpu.dot_dimension_numbers<[1], [1], [0], [0], [0, 0, 1, 0], [], []>} : vector<8x8xbf16>, vector<8x8xbf16>, vector<8x8xf32> -> vector<8x8xf32>
    %51 = vector.broadcast %45 : vector<1x8xf32> to vector<8x8xf32>
    %52 = arith.addf %50, %51 : vector<8x8xf32>
    %cst_28 = arith.constant dense<0xFF800000> : vector<8xf32>
    %53 = vector.multi_reduction <maximumf>, %52, %cst_28 [1] : vector<8x8xf32> to vector<8xf32>
    %54 = vector.shape_cast %53 : vector<8xf32> to vector<8x1xf32>
    %55 = vector.broadcast %54 : vector<8x1xf32> to vector<8x8xf32>
    %56 = arith.subf %52, %55 : vector<8x8xf32>
    %57 = math.exp %56 : vector<8x8xf32>
    %cst_29 = arith.constant dense<0.000000e+00> : vector<8xf32>
    %58 = vector.multi_reduction <add>, %57, %cst_29 [1] : vector<8x8xf32> to vector<8xf32>
    %59 = vector.shape_cast %58 : vector<8xf32> to vector<8x1xf32>
    %60 = tpu.reciprocal %59 {approx = true} : vector<8x1xf32> -> vector<8x1xf32>
    %61 = vector.broadcast %60 : vector<8x1xf32> to vector<8x8xf32>
    %62 = arith.mulf %57, %61 : vector<8x8xf32>
    %63 = arith.truncf %62 : vector<8x8xf32> to vector<8x8xbf16>
    %64 = vector.extract_strided_slice %43 {offsets = [0, 0], sizes = [8, 8], strides = [1, 1]} : vector<8x32xf32> to vector<8x8xf32>
    %65 = arith.truncf %64 : vector<8x8xf32> to vector<8x8xbf16>
    %cst_30 = arith.constant dense<0.000000e+00> : vector<8x8xf32>
    %66 = tpu.matmul %63, %65, %cst_30 {dimension_numbers = #tpu.dot_dimension_numbers<[1], [0], [0], [1], [0, 0, 1, 1], [], []>} : vector<8x8xbf16>, vector<8x8xbf16>, vector<8x8xf32> -> vector<8x8xf32>
    %c0_31 = arith.constant 0 : index
    %c0_32 = arith.constant 0 : index
    %67 = vector.load %arg14[%c0_31, %c0_32] : memref<8x32xf32, #tpu.memory_space<vmem>>, vector<8x8xf32>
    tpu.vector_store %arg14[%c0_31, %c0_32], %66 {strides = array<i32>} : memref<8x32xf32, #tpu.memory_space<vmem>>, vector<8x8xf32>,
    %68 = vector.extract_strided_slice %35 {offsets = [0, 8], sizes = [8, 8], strides = [1, 1]} : vector<8x32xf32> to vector<8x8xf32>
    %69 = arith.truncf %68 : vector<8x8xf32> to vector<8x8xbf16>
    %70 = vector.extract_strided_slice %42 {offsets = [0, 8], sizes = [8, 8], strides = [1, 1]} : vector<8x32xf32> to vector<8x8xf32>
    %71 = arith.truncf %70 : vector<8x8xf32> to vector<8x8xbf16>
    %cst_33 = arith.constant dense<0.000000e+00> : vector<8x8xf32>
    %72 = tpu.matmul %69, %71, %cst_33 {dimension_numbers = #tpu.dot_dimension_numbers<[1], [1], [0], [0], [0, 0, 1, 0], [], []>} : vector<8x8xbf16>, vector<8x8xbf16>, vector<8x8xf32> -> vector<8x8xf32>
    %73 = vector.broadcast %45 : vector<1x8xf32> to vector<8x8xf32>
    %74 = arith.addf %72, %73 : vector<8x8xf32>
    %cst_34 = arith.constant dense<0xFF800000> : vector<8xf32>
    %75 = vector.multi_reduction <maximumf>, %74, %cst_34 [1] : vector<8x8xf32> to vector<8xf32>
    %76 = vector.shape_cast %75 : vector<8xf32> to vector<8x1xf32>
    %77 = vector.broadcast %76 : vector<8x1xf32> to vector<8x8xf32>
    %78 = arith.subf %74, %77 : vector<8x8xf32>
    %79 = math.exp %78 : vector<8x8xf32>
    %cst_35 = arith.constant dense<0.000000e+00> : vector<8xf32>
    %80 = vector.multi_reduction <add>, %79, %cst_35 [1] : vector<8x8xf32> to vector<8xf32>
    %81 = vector.shape_cast %80 : vector<8xf32> to vector<8x1xf32>
    %82 = tpu.reciprocal %81 {approx = true} : vector<8x1xf32> -> vector<8x1xf32>
    %83 = vector.broadcast %82 : vector<8x1xf32> to vector<8x8xf32>
    %84 = arith.mulf %79, %83 : vector<8x8xf32>
    %85 = arith.truncf %84 : vector<8x8xf32> to vector<8x8xbf16>
    %86 = vector.extract_strided_slice %43 {offsets = [0, 8], sizes = [8, 8], strides = [1, 1]} : vector<8x32xf32> to vector<8x8xf32>
    %87 = arith.truncf %86 : vector<8x8xf32> to vector<8x8xbf16>
    %cst_36 = arith.constant dense<0.000000e+00> : vector<8x8xf32>
    %88 = tpu.matmul %85, %87, %cst_36 {dimension_numbers = #tpu.dot_dimension_numbers<[1], [0], [0], [1], [0, 0, 1, 1], [], []>} : vector<8x8xbf16>, vector<8x8xbf16>, vector<8x8xf32> -> vector<8x8xf32>
    %c0_37 = arith.constant 0 : index
    %c8 = arith.constant 8 : index
    %89 = vector.load %arg14[%c0_37, %c8] : memref<8x32xf32, #tpu.memory_space<vmem>>, vector<8x8xf32>
    tpu.vector_store %arg14[%c0_37, %c8], %88 {strides = array<i32>} : memref<8x32xf32, #tpu.memory_space<vmem>>, vector<8x8xf32>,
    %90 = vector.extract_strided_slice %35 {offsets = [0, 16], sizes = [8, 8], strides = [1, 1]} : vector<8x32xf32> to vector<8x8xf32>
    %91 = arith.truncf %90 : vector<8x8xf32> to vector<8x8xbf16>
    %92 = vector.extract_strided_slice %42 {offsets = [0, 16], sizes = [8, 8], strides = [1, 1]} : vector<8x32xf32> to vector<8x8xf32>
    %93 = arith.truncf %92 : vector<8x8xf32> to vector<8x8xbf16>
    %cst_38 = arith.constant dense<0.000000e+00> : vector<8x8xf32>
    %94 = tpu.matmul %91, %93, %cst_38 {dimension_numbers = #tpu.dot_dimension_numbers<[1], [1], [0], [0], [0, 0, 1, 0], [], []>} : vector<8x8xbf16>, vector<8x8xbf16>, vector<8x8xf32> -> vector<8x8xf32>
    %95 = vector.broadcast %45 : vector<1x8xf32> to vector<8x8xf32>
    %96 = arith.addf %94, %95 : vector<8x8xf32>
    %cst_39 = arith.constant dense<0xFF800000> : vector<8xf32>
    %97 = vector.multi_reduction <maximumf>, %96, %cst_39 [1] : vector<8x8xf32> to vector<8xf32>
    %98 = vector.shape_cast %97 : vector<8xf32> to vector<8x1xf32>
    %99 = vector.broadcast %98 : vector<8x1xf32> to vector<8x8xf32>
    %100 = arith.subf %96, %99 : vector<8x8xf32>
    %101 = math.exp %100 : vector<8x8xf32>
    %cst_40 = arith.constant dense<0.000000e+00> : vector<8xf32>
    %102 = vector.multi_reduction <add>, %101, %cst_40 [1] : vector<8x8xf32> to vector<8xf32>
    %103 = vector.shape_cast %102 : vector<8xf32> to vector<8x1xf32>
    %104 = tpu.reciprocal %103 {approx = true} : vector<8x1xf32> -> vector<8x1xf32>
    %105 = vector.broadcast %104 : vector<8x1xf32> to vector<8x8xf32>
    %106 = arith.mulf %101, %105 : vector<8x8xf32>
    %107 = arith.truncf %106 : vector<8x8xf32> to vector<8x8xbf16>
    %108 = vector.extract_strided_slice %43 {offsets = [0, 16], sizes = [8, 8], strides = [1, 1]} : vector<8x32xf32> to vector<8x8xf32>
    %109 = arith.truncf %108 : vector<8x8xf32> to vector<8x8xbf16>
    %cst_41 = arith.constant dense<0.000000e+00> : vector<8x8xf32>
    %110 = tpu.matmul %107, %109, %cst_41 {dimension_numbers = #tpu.dot_dimension_numbers<[1], [0], [0], [1], [0, 0, 1, 1], [], []>} : vector<8x8xbf16>, vector<8x8xbf16>, vector<8x8xf32> -> vector<8x8xf32>
    %c0_42 = arith.constant 0 : index
    %c16 = arith.constant 16 : index
    %111 = vector.load %arg14[%c0_42, %c16] : memref<8x32xf32, #tpu.memory_space<vmem>>, vector<8x8xf32>
    tpu.vector_store %arg14[%c0_42, %c16], %110 {strides = array<i32>} : memref<8x32xf32, #tpu.memory_space<vmem>>, vector<8x8xf32>,
    %112 = vector.extract_strided_slice %35 {offsets = [0, 24], sizes = [8, 8], strides = [1, 1]} : vector<8x32xf32> to vector<8x8xf32>
    %113 = arith.truncf %112 : vector<8x8xf32> to vector<8x8xbf16>
    %114 = vector.extract_strided_slice %42 {offsets = [0, 24], sizes = [8, 8], strides = [1, 1]} : vector<8x32xf32> to vector<8x8xf32>
    %115 = arith.truncf %114 : vector<8x8xf32> to vector<8x8xbf16>
    %cst_43 = arith.constant dense<0.000000e+00> : vector<8x8xf32>
    %116 = tpu.matmul %113, %115, %cst_43 {dimension_numbers = #tpu.dot_dimension_numbers<[1], [1], [0], [0], [0, 0, 1, 0], [], []>} : vector<8x8xbf16>, vector<8x8xbf16>, vector<8x8xf32> -> vector<8x8xf32>
    %117 = vector.broadcast %45 : vector<1x8xf32> to vector<8x8xf32>
    %118 = arith.addf %116, %117 : vector<8x8xf32>
    %cst_44 = arith.constant dense<0xFF800000> : vector<8xf32>
    %119 = vector.multi_reduction <maximumf>, %118, %cst_44 [1] : vector<8x8xf32> to vector<8xf32>
    %120 = vector.shape_cast %119 : vector<8xf32> to vector<8x1xf32>
    %121 = vector.broadcast %120 : vector<8x1xf32> to vector<8x8xf32>
    %122 = arith.subf %118, %121 : vector<8x8xf32>
    %123 = math.exp %122 : vector<8x8xf32>
    %cst_45 = arith.constant dense<0.000000e+00> : vector<8xf32>
    %124 = vector.multi_reduction <add>, %123, %cst_45 [1] : vector<8x8xf32> to vector<8xf32>
    %125 = vector.shape_cast %124 : vector<8xf32> to vector<8x1xf32>
    %126 = tpu.reciprocal %125 {approx = true} : vector<8x1xf32> -> vector<8x1xf32>
    %127 = vector.broadcast %126 : vector<8x1xf32> to vector<8x8xf32>
    %128 = arith.mulf %123, %127 : vector<8x8xf32>
    %129 = arith.truncf %128 : vector<8x8xf32> to vector<8x8xbf16>
    %130 = vector.extract_strided_slice %43 {offsets = [0, 24], sizes = [8, 8], strides = [1, 1]} : vector<8x32xf32> to vector<8x8xf32>
    %131 = arith.truncf %130 : vector<8x8xf32> to vector<8x8xbf16>
    %cst_46 = arith.constant dense<0.000000e+00> : vector<8x8xf32>
    %132 = tpu.matmul %129, %131, %cst_46 {dimension_numbers = #tpu.dot_dimension_numbers<[1], [0], [0], [1], [0, 0, 1, 1], [], []>} : vector<8x8xbf16>, vector<8x8xbf16>, vector<8x8xf32> -> vector<8x8xf32>
    %c0_47 = arith.constant 0 : index
    %c24 = arith.constant 24 : index
    %133 = vector.load %arg14[%c0_47, %c24] : memref<8x32xf32, #tpu.memory_space<vmem>>, vector<8x8xf32>
    tpu.vector_store %arg14[%c0_47, %c24], %132 {strides = array<i32>} : memref<8x32xf32, #tpu.memory_space<vmem>>, vector<8x8xf32>,
    %c0_48 = arith.constant 0 : index
    %c0_49 = arith.constant 0 : index
    %134 = vector.load %arg14[%c0_48, %c0_49] : memref<8x32xf32, #tpu.memory_space<vmem>>, vector<8x32xf32>
    %135 = arith.truncf %134 : vector<8x32xf32> to vector<8x32xbf16>
    %c0_50 = arith.constant 0 : index
    %c0_51 = arith.constant 0 : index
    %136 = vector.load %arg11[%c0_50, %c0_51] : memref<32x32xbf16, #tpu.memory_space<vmem>>, vector<32x32xbf16>
    %cst_52 = arith.constant dense<0.000000e+00> : vector<8x32xf32>
    %137 = tpu.matmul %135, %136, %cst_52 {dimension_numbers = #tpu.dot_dimension_numbers<[1], [0], [0], [1], [0, 0, 1, 1], [], []>} : vector<8x32xbf16>, vector<32x32xbf16>, vector<8x32xf32> -> vector<8x32xf32>
    %138 = arith.addf %2, %137 : vector<8x32xf32>
    %c0_53 = arith.constant 0 : index
    %c0_54 = arith.constant 0 : index
    %139 = vector.load %arg12[%c0_53, %c0_54] : memref<1x32xf32, #tpu.memory_space<vmem>>, vector<1x32xf32>
    %140 = vector.broadcast %139 : vector<1x32xf32> to vector<8x32xf32>
    %141 = arith.addf %138, %140 : vector<8x32xf32>
    %142 = arith.truncf %141 : vector<8x32xf32> to vector<8x32xbf16>
    %c0_55 = arith.constant 0 : index
    %c0_56 = arith.constant 0 : index
    %c0_57 = arith.constant 0 : index
    %143 = vector.load %arg13[%c0_55, %c0_56, %c0_57] : memref<1x8x32xbf16, #tpu.memory_space<vmem>>, vector<1x8x32xbf16>
    %144 = vector.shape_cast %143 : vector<1x8x32xbf16> to vector<8x32xbf16>
    %145 = vector.shape_cast %142 : vector<8x32xbf16> to vector<1x8x32xbf16>
    tpu.vector_store %arg13[%c0_55, %c0_56, %c0_57], %145 {strides = array<i32>} : memref<1x8x32xbf16, #tpu.memory_space<vmem>>, vector<1x8x32xbf16>,
    return
  }
  func.func @transform_0(%arg0: i32, %arg1: i32) -> (i32, i32, i32) {
    %c0_i32 = arith.constant 0 : i32
    %c0_i32_0 = arith.constant 0 : i32
    return %arg0, %arg1, %c0_i32 : i32, i32, i32
  }
  func.func @transform_1(%arg0: i32, %arg1: i32) -> (i32, i32, i32) {
    %c0_i32 = arith.constant 0 : i32
    %c0_i32_0 = arith.constant 0 : i32
    %c0_i32_1 = arith.constant 0 : i32
    return %arg0, %c0_i32, %c0_i32_0 : i32, i32, i32
  }
  func.func @transform_2(%arg0: i32, %arg1: i32) -> (i32, i32, i32) {
    %c0_i32 = arith.constant 0 : i32
    %c0_i32_0 = arith.constant 0 : i32
    %c0_i32_1 = arith.constant 0 : i32
    return %arg0, %c0_i32, %c0_i32_0 : i32, i32, i32
  }
  func.func @transform_3(%arg0: i32, %arg1: i32) -> (i32, i32) {
    %c0_i32 = arith.constant 0 : i32
    %c0_i32_0 = arith.constant 0 : i32
    %c0_i32_1 = arith.constant 0 : i32
    return %c0_i32, %c0_i32_0 : i32, i32
  }
  func.func @transform_4(%arg0: i32, %arg1: i32) -> (i32, i32) {
    %c0_i32 = arith.constant 0 : i32
    %c0_i32_0 = arith.constant 0 : i32
    %c0_i32_1 = arith.constant 0 : i32
    return %c0_i32, %c0_i32_0 : i32, i32
  }
  func.func @transform_5(%arg0: i32, %arg1: i32) -> (i32, i32) {
    %c0_i32 = arith.constant 0 : i32
    %c0_i32_0 = arith.constant 0 : i32
    %c0_i32_1 = arith.constant 0 : i32
    return %c0_i32, %c0_i32_0 : i32, i32
  }
  func.func @transform_6(%arg0: i32, %arg1: i32) -> (i32, i32) {
    %c0_i32 = arith.constant 0 : i32
    %c0_i32_0 = arith.constant 0 : i32
    %c0_i32_1 = arith.constant 0 : i32
    return %c0_i32, %c0_i32_0 : i32, i32
  }
  func.func @transform_7(%arg0: i32, %arg1: i32) -> (i32, i32) {
    %c0_i32 = arith.constant 0 : i32
    %c0_i32_0 = arith.constant 0 : i32
    %c0_i32_1 = arith.constant 0 : i32
    return %c0_i32, %c0_i32_0 : i32, i32
  }
  func.func @transform_8(%arg0: i32, %arg1: i32) -> (i32, i32) {
    %c0_i32 = arith.constant 0 : i32
    %c0_i32_0 = arith.constant 0 : i32
    %c0_i32_1 = arith.constant 0 : i32
    return %c0_i32, %c0_i32_0 : i32, i32
  }
  func.func @transform_9(%arg0: i32, %arg1: i32) -> (i32, i32) {
    %c0_i32 = arith.constant 0 : i32
    %c0_i32_0 = arith.constant 0 : i32
    %c0_i32_1 = arith.constant 0 : i32
    return %c0_i32, %c0_i32_0 : i32, i32
  }
  func.func @transform_10(%arg0: i32, %arg1: i32) -> (i32, i32) {
    %c0_i32 = arith.constant 0 : i32
    %c0_i32_0 = arith.constant 0 : i32
    %c0_i32_1 = arith.constant 0 : i32
    return %c0_i32, %c0_i32_0 : i32, i32
  }
  func.func @transform_11(%arg0: i32, %arg1: i32) -> (i32, i32, i32) {
    %c0_i32 = arith.constant 0 : i32
    %c0_i32_0 = arith.constant 0 : i32
    return %arg0, %arg1, %c0_i32 : i32, i32, i32
  }
}

module attributes {stable_mosaic.version = 11 : i64} {
  func.func @_ffn_sublayer_kernel(%arg0: i32, %arg1: memref<16x32xbf16, #tpu.memory_space<vmem>>, %arg2: memref<1x32xf32, #tpu.memory_space<vmem>>, %arg3: memref<1x32xf32, #tpu.memory_space<vmem>>, %arg4: memref<32x64xbf16, #tpu.memory_space<vmem>>, %arg5: memref<1x64xf32, #tpu.memory_space<vmem>>, %arg6: memref<64x32xbf16, #tpu.memory_space<vmem>>, %arg7: memref<1x32xf32, #tpu.memory_space<vmem>>, %arg8: memref<1x32xf32, #tpu.memory_space<vmem>>, %arg9: memref<1x32xf32, #tpu.memory_space<vmem>>, %arg10: memref<16x32xf32, #tpu.memory_space<vmem>>) attributes {dimension_semantics = [#tpu.dimension_semantics<parallel>], iteration_bounds = array<i64: 1>, scalar_prefetch = 0 : i64, scratch_operands = 0 : i64, tpu.core_type = #tpu.core_type<tc>, window_params = [{transform_indices = @transform_0, window_bounds = array<i64: 16, 32>}, {pipeline_mode = #tpu.pipeline_mode<synchronous>, transform_indices = @transform_1, window_bounds = array<i64: 1, 32>}, {pipeline_mode = #tpu.pipeline_mode<synchronous>, transform_indices = @transform_2, window_bounds = array<i64: 1, 32>}, {pipeline_mode = #tpu.pipeline_mode<synchronous>, transform_indices = @transform_3, window_bounds = array<i64: 32, 64>}, {pipeline_mode = #tpu.pipeline_mode<synchronous>, transform_indices = @transform_4, window_bounds = array<i64: 1, 64>}, {pipeline_mode = #tpu.pipeline_mode<synchronous>, transform_indices = @transform_5, window_bounds = array<i64: 64, 32>}, {pipeline_mode = #tpu.pipeline_mode<synchronous>, transform_indices = @transform_6, window_bounds = array<i64: 1, 32>}, {pipeline_mode = #tpu.pipeline_mode<synchronous>, transform_indices = @transform_7, window_bounds = array<i64: 1, 32>}, {pipeline_mode = #tpu.pipeline_mode<synchronous>, transform_indices = @transform_8, window_bounds = array<i64: 1, 32>}, {transform_indices = @transform_9, window_bounds = array<i64: 16, 32>}]} {
    %c0 = arith.constant 0 : index
    %c0_0 = arith.constant 0 : index
    %0 = vector.load %arg1[%c0, %c0_0] : memref<16x32xbf16, #tpu.memory_space<vmem>>, vector<16x32xbf16>
    %1 = arith.extf %0 : vector<16x32xbf16> to vector<16x32xf32>
    %c0_1 = arith.constant 0 : index
    %c0_2 = arith.constant 0 : index
    %2 = vector.load %arg2[%c0_1, %c0_2] : memref<1x32xf32, #tpu.memory_space<vmem>>, vector<1x32xf32>
    %c0_3 = arith.constant 0 : index
    %c0_4 = arith.constant 0 : index
    %3 = vector.load %arg3[%c0_3, %c0_4] : memref<1x32xf32, #tpu.memory_space<vmem>>, vector<1x32xf32>
    %cst = arith.constant dense<0.000000e+00> : vector<16xf32>
    %4 = vector.multi_reduction <add>, %1, %cst [1] : vector<16x32xf32> to vector<16xf32>
    %5 = vector.shape_cast %4 : vector<16xf32> to vector<16x1xf32>
    %cst_5 = arith.constant 3.200000e+01 : f32
    %6 = vector.broadcast %cst_5 : f32 to vector<16x1xf32>
    %7 = arith.divf %5, %6 : vector<16x1xf32>
    %8 = vector.broadcast %7 : vector<16x1xf32> to vector<16x32xf32>
    %9 = arith.subf %1, %8 : vector<16x32xf32>
    %10 = arith.mulf %9, %9 : vector<16x32xf32>
    %cst_6 = arith.constant dense<0.000000e+00> : vector<16xf32>
    %11 = vector.multi_reduction <add>, %10, %cst_6 [1] : vector<16x32xf32> to vector<16xf32>
    %12 = vector.shape_cast %11 : vector<16xf32> to vector<16x1xf32>
    %cst_7 = arith.constant 3.100000e+01 : f32
    %13 = vector.broadcast %cst_7 : f32 to vector<16x1xf32>
    %14 = arith.divf %12, %13 : vector<16x1xf32>
    %15 = math.sqrt %14 : vector<16x1xf32>
    %16 = vector.broadcast %2 : vector<1x32xf32> to vector<16x32xf32>
    %17 = arith.mulf %16, %9 : vector<16x32xf32>
    %cst_8 = arith.constant 9.99999997E-7 : f32
    %18 = vector.broadcast %cst_8 : f32 to vector<16x1xf32>
    %19 = arith.addf %15, %18 : vector<16x1xf32>
    %20 = vector.broadcast %19 : vector<16x1xf32> to vector<16x32xf32>
    %21 = arith.divf %17, %20 : vector<16x32xf32>
    %22 = vector.broadcast %3 : vector<1x32xf32> to vector<16x32xf32>
    %23 = arith.addf %21, %22 : vector<16x32xf32>
    %24 = arith.truncf %23 : vector<16x32xf32> to vector<16x32xbf16>
    %c0_9 = arith.constant 0 : index
    %c0_10 = arith.constant 0 : index
    %25 = vector.load %arg4[%c0_9, %c0_10] : memref<32x64xbf16, #tpu.memory_space<vmem>>, vector<32x64xbf16>
    %cst_11 = arith.constant dense<0.000000e+00> : vector<16x64xf32>
    %26 = tpu.matmul %24, %25, %cst_11 {dimension_numbers = #tpu.dot_dimension_numbers<[1], [0], [0], [1], [0, 0, 1, 1], [], []>} : vector<16x32xbf16>, vector<32x64xbf16>, vector<16x64xf32> -> vector<16x64xf32>
    %c0_12 = arith.constant 0 : index
    %c0_13 = arith.constant 0 : index
    %27 = vector.load %arg5[%c0_12, %c0_13] : memref<1x64xf32, #tpu.memory_space<vmem>>, vector<1x64xf32>
    %28 = vector.broadcast %27 : vector<1x64xf32> to vector<16x64xf32>
    %29 = arith.addf %26, %28 : vector<16x64xf32>
    %cst_14 = arith.constant 0.000000e+00 : f32
    %30 = vector.broadcast %cst_14 : f32 to vector<16x64xf32>
    %31 = arith.maximumf %29, %30 : vector<16x64xf32>
    %32 = arith.truncf %31 : vector<16x64xf32> to vector<16x64xbf16>
    %c0_15 = arith.constant 0 : index
    %c0_16 = arith.constant 0 : index
    %33 = vector.load %arg6[%c0_15, %c0_16] : memref<64x32xbf16, #tpu.memory_space<vmem>>, vector<64x32xbf16>
    %cst_17 = arith.constant dense<0.000000e+00> : vector<16x32xf32>
    %34 = tpu.matmul %32, %33, %cst_17 {dimension_numbers = #tpu.dot_dimension_numbers<[1], [0], [0], [1], [0, 0, 1, 1], [], []>} : vector<16x64xbf16>, vector<64x32xbf16>, vector<16x32xf32> -> vector<16x32xf32>
    %c0_18 = arith.constant 0 : index
    %c0_19 = arith.constant 0 : index
    %35 = vector.load %arg7[%c0_18, %c0_19] : memref<1x32xf32, #tpu.memory_space<vmem>>, vector<1x32xf32>
    %36 = vector.broadcast %35 : vector<1x32xf32> to vector<16x32xf32>
    %37 = arith.addf %34, %36 : vector<16x32xf32>
    %38 = arith.addf %1, %37 : vector<16x32xf32>
    %c0_20 = arith.constant 0 : index
    %c0_21 = arith.constant 0 : index
    %39 = vector.load %arg8[%c0_20, %c0_21] : memref<1x32xf32, #tpu.memory_space<vmem>>, vector<1x32xf32>
    %c0_22 = arith.constant 0 : index
    %c0_23 = arith.constant 0 : index
    %40 = vector.load %arg9[%c0_22, %c0_23] : memref<1x32xf32, #tpu.memory_space<vmem>>, vector<1x32xf32>
    %cst_24 = arith.constant dense<0.000000e+00> : vector<16xf32>
    %41 = vector.multi_reduction <add>, %38, %cst_24 [1] : vector<16x32xf32> to vector<16xf32>
    %42 = vector.shape_cast %41 : vector<16xf32> to vector<16x1xf32>
    %cst_25 = arith.constant 3.200000e+01 : f32
    %43 = vector.broadcast %cst_25 : f32 to vector<16x1xf32>
    %44 = arith.divf %42, %43 : vector<16x1xf32>
    %45 = vector.broadcast %44 : vector<16x1xf32> to vector<16x32xf32>
    %46 = arith.subf %38, %45 : vector<16x32xf32>
    %47 = arith.mulf %46, %46 : vector<16x32xf32>
    %cst_26 = arith.constant dense<0.000000e+00> : vector<16xf32>
    %48 = vector.multi_reduction <add>, %47, %cst_26 [1] : vector<16x32xf32> to vector<16xf32>
    %49 = vector.shape_cast %48 : vector<16xf32> to vector<16x1xf32>
    %cst_27 = arith.constant 3.100000e+01 : f32
    %50 = vector.broadcast %cst_27 : f32 to vector<16x1xf32>
    %51 = arith.divf %49, %50 : vector<16x1xf32>
    %52 = math.sqrt %51 : vector<16x1xf32>
    %53 = vector.broadcast %39 : vector<1x32xf32> to vector<16x32xf32>
    %54 = arith.mulf %53, %46 : vector<16x32xf32>
    %cst_28 = arith.constant 9.99999997E-7 : f32
    %55 = vector.broadcast %cst_28 : f32 to vector<16x1xf32>
    %56 = arith.addf %52, %55 : vector<16x1xf32>
    %57 = vector.broadcast %56 : vector<16x1xf32> to vector<16x32xf32>
    %58 = arith.divf %54, %57 : vector<16x32xf32>
    %59 = vector.broadcast %40 : vector<1x32xf32> to vector<16x32xf32>
    %60 = arith.addf %58, %59 : vector<16x32xf32>
    %c0_29 = arith.constant 0 : index
    %c0_30 = arith.constant 0 : index
    %61 = vector.load %arg10[%c0_29, %c0_30] : memref<16x32xf32, #tpu.memory_space<vmem>>, vector<16x32xf32>
    tpu.vector_store %arg10[%c0_29, %c0_30], %60 {strides = array<i32>} : memref<16x32xf32, #tpu.memory_space<vmem>>, vector<16x32xf32>,
    return
  }
  func.func @transform_0(%arg0: i32) -> (i32, i32) {
    %c0_i32 = arith.constant 0 : i32
    %c0_i32_0 = arith.constant 0 : i32
    return %arg0, %c0_i32 : i32, i32
  }
  func.func @transform_1(%arg0: i32) -> (i32, i32) {
    %c0_i32 = arith.constant 0 : i32
    %c0_i32_0 = arith.constant 0 : i32
    %c0_i32_1 = arith.constant 0 : i32
    return %c0_i32, %c0_i32_0 : i32, i32
  }
  func.func @transform_2(%arg0: i32) -> (i32, i32) {
    %c0_i32 = arith.constant 0 : i32
    %c0_i32_0 = arith.constant 0 : i32
    %c0_i32_1 = arith.constant 0 : i32
    return %c0_i32, %c0_i32_0 : i32, i32
  }
  func.func @transform_3(%arg0: i32) -> (i32, i32) {
    %c0_i32 = arith.constant 0 : i32
    %c0_i32_0 = arith.constant 0 : i32
    %c0_i32_1 = arith.constant 0 : i32
    return %c0_i32, %c0_i32_0 : i32, i32
  }
  func.func @transform_4(%arg0: i32) -> (i32, i32) {
    %c0_i32 = arith.constant 0 : i32
    %c0_i32_0 = arith.constant 0 : i32
    %c0_i32_1 = arith.constant 0 : i32
    return %c0_i32, %c0_i32_0 : i32, i32
  }
  func.func @transform_5(%arg0: i32) -> (i32, i32) {
    %c0_i32 = arith.constant 0 : i32
    %c0_i32_0 = arith.constant 0 : i32
    %c0_i32_1 = arith.constant 0 : i32
    return %c0_i32, %c0_i32_0 : i32, i32
  }
  func.func @transform_6(%arg0: i32) -> (i32, i32) {
    %c0_i32 = arith.constant 0 : i32
    %c0_i32_0 = arith.constant 0 : i32
    %c0_i32_1 = arith.constant 0 : i32
    return %c0_i32, %c0_i32_0 : i32, i32
  }
  func.func @transform_7(%arg0: i32) -> (i32, i32) {
    %c0_i32 = arith.constant 0 : i32
    %c0_i32_0 = arith.constant 0 : i32
    %c0_i32_1 = arith.constant 0 : i32
    return %c0_i32, %c0_i32_0 : i32, i32
  }
  func.func @transform_8(%arg0: i32) -> (i32, i32) {
    %c0_i32 = arith.constant 0 : i32
    %c0_i32_0 = arith.constant 0 : i32
    %c0_i32_1 = arith.constant 0 : i32
    return %c0_i32, %c0_i32_0 : i32, i32
  }
  func.func @transform_9(%arg0: i32) -> (i32, i32) {
    %c0_i32 = arith.constant 0 : i32
    %c0_i32_0 = arith.constant 0 : i32
    return %arg0, %c0_i32 : i32, i32
  }
}

</mosaic_0001>

<bundles_post_ra>
// kernel: decoder_forward.7
= control target key start
LH: loop header
LB: loop body
LE: loop exit
PB: predicated region body
PF: predicated region fallthrough
CT: control target
= control target key end

     0   :  { %s1563_s0 = inlined_call_operand.vmem [shape: bf16[2,8,32], index: 0, kind: input, shape index: {}]   ;;  %s1564_s1 = inlined_call_operand.vmem [shape: bf16[2,8,32], index: 1, kind: input, shape index: {}]   ;;  %s1565_s2 = inlined_call_operand.vmem [shape: f32[2,1,8], index: 2, kind: input, shape index: {}]   ;;  %s1566_s3 = inlined_call_operand.vmem [shape: f32[1,32], index: 3, kind: input, shape index: {}]   ;;  %s1567_s4 = inlined_call_operand.vmem [shape: f32[1,32], index: 4, kind: input, shape index: {}]   ;;  %s1568_s5 = inlined_call_operand.hbm [shape: bf16[32,32], index: 5, kind: input, shape index: {}]   ;;  %s1569_s6 = inlined_call_operand.vmem [shape: f32[1,32], index: 6, kind: input, shape index: {}]   ;;  %s1570_s7 = inlined_call_operand.hbm [shape: bf16[32,64], index: 7, kind: input, shape index: {}]   ;;  %s1571_s8 = inlined_call_operand.vmem [shape: f32[1,64], index: 8, kind: input, shape index: {}]   ;;  %s1572_s9 = inlined_call_operand.hbm [shape: bf16[32,32], index: 9, kind: input, shape index: {}]   ;;  %s1573_s10 = inlined_call_operand.vmem [shape: f32[1,32], index: 10, kind: input, shape index: {}]   ;;  %s1574_s11 = inlined_call_operand.vmem [shape: bf16[2,8,32], index: 11, kind: output, shape index: {}]  }
   0x1   :  { %1576 = sst [smem:[#allocation11_spill]] %s1570_s7 }
   0x2   :  { %16 = vsyncpa [#allocation4], 0 }
   0x3   :  { %17 = vsyncpa [#allocation6], 0  ;;  %s1409_s17 = smov 0   ;;  %s1411_s18 = smov 0  }
   0x4   :  { %s1413_s19 = smov 0  }
   0x5 LB: > { %1577 = sst [smem:[#allocation10_spill]] %s1326_s18  ;;  %s1054_s20 = sadd.s32 4294967295, %s1330_s19   ;;  %s1330_s19 = sphi %s1413_s19, %s23_s19   ;;  %s1326_s18 = sphi %s1411_s18, %s1583_s18   ;;  %s1322_s17 = sphi %s1409_s17, %s1582_s17  }
   0x6   : > { %p1056_p0 = scmp.ge.s32.totalorder %s1330_s19, 1  ;;  %p316_p1 = scmp.lt.s32.totalorder %s1330_s19, 3 }
   0x7   : > { %p1427_p2 = scmp.eq.s32.totalorder %s1054_s20, 0  ;;  %s1579_s7 = sld [smem:[#allocation11_spill]] }
   0x8   : > { %p1434_p3 = pnand %p1056_p0, %p316_p1  ;;  %s1332_s26 = smov [#allocation5]  }
   0x9   : > { %s352_s27 = sshll.u32 %s1332_s26, 4  ;;  %s35_s29 = sadd.s32 1, %s1326_s18  ;;  %s353_s27 = int_to_ptr.vmem [resolvable:$true] %s352_s27 }
   0xa   : > { %p1123_p4 = pneg %p1434_p3  ;;  %p37_p6 = scmp.ge.s32.totalorder %s35_s29, 2 }
   0xb   : > { %s1333_s30 = smov 64   ;;  %s1334_s12 = smov 4  }
   0xc   : > { %p1442_p5 = pnand %p1427_p2, %p1123_p4  ;;  %s1585_s29 = smov (%p37_p6, %s35_s29), 0 }
   0xd   : > { %s350_s24 = sshll.u32 %s1579_s7, 4  ;;  %s333_s15 = sshll.u32 %s1568_s5, 4  ;;  %s351_s24 = int_to_ptr.hbm [resolvable:$true] %s350_s24  ;;  %s334_s15 = int_to_ptr.hbm [resolvable:$true] %s333_s15 }
   0xe   : > { %1129 = dma.hbm_to_vmem [thread:$0]  (!%p1442_p5), %s351_s24, 256, %s353_s27, [#allocation6], %s1333_s30, %s1333_s30, %s1334_s12  }
   0xf   : > { %s1335_s16 = smov [#allocation3]   ;;  %s367_s26 = sshll.u32 %s1572_s9, 4  ;;  %s368_s26 = int_to_ptr.hbm [resolvable:$true] %s367_s26 }
  0x10   : > { %s335_s20 = sshll.u32 %s1335_s16, 4  ;;  %s1336_s7 = smov [#allocation7]   ;;  %s336_s20 = int_to_ptr.vmem [resolvable:$true] %s335_s20 }
  0x11   : > { %1126 = dma.hbm_to_vmem [thread:$0]  (!%p1442_p5), %s334_s15, 256, %s336_s20, [#allocation4], %s1333_s30, %s1333_s30, %s1334_s12  }
  0x12   : > { %s369_s18 = sshll.u32 %s1336_s7, 4  ;;  %411 = sbr.rel (%p1434_p3) target bundleno = 1664 (0x680), region = 64  ;;  %s370_s18 = int_to_ptr.vmem [resolvable:$true] %s369_s18 }
  0x13   : > { %1132 = dma.hbm_to_vmem [thread:$0]  (!%p1442_p5), %s368_s26, 256, %s370_s18, [#allocation6], %s1333_s30, %s1333_s30, %s1334_s12  }
  0x17   : > { %1313 = dma.done.wait (%p1427_p2), [#allocation4], 256  }
  0x18   : > { %1315 = vsyncadd (%p1427_p2), [#allocation4], 4294967040 }
  0x19   : > { %1317 = dma.done.wait (%p1427_p2), [#allocation6], 512  }
  0x1a   : > { %1319 = vsyncadd (%p1427_p2), [#allocation6], 4294966784  ;;  %p473_p7 = scmp.lt.s32.totalorder %s1322_s17, 1  ;;  %vm499_vm0 = vcmask 261120   ;;  %v1337_v3 = vmov 32.0   ;;  %v1338_v15 = vmov 31.0  }
  0x1b   : > { %1186 = vrcp.f32 %v1337_v3  ;;  %v1108_v19 = vld [vmem:[#allocation5 + $0x8] sm:$0xff]  ;;  %v1107_v21 = vld [vmem:[#allocation5] sm:$0xff]  ;;  %v1106_v22 = vld [vmem:[#allocation3 + $0x8] sm:$0xff]  ;;  %s1339_s20 = smov 96   ;;  %s1340_s22 = smov 120   ;;  %vm641_vm9 = vcmask 64512  }
  0x1c   : > { %s1587_s17 = smov (!%p473_p7, %s1322_s17), 1  ;;  %1188 = vrcp.f32 %v1338_v15  ;;  %628 = vmatpush.bf16.msra.mxu1 %v1108_v19  ;;  %591 = vmatpush.bf16.msra.mxu0 %v1106_v22  ;;  %v1105_v24 = vld [vmem:[#allocation3] sm:$0xff]  ;;  %v1180_v44 = vld [vmem:[%s1566_s3] ss:$0 sm:$0xff]  ;;  %s1341_s23 = smov 104   ;;  %vm679_vm10 = vcmask 1043456  }
  0x1d   : > { %s1476_s7 = sshll.u32 %s1587_s17, 2  ;;  %v1181_v51 = vld [vmem:[%s1567_s4] ss:$0 sm:$0xff]  ;;  %s486_s24 = scalar_lea.vmem %s1565_s2, %s1587_s17  ;;  %vm758_vm11 = vcmask 130112   ;;  %vm820_vm12 = vcmask 195712   ;;  %vm882_vm13 = vcmask 261312  }
  0x1e   : > { %s479_s25 = scalar_lea.vmem %s1563_s0, %s1476_s7  ;;  %s483_s28 = scalar_lea.vmem %s1564_s1, %s1476_s7  ;;  %v1182_v56 = vld [vmem:[%s1571_s8] ss:$0 sm:$0xff]  ;;  %vm925_vm14 = vcmask 257024  }
  0x1f   : > { %v495_v0 = vld [vmem:[%s479_s25] sm:$0xf]  ;;  %s1342_s27 = smov 112   ;;  %s1343_s17 = smov 88  }
  0x20   : > { %v1482_v1 = vunpack.c.l.bf16 %v495_v0  ;;  %629 = vmatpush.bf16.msra.mxu1 %v1107_v21  ;;  %v560_v23 = vld [vmem:[%s483_s28] sm:$0xf]  ;;  %592 = vmatpush.bf16.msra.mxu0 %v1105_v24  ;;  %s1344_s28 = smov 80   ;;  %s1345_s30 = smov 72  }
  0x21   : > { %v1187_v4 = vpop.eup %1186  ;;  %v1183_v62 = vld [vmem:[%s1569_s6] ss:$0 sm:$0xff]  ;;  %s1346_s12 = smov 8   ;;  %s1347_s13 = smov 16  }
  0x22   : > { %v500_v2 = vsel %vm499_vm0, %v1482_v1, 0.0  ;;  %v504_v5 = vmul.f32 32.0, %v1187_v4  ;;  %vm508_vm1 = vweird.f32 %v1187_v4  ;;  %v1189_v16 = vpop.eup %1188  ;;  %s1348_s14 = smov 24  }
  0x23   : > { %501 = vadd.xlane.f32.xlu0 %v500_v2  ;;  %v517_v17 = vmul.f32 31.0, %v1189_v16  ;;  %vm521_vm2 = vweird.f32 %v1189_v16  ;;  %1085 = vmatmul.msk.bf16.vlgmr.msra.gmra.mxu1 %vm499_vm0, %v560_v23 }
  0x24   : > { %v505_v6 = vsub.f32 1.0, %v504_v5 }
  0x25   : > { %v518_v18 = vsub.f32 1.0, %v517_v17 }
  0x26   : > { %v506_v7 = vmul.f32 %v1187_v4, %v505_v6 }
  0x27   : > { %v519_v20 = vmul.f32 %v1189_v16, %v518_v18 }
  0x28   : > { %v507_v8 = vadd.f32 %v1187_v4, %v506_v7 }
  0x29   : > { %v520_v25 = vadd.f32 %v1189_v16, %v519_v20 }
  0x2a   : > { %v509_v9 = vsel %vm508_vm1, %v1187_v4, %v507_v8 }
  0x2b   : > { %v522_v26 = vsel %vm521_vm2, %v1189_v16, %v520_v25 }
  0x96   : > { %v502_v10 = vpop.xlane.xlu0 %501 }
  0x97   : > { %v510_v11 = vmul.f32 %v509_v9, %v502_v10  ;;  %v1184_v9 = vld [vmem:[%s486_s24] ss:$0 sm:$0xff] }
  0x99   : > { %v511_v12 = vsub.f32 %v1482_v1, %v510_v11 }
  0x9b   : > { %v512_v13 = vmul.f32 %v511_v12, %v511_v12  ;;  %v539_v49 = vmul.f32 %v1180_v44, %v511_v12 }
  0x9d   : > { %v513_v14 = vsel %vm499_vm0, %v512_v13, 0.0 }
  0x9e   : > { %514 = vadd.xlane.f32.xlu0 %v513_v14 }
  0xa0   : > { %v631_v57 = vpop.f32.mrf.mxu1 }
  0xa1   : > { %v632_v58 = vadd.f32 %v1182_v56, %v631_v57 }
  0xa3   : > { %v1503_v59 = vpack.c.bf16 %v632_v58, %v632_v58 }
  0xa5   : > { %674 = vrot.lane.b32.xlu2 %v1503_v59, %s1339_s20  ;;  %v646_v61 = vsel %vm641_vm9, %v1503_v59, 0 }
  0xa6   : > { %655 = vmatpush.bf16.xpose.msra.mxu2 %v646_v61 }
  0xa8   : > { %v633_v60 = vpop.f32.mrf.mxu1 }
  0xad   : > { %700 = vrot.lane.b32.xlu2 %v1503_v59, %s1340_s22 }
  0xb5   : > { %824 = vrot.lane.b32.xlu2 %v1503_v59, %s1341_s23 }
  0xff   : > { %v675_v5 = vpop.permute.xlu2 %674 }
 0x100   : > { %v681_v6 = vsel %vm679_vm10, %v675_v5, 0 }
 0x101   : > { %690 = vmatpush.bf16.msra.mxu3 %v681_v6 }
 0x107   : > { %v701_v7 = vpop.permute.xlu2 %700 }
 0x108   : > { %v706_v8 = vsel %vm641_vm9, %v701_v7, 0 }
 0x109   : > { %715 = vmatpush.bf16.xpose.msrb.mxu3 %v706_v8 }
 0x10f   : > { %v825_v22 = vpop.permute.xlu2 %824 }
 0x110   : > { %v830_v24 = vsel %vm641_vm9, %v825_v22, 0 }
 0x111   : > { %v515_v27 = vpop.xlane.xlu0 %514 }
 0x112   : > { %v523_v28 = vmul.f32 %v522_v26, %v515_v27 }
 0x114   : > { %1190 = vrsqrt.f32 %v523_v28  ;;  %vm531_vm3 = vcmp.eq.f32.partialorder %v523_v28, inf  ;;  %v534_v36 = vand.u32 2147483648, %v523_v28  ;;  %vm533_vm4 = vcmp.eq.f32.partialorder %v523_v28, 0.0 }
 0x11a   : > { %v1191_v29 = vpop.eup %1190 }
 0x11b   : > { %v525_v30 = vmul.f32 %v1191_v29, %v523_v28 }
 0x11d   : > { %v526_v31 = vmul.f32 %v1191_v29, %v525_v30 }
 0x11f   : > { %v527_v32 = vmul.f32 0.5, %v526_v31 }
 0x121   : > { %v528_v33 = vsub.f32 1.5, %v527_v32 }
 0x123   : > { %v529_v34 = vmul.f32 %v1191_v29, %v528_v33 }
 0x125   : > { %v530_v35 = vmul.f32 %v529_v34, %v523_v28 }
 0x127   : > { %v532_v37 = vsel %vm531_vm3, %v523_v28, %v530_v35 }
 0x128   : > { %v535_v38 = vsel %vm533_vm4, %v534_v36, %v532_v37 }
 0x129   : > { %v540_v39 = vadd.f32 1e-06, %v535_v38 }
 0x12b   : > { %1192 = vrcp.f32 %v540_v39  ;;  %v552_v43 = vand.u32 2147483648, %v540_v39  ;;  %v550_v46 = vand.u32 2147483647, %v540_v39  ;;  %vm546_vm6 = vweird.f32 %v540_v39 }
 0x12d   : > { %v553_v48 = vor.u32 1.1754944e-38, %v552_v43  ;;  %vm551_vm8 = vcmp.eq.f32.partialorder %v550_v46, 8.507059e+37 }
 0x131   : > { %v1193_v40 = vpop.eup %1192 }
 0x132   : > { %v542_v41 = vmul.f32 %v1193_v40, %v540_v39  ;;  %vm547_vm5 = vweird.f32 %v1193_v40 }
 0x133   : > { %vm548_vm7 = vmor %vm546_vm6, %vm547_vm5 }
 0x134   : > { %v543_v42 = vsub.f32 1.0, %v542_v41 }
 0x136   : > { %v544_v45 = vmul.f32 %v1193_v40, %v543_v42 }
 0x138   : > { %v545_v47 = vadd.f32 %v1193_v40, %v544_v45 }
 0x13a   : > { %v549_v50 = vsel %vm548_vm7, %v1193_v40, %v545_v47 }
 0x13b   : > { %v554_v52 = vsel %vm551_vm8, %v553_v48, %v549_v50 }
 0x13c   : > { %v555_v53 = vmul.f32 %v554_v52, %v539_v49 }
 0x13e   : > { %v559_v54 = vadd.f32 %v1181_v51, %v555_v53 }
 0x140   : > { %v561_v55 = vpack.c.bf16 %v559_v54, %v559_v54 }
 0x142   : > { %1076 = vmatmul.msk.bf16.vlgmr.msra.gmra.mxu0 %vm499_vm0, %v561_v55 }
 0x1bf   : > { %v594_v63 = vpop.f32.mrf.mxu0 }
 0x1c0   : > { %v595_v0 = vadd.f32 %v1183_v62, %v594_v63 }
 0x1c2   : > { %v598_v2 = vmul.f32 0.35355338, %v595_v0 }
 0x1c4   : > { %v636_v3 = vpack.c.bf16 %v598_v2, %v598_v2 }
 0x1c6   : > { %760 = vrot.lane.b32.xlu2 %v636_v3, %s1342_s27  ;;  %698 = vrot.lane.b32.xlu0 %v636_v3, %s1340_s22 }
 0x1c7   : > { %1086 = vmatmul.msk.bf16.vlgmr.msra.gmra.mxu2 %vm641_vm9, %v636_v3  ;;  %v596_v4 = vpop.f32.mrf.mxu0 }
 0x1ce   : > { %822 = vrot.lane.b32.xlu2 %v636_v3, %s1341_s23  ;;  %s493_s23 = scalar_lea.vmem %s1574_s11, %s1476_s7 }
 0x220   : > { %v761_v28 = vpop.permute.xlu2 %760 }
 0x228   : > { %v823_v29 = vpop.permute.xlu2 %822 }
 0x238   : > { %v699_v27 = vpop.permute.xlu0 %698 }
 0x24a   : > { %v657_v10 = vpop.f32.mrf.mxu2 }
 0x24b   : > { %v658_v11 = vadd.f32 %v1184_v9, %v657_v10 }
 0x24d   : > { %v661_v12 = vsel %vm641_vm9, %v658_v11, -inf }
 0x24e   : > { %662 = vmax.xlane.f32.xlu1 %v661_v12 }
 0x252   : > { %v659_v13 = vpop.f32.mrf.mxu2 }
 0x2c1   : > { %v663_v14 = vpop.xlane.xlu1 %662 }
 0x2c2   : > { %v664_v15 = vsub.f32 %v658_v11, %v663_v14 }
 0x2c4   : > { %v665_v16 = vmul.f32 1.442695, %v664_v15 }
 0x2c6   : > { %1194 = vpow2.f32 %v665_v16 }
 0x2cc   : > { %v1195_v17 = vpop.eup %1194 }
 0x2cd   : > { %v667_v18 = vsel %vm641_vm9, %v1195_v17, 0.0 }
 0x2ce   : > { %668 = vadd.xlane.f32.xlu1 %v667_v18 }
 0x2e7   : > { %762 = vrot.lane.b32.xlu1 %v1503_v59, %s1342_s27 }
 0x341   : > { %v669_v19 = vpop.xlane.xlu1 %668 }
 0x342   : > { %1196 = vrcp.f32 %v669_v19 }
 0x348   : > { %v1197_v20 = vpop.eup %1196 }
 0x349   : > { %v671_v21 = vmul.f32 %v1197_v20, %v1195_v17 }
 0x34b   : > { %v672_v23 = vpack.c.bf16 %v671_v21, %v671_v21  ;;  %v1110_v21 = vld [vmem:[#allocation7 + $0x8] sm:$0xff] }
 0x34d   : > { %1087 = vmatmul.msk.bf16.vlgmr.msra.gmra.mxu3 %vm641_vm9, %v672_v23  ;;  %v1109_v23 = vld [vmem:[#allocation7] sm:$0xff] }
 0x34e   : > { %839 = vmatpush.bf16.xpose.msra.mxu3 %v830_v24 }
 0x359   : > { %v763_v25 = vpop.permute.xlu1 %762 }
 0x35a   : > { %v768_v26 = vsel %vm641_vm9, %v763_v25, 0 }
 0x35b   : > { %777 = vmatpush.bf16.xpose.msrb.mxu1 %v768_v26 }
 0x35d   : > { %1088 = vmatmul.msk.bf16.vlgmr.msrb.gmra.mxu3 %vm641_vm9, %v699_v27  ;;  %v1185_v27 = vld [vmem:[%s1573_s10] ss:$0 sm:$0xff] }
 0x362   : > { %1090 = vmatmul.msk.bf16.vlgmr.msrb.gmra.mxu1 %vm641_vm9, %v761_v28 }
 0x363   : > { %911 = vmatpush.bf16.msra.mxu1 %v1110_v21 }
 0x367   : > { %912 = vmatpush.bf16.msra.mxu1 %v1109_v23 }
 0x36d   : > { %1092 = vmatmul.msk.bf16.vlgmr.msra.gmra.mxu3 %vm641_vm9, %v823_v29 }
 0x3d0   : > { %v692_v30 = vpop.f32.mrf.mxu3 }
 0x3d1   : > { %696 = vst.msk [vmem:[#allocation2] sm:$0xff] %vm641_vm9, %v692_v30 }
 0x3d8   : > { %v694_v31 = vpop.f32.mrf.mxu3 }
 0x3df   : > { %v779_v32 = vpop.f32.mrf.mxu1 }
 0x3e0   : > { %v780_v33 = vadd.f32 %v1184_v9, %v779_v32  ;;  %v717_v34 = vpop.f32.mrf.mxu3 }
 0x3e1   : > { %v718_v35 = vadd.f32 %v1184_v9, %v717_v34 }
 0x3e2   : > { %v783_v36 = vsel %vm641_vm9, %v780_v33, -inf }
 0x3e3   : > { %784 = vmax.xlane.f32.xlu2 %v783_v36  ;;  %v721_v37 = vsel %vm641_vm9, %v718_v35, -inf }
 0x3e4   : > { %722 = vmax.xlane.f32.xlu0 %v721_v37 }
 0x3e7   : > { %v781_v38 = vpop.f32.mrf.mxu1 }
 0x3e8   : > { %v719_v39 = vpop.f32.mrf.mxu3 }
 0x3f0   : > { %v841_v40 = vpop.f32.mrf.mxu3 }
 0x3f1   : > { %v842_v41 = vadd.f32 %v1184_v9, %v841_v40 }
 0x3f3   : > { %v845_v42 = vsel %vm641_vm9, %v842_v41, -inf }
 0x3f4   : > { %846 = vmax.xlane.f32.xlu1 %v845_v42 }
 0x3f8   : > { %v843_v43 = vpop.f32.mrf.mxu3 }
 0x3fb   : > { %733 = vrot.lane.b32.xlu2 %v1503_v59, %s1343_s17 }
 0x456   : > { %v785_v44 = vpop.xlane.xlu2 %784 }
 0x457   : > { %v786_v45 = vsub.f32 %v780_v33, %v785_v44  ;;  %v723_v46 = vpop.xlane.xlu0 %722 }
 0x458   : > { %v724_v47 = vsub.f32 %v718_v35, %v723_v46 }
 0x459   : > { %v787_v48 = vmul.f32 1.442695, %v786_v45 }
 0x45a   : > { %v725_v49 = vmul.f32 1.442695, %v724_v47 }
 0x45b   : > { %1198 = vpow2.f32 %v787_v48 }
 0x45c   : > { %1200 = vpow2.f32 %v725_v49 }
 0x45e   : > { %v734_v50 = vpop.permute.xlu2 %733 }
 0x45f   : > { %v739_v51 = vsel %vm679_vm10, %v734_v50, 0 }
 0x460   : > { %748 = vmatpush.bf16.msrb.mxu0 %v739_v51 }
 0x461   : > { %v1199_v52 = vpop.eup %1198 }
 0x462   : > { %v1201_v53 = vpop.eup %1200  ;;  %v789_v54 = vsel %vm641_vm9, %v1199_v52, 0.0 }
 0x463   : > { %790 = vadd.xlane.f32.xlu1 %v789_v54  ;;  %v727_v55 = vsel %vm641_vm9, %v1201_v53, 0.0 }
 0x464   : > { %728 = vadd.xlane.f32.xlu0 %v727_v55 }
 0x467   : > { %v847_v56 = vpop.xlane.xlu1 %846 }
 0x468   : > { %v848_v57 = vsub.f32 %v842_v41, %v847_v56 }
 0x46a   : > { %v849_v58 = vmul.f32 1.442695, %v848_v57 }
 0x46c   : > { %1202 = vpow2.f32 %v849_v58 }
 0x472   : > { %v1203_v60 = vpop.eup %1202 }
 0x473   : > { %v851_v61 = vsel %vm641_vm9, %v1203_v60, 0.0 }
 0x474   : > { %852 = vadd.xlane.f32.xlu0 %v851_v61 }
 0x47c   : > { %795 = vrot.lane.b32.xlu1 %v1503_v59, %s1344_s28 }
 0x488   : > { %857 = vrot.lane.b32.xlu0 %v1503_v59, %s1345_s30 }
 0x4d6   : > { %v791_v2 = vpop.xlane.xlu1 %790 }
 0x4d7   : > { %v729_v62 = vpop.xlane.xlu0 %728 }
 0x4d8   : > { %1204 = vrcp.f32 %v729_v62 }
 0x4d9   : > { %1206 = vrcp.f32 %v791_v2 }
 0x4de   : > { %v1205_v63 = vpop.eup %1204 }
 0x4df   : > { %v731_v0 = vmul.f32 %v1205_v63, %v1201_v53  ;;  %v1207_v4 = vpop.eup %1206 }
 0x4e0   : > { %v793_v5 = vmul.f32 %v1207_v4, %v1199_v52 }
 0x4e1   : > { %v732_v3 = vpack.c.bf16 %v731_v0, %v731_v0 }
 0x4e2   : > { %v794_v9 = vpack.c.bf16 %v793_v5, %v793_v5 }
 0x4e3   : > { %1089 = vmatmul.msk.bf16.vlgmr.msrb.gmra.mxu0 %vm641_vm9, %v732_v3 }
 0x4e7   : > { %v853_v6 = vpop.xlane.xlu0 %852 }
 0x4e8   : > { %1208 = vrcp.f32 %v853_v6 }
 0x4ee   : > { %v796_v7 = vpop.permute.xlu1 %795  ;;  %v1209_v59 = vpop.eup %1208 }
 0x4ef   : > { %v801_v8 = vsel %vm679_vm10, %v796_v7, 0  ;;  %v855_v10 = vmul.f32 %v1209_v59, %v1203_v60 }
 0x4f0   : > { %810 = vmatpush.bf16.msrb.mxu2 %v801_v8 }
 0x4f1   : > { %v856_v13 = vpack.c.bf16 %v855_v10, %v855_v10 }
 0x4f3   : > { %1091 = vmatmul.msk.bf16.vlgmr.msrb.gmra.mxu2 %vm641_vm9, %v794_v9 }
 0x4fa   : > { %v858_v11 = vpop.permute.xlu0 %857 }
 0x4fb   : > { %v863_v12 = vsel %vm679_vm10, %v858_v11, 0 }
 0x4fc   : > { %872 = vmatpush.bf16.msra.mxu0 %v863_v12 }
 0x4ff   : > { %1093 = vmatmul.msk.bf16.vlgmr.msra.gmra.mxu0 %vm641_vm9, %v856_v13 }
 0x560   : > { %v750_v14 = vpop.f32.mrf.mxu0 }
 0x561   : > { %755 = vrot.lane.b32.xlu2 %v750_v14, %s1346_s12 }
 0x568   : > { %v752_v15 = vpop.f32.mrf.mxu0 }
 0x576   : > { %v812_v16 = vpop.f32.mrf.mxu2 }
 0x577   : > { %817 = vrot.lane.b32.xlu2 %v812_v16, %s1347_s13 }
 0x57c   : > { %v874_v17 = vpop.f32.mrf.mxu0 }
 0x57d   : > { %879 = vrot.lane.b32.xlu0 %v874_v17, %s1348_s14 }
 0x57e   : > { %v814_v18 = vpop.f32.mrf.mxu2 }
 0x584   : > { %v876_v19 = vpop.f32.mrf.mxu0 }
 0x5bb   : > { %v756_v20 = vpop.permute.xlu2 %755 }
 0x5bc   : > { %759 = vst.msk [vmem:[#allocation2] sm:$0xff] %vm758_vm11, %v756_v20 }
 0x5d1   : > { %v818_v22 = vpop.permute.xlu2 %817 }
 0x5d2   : > { %821 = vst.msk [vmem:[#allocation2] sm:$0xff] %vm820_vm12, %v818_v22 }
 0x5ef   : > { %v880_v24 = vpop.permute.xlu0 %879 }
 0x5f0   : > { %883 = vst.msk [vmem:[#allocation2] sm:$0xff] %vm882_vm13, %v880_v24 }
 0x5f7   : > { %v884_v25 = vld [vmem:[#allocation2] sm:$0xff] }
 0x5f8   : > { %v885_v26 = vpack.c.bf16 %v884_v25, %v884_v25 }
 0x5fa   : > { %1102 = vmatmul.msk.bf16.vlgmr.msra.gmra.mxu1 %vm499_vm0, %v885_v26 }
 0x677   : > { %v914_v28 = vpop.f32.mrf.mxu1 }
 0x678   : > { %v918_v29 = vadd.f32 %v914_v28, %v1482_v1 }
 0x67a   : > { %v923_v30 = vadd.f32 %v1185_v27, %v918_v29 }
 0x67c   : > { %v924_v31 = vpack.c.bf16 %v923_v30, %v923_v30 }
 0x67e   : > { %926 = vst.msk [vmem:[%s493_s23] sm:$0xf] %vm925_vm14, %v924_v31 }
 0x67f   : > { %v916_v32 = vpop.f32.mrf.mxu1 }
 0x680 PF: > { %s23_s19 = sadd.s32 1, %s1330_s19   ;;  %s1582_s17 = sld [smem:[#allocation10_spill]] }
 0x681   : > { %p20_p8 = scmp.ge.s32.totalorder %s23_s19, 4   ;;  %s1583_s18 = smov %s1585_s29 }
 0x683   :  { %22 = sbr.rel (!%p20_p8) target bundleno = 5 (0x5), region = 113 }
 0x688   :  { %952 = vsyncpa [#allocation4], 1 }
 0x689   :  { %954 = vsyncpa [#allocation4 + $0x1], 1 }
 0x68a   :  { %955 = vsyncpa [#allocation6], 1 }

// kernel: decoder_forward.6
= control target key start
LH: loop header
LB: loop body
LE: loop exit
PB: predicated region body
PF: predicated region fallthrough
CT: control target
= control target key end

     0   :  { %13 = vsyncpa [#allocation4], 0  ;;  %s1108_s27 = smov 0   ;;  %s1110_s28 = smov 0   ;;  %s1217_s0 = inlined_call_operand.vmem [shape: bf16[2,8,32], index: 0, kind: input, shape index: {}]   ;;  %s1218_s1 = inlined_call_operand.vmem [shape: f32[1,8,8], index: 1, kind: input, shape index: {}]   ;;  %s1219_s2 = inlined_call_operand.vmem [shape: f32[1,32], index: 2, kind: input, shape index: {}]   ;;  %s1220_s3 = inlined_call_operand.vmem [shape: f32[1,32], index: 3, kind: input, shape index: {}]   ;;  %s1221_s4 = inlined_call_operand.vmem [shape: bf16[32,96], index: 4, kind: input, shape index: {}]   ;;  %s1222_s5 = inlined_call_operand.vmem [shape: f32[1,96], index: 5, kind: input, shape index: {}]   ;;  %s1223_s6 = inlined_call_operand.hbm [shape: bf16[32,32], index: 6, kind: input, shape index: {}]   ;;  %s1224_s7 = inlined_call_operand.vmem [shape: f32[1,32], index: 7, kind: input, shape index: {}]   ;;  %s1225_s8 = inlined_call_operand.vmem [shape: bf16[2,8,32], index: 8, kind: output, shape index: {}]  }
   0x1   :  { %s1112_s29 = smov 0  }
   0x2 LB: > { %s863_s30 = sadd.s32 4294967295, %s1042_s29   ;;  %s31_s9 = sadd.s32 1, %s1038_s28  ;;  %s1042_s29 = sphi %s1112_s29, %s19_s29   ;;  %s1038_s28 = sphi %s1110_s28, %s1227_s28   ;;  %s1034_s27 = sphi %s1108_s27, %s1226_s27  }
   0x3   : > { %p33_p0 = scmp.ge.s32.totalorder %s31_s9, 2  ;;  %p865_p1 = scmp.ge.s32.totalorder %s1042_s29, 1 }
   0x4   : > { %p244_p2 = scmp.lt.s32.totalorder %s1042_s29, 3  ;;  %p913_p4 = scmp.eq.s32.totalorder %s863_s30, 0 }
   0x5   : > { %s1229_s9 = smov (%p33_p0, %s31_s9), 0  ;;  %s274_s12 = sshll.u32 %s1223_s6, 4  ;;  %s275_s12 = int_to_ptr.hbm [resolvable:$true] %s274_s12 }
   0x6   : > { %p245_p3 = pnand %p865_p1, %p244_p2  ;;  %s1044_s13 = smov [#allocation3]  }
   0x7   : > { %s276_s14 = sshll.u32 %s1044_s13, 4  ;;  %s1045_s15 = smov 64   ;;  %s277_s14 = int_to_ptr.vmem [resolvable:$true] %s276_s14 }
   0x8   : > { %p909_p5 = pneg %p245_p3  ;;  %s1046_s16 = smov 4  }
   0x9   : > { %305 = sbr.rel (%p245_p3) target bundleno = 1371 (0x55b), region = 52 }
   0xa   : > { %p910_p6 = pnand %p913_p4, %p909_p5 }
   0xc   : > { %912 = dma.hbm_to_vmem [thread:$0]  (!%p910_p6), %s275_s12, 256, %s277_s14, [#allocation4], %s1045_s15, %s1045_s15, %s1046_s16  }
   0xe   : > { %1029 = dma.done.wait (%p913_p4), [#allocation4], 256  }
   0xf   : > { %1031 = vsyncadd (%p913_p4), [#allocation4], 4294967040  ;;  %p348_p7 = scmp.lt.s32.totalorder %s1034_s27, 1  ;;  %vm371_vm0 = vcmask 261120   ;;  %v1047_v3 = vmov 32.0   ;;  %v1048_v15 = vmov 31.0  }
  0x10   : > { %962 = vrcp.f32 %v1047_v3  ;;  %v902_v20 = vld [vmem:[%s1221_s4 + $0x8] sm:$0xff]  ;;  %v901_v21 = vld [vmem:[%s1221_s4] sm:$0xff]  ;;  %s1049_s13 = smov 96   ;;  %s1050_s14 = smov 104   ;;  %vm476_vm9 = vcmask 64512   ;;  %vm513_vm10 = vcmask 1043456  }
  0x11   : > { %s1231_s27 = smov (!%p348_p7, %s1034_s27), 1  ;;  %964 = vrcp.f32 %v1048_v15  ;;  %462 = vmatpush.bf16.msra.mxu0 %v902_v20  ;;  %v958_v41 = vld [vmem:[%s1219_s2] ss:$0 sm:$0xff]  ;;  %s1051_s15 = smov 120   ;;  %vm592_vm11 = vcmask 130112   ;;  %vm654_vm12 = vcmask 195712  }
  0x12   : > { %s871_s17 = sshll.u32 %s1231_s27, 2  ;;  %v959_v48 = vld [vmem:[%s1220_s3] ss:$0 sm:$0xff]  ;;  %s1052_s16 = smov 88   ;;  %vm716_vm13 = vcmask 261312   ;;  %vm759_vm14 = vcmask 257024  }
  0x13   : > { %s354_s20 = scalar_lea.vmem %s1217_s0, %s871_s17  ;;  %v960_v53 = vld [vmem:[%s1222_s5] ss:$0 sm:$0xff]  ;;  %s1053_s18 = smov 72  }
  0x14   : > { %v367_v0 = vld [vmem:[%s354_s20] sm:$0xf]  ;;  %s1054_s19 = smov 80   ;;  %s1055_s20 = smov 112  }
  0x15   : > { %v1138_v1 = vunpack.c.l.bf16 %v367_v0  ;;  %463 = vmatpush.bf16.msra.mxu0 %v901_v21  ;;  %s1056_s23 = smov 64   ;;  %s1057_s24 = smov 56  }
  0x16   : > { %v963_v4 = vpop.eup %962  ;;  %s1058_s25 = smov 40   ;;  %s1059_s26 = smov 48  }
  0x17   : > { %v372_v2 = vsel %vm371_vm0, %v1138_v1, 0.0  ;;  %v376_v5 = vmul.f32 32.0, %v963_v4  ;;  %vm380_vm1 = vweird.f32 %v963_v4  ;;  %v965_v16 = vpop.eup %964  ;;  %s1060_s30 = smov 8   ;;  %s1061_s10 = smov 24  }
  0x18   : > { %373 = vadd.xlane.f32.xlu0 %v372_v2  ;;  %v389_v17 = vmul.f32 31.0, %v965_v16  ;;  %vm393_vm2 = vweird.f32 %v965_v16  ;;  %s1062_s11 = smov 16  }
  0x19   : > { %v377_v6 = vsub.f32 1.0, %v376_v5 }
  0x1a   : > { %v390_v18 = vsub.f32 1.0, %v389_v17 }
  0x1b   : > { %v378_v7 = vmul.f32 %v963_v4, %v377_v6 }
  0x1c   : > { %v391_v19 = vmul.f32 %v965_v16, %v390_v18 }
  0x1d   : > { %v379_v8 = vadd.f32 %v963_v4, %v378_v7 }
  0x1e   : > { %v392_v22 = vadd.f32 %v965_v16, %v391_v19 }
  0x1f   : > { %v381_v9 = vsel %vm380_vm1, %v963_v4, %v379_v8  ;;  %v470_v8 = vld [vmem:[%s1218_s1] sm:$0xff] }
  0x20   : > { %v394_v23 = vsel %vm393_vm2, %v965_v16, %v392_v22 }
  0x8b   : > { %v374_v10 = vpop.xlane.xlu0 %373 }
  0x8c   : > { %v382_v11 = vmul.f32 %v381_v9, %v374_v10 }
  0x8e   : > { %v383_v12 = vsub.f32 %v1138_v1, %v382_v11 }
  0x90   : > { %v384_v13 = vmul.f32 %v383_v12, %v383_v12  ;;  %v411_v46 = vmul.f32 %v958_v41, %v383_v12 }
  0x92   : > { %v385_v14 = vsel %vm371_vm0, %v384_v13, 0.0 }
  0x93   : > { %386 = vadd.xlane.f32.xlu0 %v385_v14 }
 0x106   : > { %v387_v24 = vpop.xlane.xlu0 %386 }
 0x107   : > { %v395_v25 = vmul.f32 %v394_v23, %v387_v24 }
 0x109   : > { %966 = vrsqrt.f32 %v395_v25  ;;  %vm403_vm3 = vcmp.eq.f32.partialorder %v395_v25, inf  ;;  %v406_v33 = vand.u32 2147483648, %v395_v25  ;;  %vm405_vm4 = vcmp.eq.f32.partialorder %v395_v25, 0.0 }
 0x10f   : > { %v967_v26 = vpop.eup %966 }
 0x110   : > { %v397_v27 = vmul.f32 %v967_v26, %v395_v25 }
 0x112   : > { %v398_v28 = vmul.f32 %v967_v26, %v397_v27 }
 0x114   : > { %v399_v29 = vmul.f32 0.5, %v398_v28 }
 0x116   : > { %v400_v30 = vsub.f32 1.5, %v399_v29 }
 0x118   : > { %v401_v31 = vmul.f32 %v967_v26, %v400_v30 }
 0x11a   : > { %v402_v32 = vmul.f32 %v401_v31, %v395_v25 }
 0x11c   : > { %v404_v34 = vsel %vm403_vm3, %v395_v25, %v402_v32 }
 0x11d   : > { %v407_v35 = vsel %vm405_vm4, %v406_v33, %v404_v34 }
 0x11e   : > { %v412_v36 = vadd.f32 1e-06, %v407_v35 }
 0x120   : > { %968 = vrcp.f32 %v412_v36  ;;  %v424_v40 = vand.u32 2147483648, %v412_v36  ;;  %v422_v43 = vand.u32 2147483647, %v412_v36  ;;  %vm418_vm6 = vweird.f32 %v412_v36 }
 0x122   : > { %v425_v45 = vor.u32 1.1754944e-38, %v424_v40  ;;  %vm423_vm8 = vcmp.eq.f32.partialorder %v422_v43, 8.507059e+37 }
 0x126   : > { %v969_v37 = vpop.eup %968 }
 0x127   : > { %v414_v38 = vmul.f32 %v969_v37, %v412_v36  ;;  %vm419_vm5 = vweird.f32 %v969_v37 }
 0x128   : > { %vm420_vm7 = vmor %vm418_vm6, %vm419_vm5 }
 0x129   : > { %v415_v39 = vsub.f32 1.0, %v414_v38 }
 0x12b   : > { %v416_v42 = vmul.f32 %v969_v37, %v415_v39 }
 0x12d   : > { %v417_v44 = vadd.f32 %v969_v37, %v416_v42 }
 0x12f   : > { %v421_v47 = vsel %vm420_vm7, %v969_v37, %v417_v44 }
 0x130   : > { %v426_v49 = vsel %vm423_vm8, %v425_v45, %v421_v47 }
 0x131   : > { %v427_v50 = vmul.f32 %v426_v49, %v411_v46 }
 0x133   : > { %v431_v51 = vadd.f32 %v959_v48, %v427_v50 }
 0x135   : > { %v432_v52 = vpack.c.bf16 %v431_v51, %v431_v51 }
 0x137   : > { %881 = vmatmul.msk.bf16.vlgmr.msra.gmra.mxu0 %vm371_vm0, %v432_v52 }
 0x1b4   : > { %v465_v54 = vpop.f32.mrf.mxu0 }
 0x1b5   : > { %v466_v55 = vadd.f32 %v960_v53, %v465_v54 }
 0x1b7   : > { %v469_v56 = vmul.f32 0.35355338, %v466_v55  ;;  %v1160_v57 = vpack.c.bf16 %v466_v55, %v466_v55 }
 0x1b9   : > { %v471_v58 = vpack.c.bf16 %v469_v56, %v469_v56  ;;  %474 = vrot.lane.b32.xlu1 %v1160_v57, %s1049_s13 }
 0x1bb   : > { %656 = vrot.lane.b32.xlu0 %v471_v58, %s1050_s14  ;;  %532 = vrot.lane.b32.xlu2 %v471_v58, %s1051_s15 }
 0x1bc   : > { %v467_v59 = vpop.f32.mrf.mxu0 }
 0x1c1   : > { %534 = vrot.lane.b32.xlu1 %v1160_v57, %s1052_s16  ;;  %s365_s16 = scalar_lea.vmem %s1225_s8, %s871_s17 }
 0x1c3   : > { %658 = vrot.lane.b32.xlu2 %v1160_v57, %s1053_s18 }
 0x1c9   : > { %596 = vrot.lane.b32.xlu1 %v1160_v57, %s1054_s19 }
 0x1cb   : > { %594 = vrot.lane.b32.xlu2 %v471_v58, %s1055_s20 }
 0x215   : > { %v533_v60 = vpop.permute.xlu2 %532 }
 0x21d   : > { %v659_v63 = vpop.permute.xlu2 %658 }
 0x21e   : > { %v664_v3 = vsel %vm476_vm9, %v659_v63, 0 }
 0x225   : > { %v595_v6 = vpop.permute.xlu2 %594 }
 0x22b   : > { %v475_v61 = vpop.permute.xlu1 %474 }
 0x22c   : > { %v481_v62 = vsel %vm476_vm9, %v475_v61, 0 }
 0x22d   : > { %490 = vmatpush.bf16.xpose.msra.mxu1 %v481_v62  ;;  %v657_v7 = vpop.permute.xlu0 %656 }
 0x233   : > { %v535_v0 = vpop.permute.xlu1 %534 }
 0x234   : > { %882 = vmatmul.msk.bf16.vlgmr.msra.gmra.mxu1 %vm476_vm9, %v471_v58  ;;  %v540_v2 = vsel %vm476_vm9, %v535_v0, 0 }
 0x235   : > { %549 = vmatpush.bf16.xpose.msra.mxu3 %v540_v2 }
 0x23b   : > { %v597_v4 = vpop.permute.xlu1 %596 }
 0x23c   : > { %884 = vmatmul.msk.bf16.vlgmr.msra.gmra.mxu3 %vm476_vm9, %v533_v60  ;;  %v602_v5 = vsel %vm476_vm9, %v597_v4, 0 }
 0x23d   : > { %673 = vmatpush.bf16.xpose.msrb.mxu3 %v664_v3  ;;  %611 = vmatpush.bf16.xpose.msrb.mxu0 %v602_v5 }
 0x244   : > { %886 = vmatmul.msk.bf16.vlgmr.msrb.gmra.mxu0 %vm476_vm9, %v595_v6 }
 0x24c   : > { %888 = vmatmul.msk.bf16.vlgmr.msrb.gmra.mxu3 %vm476_vm9, %v657_v7 }
 0x2b1   : > { %v492_v9 = vpop.f32.mrf.mxu1 }
 0x2b2   : > { %v493_v10 = vadd.f32 %v492_v9, %v470_v8 }
 0x2b4   : > { %v496_v11 = vsel %vm476_vm9, %v493_v10, -inf }
 0x2b5   : > { %497 = vmax.xlane.f32.xlu1 %v496_v11 }
 0x2b9   : > { %v494_v12 = vpop.f32.mrf.mxu1 }
 0x2bf   : > { %v551_v13 = vpop.f32.mrf.mxu3 }
 0x2c0   : > { %v552_v14 = vadd.f32 %v551_v13, %v470_v8 }
 0x2c1   : > { %v613_v15 = vpop.f32.mrf.mxu0 }
 0x2c2   : > { %v555_v16 = vsel %vm476_vm9, %v552_v14, -inf  ;;  %v614_v17 = vadd.f32 %v613_v15, %v470_v8  ;;  %v903_v15 = vld [vmem:[#allocation3] sm:$0xff] }
 0x2c3   : > { %556 = vmax.xlane.f32.xlu2 %v555_v16 }
 0x2c4   : > { %v617_v20 = vsel %vm476_vm9, %v614_v17, -inf }
 0x2c7   : > { %v553_v18 = vpop.f32.mrf.mxu3 }
 0x2c9   : > { %v615_v19 = vpop.f32.mrf.mxu0 }
 0x2cb   : > { %618 = vmax.xlane.f32.xlu2 %v617_v20 }
 0x2cf   : > { %v675_v21 = vpop.f32.mrf.mxu3 }
 0x2d0   : > { %v676_v22 = vadd.f32 %v675_v21, %v470_v8  ;;  %v961_v21 = vld [vmem:[%s1224_s7] ss:$0 sm:$0xff] }
 0x2d2   : > { %v679_v23 = vsel %vm476_vm9, %v676_v22, -inf }
 0x2d3   : > { %680 = vmax.xlane.f32.xlu0 %v679_v23 }
 0x2d7   : > { %v677_v24 = vpop.f32.mrf.mxu3 }
 0x2e3   : > { %508 = vrot.lane.b32.xlu2 %v1160_v57, %s1056_s23 }
 0x2e7   : > { %567 = vrot.lane.b32.xlu0 %v1160_v57, %s1057_s24 }
 0x2eb   : > { %691 = vrot.lane.b32.xlu2 %v1160_v57, %s1058_s25 }
 0x2ef   : > { %629 = vrot.lane.b32.xlu0 %v1160_v57, %s1059_s26 }
 0x328   : > { %v498_v25 = vpop.xlane.xlu1 %497 }
 0x329   : > { %v499_v26 = vsub.f32 %v493_v10, %v498_v25 }
 0x32b   : > { %v500_v27 = vmul.f32 1.442695, %v499_v26 }
 0x32d   : > { %970 = vpow2.f32 %v500_v27 }
 0x333   : > { %v971_v28 = vpop.eup %970 }
 0x334   : > { %v502_v29 = vsel %vm476_vm9, %v971_v28, 0.0 }
 0x335   : > { %503 = vadd.xlane.f32.xlu1 %v502_v29 }
 0x336   : > { %v557_v30 = vpop.xlane.xlu2 %556 }
 0x337   : > { %v558_v31 = vsub.f32 %v552_v14, %v557_v30  ;;  %v904_v14 = vld [vmem:[#allocation3 + $0x8] sm:$0xff] }
 0x338   : > { %745 = vmatpush.bf16.msra.mxu0 %v904_v14 }
 0x339   : > { %v559_v32 = vmul.f32 1.442695, %v558_v31 }
 0x33b   : > { %972 = vpow2.f32 %v559_v32 }
 0x33c   : > { %746 = vmatpush.bf16.msra.mxu0 %v903_v15 }
 0x33e   : > { %v619_v33 = vpop.xlane.xlu2 %618 }
 0x33f   : > { %v620_v40 = vsub.f32 %v614_v17, %v619_v33 }
 0x341   : > { %v973_v34 = vpop.eup %972  ;;  %v621_v42 = vmul.f32 1.442695, %v620_v40 }
 0x342   : > { %v561_v35 = vsel %vm476_vm9, %v973_v34, 0.0 }
 0x343   : > { %562 = vadd.xlane.f32.xlu1 %v561_v35 }
 0x346   : > { %v681_v36 = vpop.xlane.xlu0 %680  ;;  %v509_v37 = vpop.permute.xlu2 %508 }
 0x347   : > { %v682_v38 = vsub.f32 %v676_v22, %v681_v36  ;;  %v515_v39 = vsel %vm513_vm10, %v509_v37, 0 }
 0x348   : > { %524 = vmatpush.bf16.msra.mxu2 %v515_v39 }
 0x349   : > { %v683_v41 = vmul.f32 1.442695, %v682_v38 }
 0x34b   : > { %974 = vpow2.f32 %v683_v41 }
 0x34c   : > { %976 = vpow2.f32 %v621_v42 }
 0x34e   : > { %v692_v54 = vpop.permute.xlu2 %691 }
 0x34f   : > { %v697_v56 = vsel %vm513_vm10, %v692_v54, 0 }
 0x351   : > { %v975_v43 = vpop.eup %974 }
 0x352   : > { %v685_v44 = vsel %vm476_vm9, %v975_v43, 0.0  ;;  %v977_v45 = vpop.eup %976 }
 0x353   : > { %686 = vadd.xlane.f32.xlu1 %v685_v44  ;;  %v623_v48 = vsel %vm476_vm9, %v977_v45, 0.0 }
 0x359   : > { %v568_v46 = vpop.permute.xlu0 %567 }
 0x35a   : > { %v573_v47 = vsel %vm513_vm10, %v568_v46, 0 }
 0x35b   : > { %582 = vmatpush.bf16.msrb.mxu2 %v573_v47  ;;  %624 = vadd.xlane.f32.xlu1 %v623_v48 }
 0x361   : > { %v630_v49 = vpop.permute.xlu0 %629 }
 0x362   : > { %v635_v50 = vsel %vm513_vm10, %v630_v49, 0 }
 0x363   : > { %644 = vmatpush.bf16.msrb.mxu1 %v635_v50 }
 0x3a8   : > { %v504_v51 = vpop.xlane.xlu1 %503 }
 0x3a9   : > { %978 = vrcp.f32 %v504_v51 }
 0x3af   : > { %v979_v52 = vpop.eup %978 }
 0x3b0   : > { %v506_v53 = vmul.f32 %v979_v52, %v971_v28 }
 0x3b2   : > { %v507_v55 = vpack.c.bf16 %v506_v53, %v506_v53 }
 0x3b4   : > { %883 = vmatmul.msk.bf16.vlgmr.msra.gmra.mxu2 %vm476_vm9, %v507_v55 }
 0x3b5   : > { %706 = vmatpush.bf16.msra.mxu2 %v697_v56 }
 0x3b6   : > { %v563_v57 = vpop.xlane.xlu1 %562 }
 0x3b7   : > { %980 = vrcp.f32 %v563_v57 }
 0x3bd   : > { %v981_v58 = vpop.eup %980 }
 0x3be   : > { %v565_v59 = vmul.f32 %v981_v58, %v973_v34 }
 0x3c0   : > { %v566_v60 = vpack.c.bf16 %v565_v59, %v565_v59 }
 0x3c4   : > { %885 = vmatmul.msk.bf16.vlgmr.msrb.gmra.mxu2 %vm476_vm9, %v566_v60 }
 0x3c6   : > { %v687_v61 = vpop.xlane.xlu1 %686 }
 0x3c7   : > { %982 = vrcp.f32 %v687_v61 }
 0x3cd   : > { %v983_v62 = vpop.eup %982 }
 0x3ce   : > { %v689_v63 = vmul.f32 %v983_v62, %v975_v43  ;;  %v625_v0 = vpop.xlane.xlu1 %624 }
 0x3cf   : > { %984 = vrcp.f32 %v625_v0 }
 0x3d0   : > { %v690_v2 = vpack.c.bf16 %v689_v63, %v689_v63 }
 0x3d4   : > { %889 = vmatmul.msk.bf16.vlgmr.msra.gmra.mxu2 %vm476_vm9, %v690_v2 }
 0x3d5   : > { %v985_v3 = vpop.eup %984 }
 0x3d6   : > { %v627_v4 = vmul.f32 %v985_v3, %v977_v45 }
 0x3d8   : > { %v628_v5 = vpack.c.bf16 %v627_v4, %v627_v4 }
 0x3da   : > { %887 = vmatmul.msk.bf16.vlgmr.msrb.gmra.mxu1 %vm476_vm9, %v628_v5 }
 0x437   : > { %v526_v6 = vpop.f32.mrf.mxu2 }
 0x438   : > { %530 = vst.msk [vmem:[#allocation2] sm:$0xff] %vm476_vm9, %v526_v6 }
 0x43f   : > { %v528_v7 = vpop.f32.mrf.mxu2 }
 0x447   : > { %v584_v8 = vpop.f32.mrf.mxu2 }
 0x448   : > { %589 = vrot.lane.b32.xlu1 %v584_v8, %s1060_s30 }
 0x44f   : > { %v586_v9 = vpop.f32.mrf.mxu2 }
 0x457   : > { %v646_v10 = vpop.f32.mrf.mxu1  ;;  %v708_v11 = vpop.f32.mrf.mxu2 }
 0x458   : > { %713 = vrot.lane.b32.xlu0 %v708_v11, %s1061_s10  ;;  %651 = vrot.lane.b32.xlu2 %v646_v10, %s1062_s11 }
 0x45f   : > { %v648_v12 = vpop.f32.mrf.mxu1  ;;  %v710_v13 = vpop.f32.mrf.mxu2 }
 0x4b2   : > { %v652_v17 = vpop.permute.xlu2 %651 }
 0x4ba   : > { %v590_v16 = vpop.permute.xlu1 %589 }
 0x4bb   : > { %593 = vst.msk [vmem:[#allocation2] sm:$0xff] %vm592_vm11, %v590_v16 }
 0x4bc   : > { %655 = vst.msk [vmem:[#allocation2] sm:$0xff] %vm654_vm12, %v652_v17 }
 0x4ca   : > { %v714_v18 = vpop.permute.xlu0 %713 }
 0x4cb   : > { %717 = vst.msk [vmem:[#allocation2] sm:$0xff] %vm716_vm13, %v714_v18 }
 0x4d2   : > { %v718_v19 = vld [vmem:[#allocation2] sm:$0xff] }
 0x4d3   : > { %v719_v20 = vpack.c.bf16 %v718_v19, %v718_v19 }
 0x4d5   : > { %898 = vmatmul.msk.bf16.vlgmr.msra.gmra.mxu0 %vm371_vm0, %v719_v20 }
 0x552   : > { %v748_v22 = vpop.f32.mrf.mxu0 }
 0x553   : > { %v752_v23 = vadd.f32 %v748_v22, %v1138_v1 }
 0x555   : > { %v757_v24 = vadd.f32 %v961_v21, %v752_v23 }
 0x557   : > { %v758_v25 = vpack.c.bf16 %v757_v24, %v757_v24 }
 0x559   : > { %760 = vst.msk [vmem:[%s365_s16] sm:$0xf] %vm759_vm14, %v758_v25 }
 0x55a   : > { %v750_v26 = vpop.f32.mrf.mxu0 }
 0x55b PF: > { %s19_s29 = sadd.s32 1, %s1042_s29   ;;  %s1226_s27 = smov %s1038_s28 }
 0x55c   : > { %p16_p8 = scmp.ge.s32.totalorder %s19_s29, 4   ;;  %s1227_s28 = smov %s1229_s9 }
 0x55e   :  { %18 = sbr.rel (!%p16_p8) target bundleno = 2 (0x2), region = 90 }
 0x563   :  { %786 = vsyncpa [#allocation4], 1 }
 0x564   :  { %788 = vsyncpa [#allocation4 + $0x1], 1 }

// kernel: decoder_forward.8
= control target key start
LH: loop header
LB: loop body
LE: loop exit
PB: predicated region body
PF: predicated region fallthrough
CT: control target
= control target key end

     0   :  { %vm33_vm0 = vcmask 261120   ;;  %v294_v5 = vmov 32.0   ;;  %v295_v25 = vmov 31.0   ;;  %vm211_vm15 = vcmask 523264   ;;  %s396_s0 = inlined_call_operand.vmem [shape: bf16[16,32], index: 0, kind: input, shape index: {}]   ;;  %s397_s1 = inlined_call_operand.vmem [shape: f32[1,32], index: 1, kind: input, shape index: {}]   ;;  %s398_s2 = inlined_call_operand.vmem [shape: f32[1,32], index: 2, kind: input, shape index: {}]   ;;  %s399_s4 = inlined_call_operand.vmem [shape: f32[1,64], index: 4, kind: input, shape index: {}]   ;;  %s400_s3 = inlined_call_operand.vmem [shape: bf16[32,64], index: 3, kind: input, shape index: {}]   ;;  %s401_s6 = inlined_call_operand.vmem [shape: f32[1,32], index: 6, kind: input, shape index: {}]   ;;  %s402_s5 = inlined_call_operand.vmem [shape: bf16[64,32], index: 5, kind: input, shape index: {}]   ;;  %s403_s7 = inlined_call_operand.vmem [shape: bf16[16,32], index: 7, kind: output, shape index: {}]  }
   0x1   :  { %v273_v0 = vld [vmem:[%s396_s0] sm:$0xff]   ;;  %282 = vrcp.f32 %v294_v5  ;;  %v267_v32 = vld [vmem:[%s400_s3 + $0x8] sm:$0xff] }
   0x2   :  { %v339_v1 = vunpack.c.l.bf16 %v273_v0  ;;  %v343_v3 = vunpack.c.h.bf16 %v273_v0  ;;  %v278_v13 = vld [vmem:[%s397_s1] ss:$0 sm:$0xff]  ;;  %284 = vrcp.f32 %v295_v25  ;;  %164 = vmatpush.bf16.msra.mxu0 %v267_v32 }
   0x3   :  { %v266_v34 = vld [vmem:[%s400_s3] sm:$0xff] }
   0x4   :  { %v34_v2 = vsel %vm33_vm0, %v339_v1, 0.0  ;;  %v37_v4 = vsel %vm33_vm0, %v343_v3, 0.0 }
   0x5   :  { %35 = vadd.xlane.f32.xlu0 %v34_v2 }
   0x6   :  { %165 = vmatpush.bf16.msra.mxu0 %v266_v34 }
   0x7   :  { %v283_v6 = vpop.eup %282 }
   0x8   :  { %v41_v7 = vmul.f32 32.0, %v283_v6  ;;  %vm45_vm1 = vweird.f32 %v283_v6  ;;  %v285_v26 = vpop.eup %284 }
   0x9   :  { %v60_v27 = vmul.f32 31.0, %v285_v26  ;;  %vm64_vm2 = vweird.f32 %v285_v26 }
   0xa   :  { %v42_v8 = vsub.f32 1.0, %v41_v7 }
   0xb   :  { %v61_v28 = vsub.f32 1.0, %v60_v27  ;;  %v269_v27 = vld [vmem:[%s402_s5 + $0x8] sm:$0xff] }
   0xc   :  { %v43_v9 = vmul.f32 %v283_v6, %v42_v8 }
   0xd   :  { %38 = vadd.xlane.f32.xlu0 %v37_v4  ;;  %v62_v29 = vmul.f32 %v285_v26, %v61_v28 }
   0xe   :  { %v44_v10 = vadd.f32 %v283_v6, %v43_v9 }
   0xf   :  { %v63_v30 = vadd.f32 %v285_v26, %v62_v29  ;;  %v280_v29 = vld [vmem:[%s399_s4] ss:$0 sm:$0xff] }
  0x10   :  { %v46_v11 = vsel %vm45_vm1, %v283_v6, %v44_v10 }
  0x11   :  { %v65_v31 = vsel %vm64_vm2, %v285_v26, %v63_v30  ;;  %v271_v26 = vld [vmem:[%s402_s5 + $0x18] sm:$0xff] }
  0x12   :  { %219 = vmatpush.bf16.msra.mxu1 %v271_v26 }
  0x78   :  { %v36_v12 = vpop.xlane.xlu0 %35 }
  0x79   :  { %v47_v14 = vmul.f32 %v46_v11, %v36_v12 }
  0x7b   :  { %v49_v15 = vsub.f32 %v339_v1, %v47_v14 }
  0x7d   :  { %v351_v16 = vmul.f32 %v278_v13, %v49_v15  ;;  %v51_v17 = vmul.f32 %v49_v15, %v49_v15 }
  0x7f   :  { %v53_v18 = vsel %vm33_vm0, %v51_v17, 0.0 }
  0x80   :  { %54 = vadd.xlane.f32.xlu1 %v53_v18  ;;  %v39_v19 = vpop.xlane.xlu0 %38 }
  0x81   :  { %v48_v20 = vmul.f32 %v46_v11, %v39_v19  ;;  %v279_v19 = vld [vmem:[%s398_s2] ss:$0 sm:$0xff] }
  0x83   :  { %v50_v21 = vsub.f32 %v343_v3, %v48_v20 }
  0x85   :  { %v355_v22 = vmul.f32 %v278_v13, %v50_v21  ;;  %v52_v23 = vmul.f32 %v50_v21, %v50_v21 }
  0x87   :  { %v56_v24 = vsel %vm33_vm0, %v52_v23, 0.0 }
  0x88   :  { %57 = vadd.xlane.f32.xlu1 %v56_v24 }
  0xf3   :  { %v55_v33 = vpop.xlane.xlu1 %54 }
  0xf4   :  { %v66_v35 = vmul.f32 %v65_v31, %v55_v33 }
  0xf6   :  { %286 = vrsqrt.f32 %v66_v35  ;;  %vm75_vm3 = vcmp.eq.f32.partialorder %v66_v35, inf  ;;  %v78_v48 = vand.u32 2147483648, %v66_v35  ;;  %vm77_vm4 = vcmp.eq.f32.partialorder %v66_v35, 0.0 }
  0xfb   :  { %v58_v36 = vpop.xlane.xlu1 %57 }
  0xfc   :  { %v287_v37 = vpop.eup %286  ;;  %v67_v38 = vmul.f32 %v65_v31, %v58_v36  ;;  %v281_v36 = vld [vmem:[%s401_s6] ss:$0 sm:$0xff] }
  0xfd   :  { %v69_v39 = vmul.f32 %v287_v37, %v66_v35 }
  0xfe   :  { %288 = vrsqrt.f32 %v67_v38  ;;  %vm87_vm5 = vcmp.eq.f32.partialorder %v67_v38, inf  ;;  %v90_v56 = vand.u32 2147483648, %v67_v38  ;;  %vm89_vm6 = vcmp.eq.f32.partialorder %v67_v38, 0.0 }
  0xff   :  { %v70_v40 = vmul.f32 %v287_v37, %v69_v39 }
 0x101   :  { %v71_v41 = vmul.f32 0.5, %v70_v40 }
 0x103   :  { %v72_v42 = vsub.f32 1.5, %v71_v41 }
 0x104   :  { %v289_v43 = vpop.eup %288 }
 0x105   :  { %v73_v44 = vmul.f32 %v287_v37, %v72_v42  ;;  %v81_v45 = vmul.f32 %v289_v43, %v67_v38 }
 0x107   :  { %v74_v46 = vmul.f32 %v73_v44, %v66_v35  ;;  %v82_v47 = vmul.f32 %v289_v43, %v81_v45 }
 0x109   :  { %v76_v49 = vsel %vm75_vm3, %v66_v35, %v74_v46  ;;  %v83_v50 = vmul.f32 0.5, %v82_v47 }
 0x10a   :  { %v79_v51 = vsel %vm77_vm4, %v78_v48, %v76_v49 }
 0x10b   :  { %v84_v52 = vsub.f32 1.5, %v83_v50  ;;  %v97_v53 = vadd.f32 1e-06, %v79_v51 }
 0x10d   :  { %v85_v54 = vmul.f32 %v289_v43, %v84_v52  ;;  %290 = vrcp.f32 %v97_v53  ;;  %v110_v4 = vand.u32 2147483648, %v97_v53  ;;  %vm104_vm8 = vweird.f32 %v97_v53 }
 0x10e   :  { %v108_v5 = vand.u32 2147483647, %v97_v53 }
 0x10f   :  { %v86_v55 = vmul.f32 %v85_v54, %v67_v38  ;;  %v111_v9 = vor.u32 1.1754944e-38, %v110_v4 }
 0x110   :  { %vm109_vm10 = vcmp.eq.f32.partialorder %v108_v5, 8.507059e+37 }
 0x111   :  { %v88_v57 = vsel %vm87_vm5, %v67_v38, %v86_v55 }
 0x112   :  { %v91_v58 = vsel %vm89_vm6, %v90_v56, %v88_v57 }
 0x113   :  { %v291_v59 = vpop.eup %290  ;;  %v98_v60 = vadd.f32 1e-06, %v91_v58 }
 0x114   :  { %v100_v61 = vmul.f32 %v291_v59, %v97_v53  ;;  %vm105_vm7 = vweird.f32 %v291_v59 }
 0x115   :  { %292 = vrcp.f32 %v98_v60  ;;  %vm106_vm9 = vmor %vm104_vm8, %vm105_vm7  ;;  %v125_v10 = vand.u32 2147483648, %v98_v60  ;;  %v123_v12 = vand.u32 2147483647, %v98_v60  ;;  %vm119_vm12 = vweird.f32 %v98_v60 }
 0x116   :  { %v101_v62 = vsub.f32 1.0, %v100_v61 }
 0x117   :  { %v126_v15 = vor.u32 1.1754944e-38, %v125_v10  ;;  %vm124_vm14 = vcmp.eq.f32.partialorder %v123_v12, 8.507059e+37 }
 0x118   :  { %v102_v63 = vmul.f32 %v291_v59, %v101_v62 }
 0x11a   :  { %v103_v0 = vadd.f32 %v291_v59, %v102_v63 }
 0x11b   :  { %v293_v2 = vpop.eup %292 }
 0x11c   :  { %v115_v6 = vmul.f32 %v293_v2, %v98_v60  ;;  %v107_v7 = vsel %vm106_vm9, %v291_v59, %v103_v0  ;;  %vm120_vm11 = vweird.f32 %v293_v2 }
 0x11d   :  { %v112_v13 = vsel %vm109_vm10, %v111_v9, %v107_v7  ;;  %vm121_vm13 = vmor %vm119_vm12, %vm120_vm11 }
 0x11e   :  { %v116_v8 = vsub.f32 1.0, %v115_v6  ;;  %v113_v17 = vmul.f32 %v112_v13, %v351_v16  ;;  %v270_v16 = vld [vmem:[%s402_s5 + $0x10] sm:$0xff] }
 0x11f   :  { %220 = vmatpush.bf16.msra.mxu1 %v270_v16 }
 0x120   :  { %v117_v11 = vmul.f32 %v293_v2, %v116_v8  ;;  %v132_v23 = vadd.f32 %v279_v19, %v113_v17 }
 0x122   :  { %v118_v14 = vadd.f32 %v293_v2, %v117_v11 }
 0x123   :  { %221 = vmatpush.bf16.msra.mxu1 %v269_v27 }
 0x124   :  { %v122_v18 = vsel %vm121_vm13, %v293_v2, %v118_v14 }
 0x125   :  { %v127_v20 = vsel %vm124_vm14, %v126_v15, %v122_v18 }
 0x126   :  { %v128_v21 = vmul.f32 %v127_v20, %v355_v22  ;;  %v268_v22 = vld [vmem:[%s402_s5] sm:$0xff] }
 0x127   :  { %222 = vmatpush.bf16.msra.mxu1 %v268_v22 }
 0x128   :  { %v133_v24 = vadd.f32 %v279_v19, %v128_v21 }
 0x12a   :  { %v134_v25 = vpack.c.bf16 %v133_v24, %v132_v23 }
 0x12c   :  { %248 = vmatmul.msk.bf16.vlgmr.msra.gmra.mxu0 %vm33_vm0, %v134_v25  ;;  %vm233_vm0 = vcmask 257024  }
 0x1a9   :  { %v167_v28 = vpop.f32.mrf.mxu0 }
 0x1aa   :  { %v168_v30 = vadd.f32 %v280_v29, %v167_v28 }
 0x1ac   :  { %v172_v33 = vmax.f32 %v168_v30, 0.0 }
 0x1b1   :  { %v169_v31 = vpop.f32.mrf.mxu0 }
 0x1b2   :  { %v170_v32 = vadd.f32 %v280_v29, %v169_v31 }
 0x1b4   :  { %v173_v34 = vmax.f32 %v170_v32, 0.0 }
 0x1b6   :  { %v174_v35 = vpack.c.bf16 %v173_v34, %v172_v33 }
 0x1b8   :  { %265 = vmatmul.msk.bf16.vlgmr.msra.gmra.mxu1 %vm211_vm15, %v174_v35 }
 0x235   :  { %v224_v37 = vpop.f32.mrf.mxu1 }
 0x236   :  { %v225_v38 = vadd.f32 %v281_v36, %v224_v37 }
 0x238   :  { %v229_v39 = vadd.f32 %v339_v1, %v225_v38 }
 0x23a   :  { %v231_v40 = vpack.c.bf16 %v229_v39, %v229_v39 }
 0x23c   :  { %234 = vst.msk [vmem:[%s403_s7] sm:$0xf] %vm233_vm0, %v231_v40 }
 0x23d   :  { %v226_v41 = vpop.f32.mrf.mxu1 }
 0x23e   :  { %v227_v42 = vadd.f32 %v281_v36, %v226_v41 }
 0x240   :  { %v230_v43 = vadd.f32 %v343_v3, %v227_v42 }
 0x242   :  { %v232_v44 = vpack.c.bf16 %v230_v43, %v230_v43 }
 0x244   :  { %235 = vst.msk [vmem:[%s403_s7 + $0x4] sm:$0xf] %vm233_vm0, %v232_v44 }

// kernel: decoder_forward.9
= control target key start
LH: loop header
LB: loop body
LE: loop exit
PB: predicated region body
PF: predicated region fallthrough
CT: control target
= control target key end

     0   :  { %13 = vsyncpa [#allocation4], 0  ;;  %s1315_s0 = inlined_call_operand.vmem [shape: bf16[2,8,32], index: 0, kind: input, shape index: {}]   ;;  %s1316_s1 = inlined_call_operand.vmem [shape: f32[1,8,8], index: 1, kind: input, shape index: {}]   ;;  %s1317_s2 = inlined_call_operand.vmem [shape: f32[1,32], index: 2, kind: input, shape index: {}]   ;;  %s1318_s3 = inlined_call_operand.vmem [shape: f32[1,32], index: 3, kind: input, shape index: {}]   ;;  %s1319_s4 = inlined_call_operand.vmem [shape: bf16[32,96], index: 4, kind: input, shape index: {}]   ;;  %s1320_s5 = inlined_call_operand.vmem [shape: f32[1,96], index: 5, kind: input, shape index: {}]   ;;  %s1321_s6 = inlined_call_operand.hbm [shape: bf16[32,32], index: 6, kind: input, shape index: {}]   ;;  %s1322_s7 = inlined_call_operand.hbm [shape: f32[1,32], index: 7, kind: input, shape index: {}]   ;;  %s1323_s8 = inlined_call_operand.vmem [shape: bf16[2,8,32], index: 8, kind: output, shape index: {}]  }
   0x1   :  { %14 = vsyncpa [#allocation6], 0  ;;  %s1180_s27 = smov 0   ;;  %s1182_s28 = smov 0  }
   0x2   :  { %s1184_s29 = smov 0  }
   0x3 LB: > { %s888_s30 = sadd.s32 4294967295, %s1113_s29   ;;  %s32_s9 = sadd.s32 1, %s1109_s28  ;;  %s1113_s29 = sphi %s1184_s29, %s20_s29   ;;  %s1109_s28 = sphi %s1182_s28, %s1327_s28   ;;  %s1105_s27 = sphi %s1180_s27, %s1326_s27  }
   0x4   : > { %p34_p0 = scmp.ge.s32.totalorder %s32_s9, 2  ;;  %p890_p1 = scmp.ge.s32.totalorder %s1113_s29, 1 }
   0x5   : > { %p245_p2 = scmp.lt.s32.totalorder %s1113_s29, 3  ;;  %p1205_p4 = scmp.eq.s32.totalorder %s888_s30, 0 }
   0x6   : > { %s1329_s9 = smov (%p34_p0, %s32_s9), 0  ;;  %s275_s14 = sshll.u32 %s1321_s6, 4  ;;  %s276_s14 = int_to_ptr.hbm [resolvable:$true] %s275_s14 }
   0x7   : > { %p1201_p3 = pnand %p890_p1, %p245_p2  ;;  %s1115_s15 = smov [#allocation3]  }
   0x8   : > { %s277_s16 = sshll.u32 %s1115_s15, 4  ;;  %s290_s19 = sshll.u32 %s1322_s7, 4  ;;  %s278_s16 = int_to_ptr.vmem [resolvable:$true] %s277_s16  ;;  %s291_s19 = int_to_ptr.hbm [resolvable:$true] %s290_s19 }
   0x9   : > { %p940_p5 = pneg %p1201_p3  ;;  %s1116_s20 = smov 64  }
   0xa   : > { %s1117_s21 = smov 4   ;;  %s1118_s22 = smov [#allocation5]  }
   0xb   : > { %p941_p6 = pnand %p1205_p4, %p940_p5  ;;  %s292_s23 = sshll.u32 %s1118_s22, 4  ;;  %s293_s23 = int_to_ptr.vmem [resolvable:$true] %s292_s23 }
   0xc   : > { %315 = sbr.rel (%p1201_p3) target bundleno = 1376 (0x560), region = 52 }
   0xd   : > { %943 = dma.hbm_to_vmem [thread:$0]  (!%p941_p6), %s276_s14, 256, %s278_s16, [#allocation4], %s1116_s20, %s1116_s20, %s1117_s21  }
   0xe   : > { %946 = dma.hbm_to_vmem [thread:$0]  (!%p941_p6), %s291_s19, 16, %s293_s23, [#allocation6]  }
  0x11   : > { %1096 = dma.done.wait (%p1205_p4), [#allocation4], 256  }
  0x12   : > { %1098 = vsyncadd (%p1205_p4), [#allocation4], 4294967040 }
  0x13   : > { %1100 = dma.done.wait (%p1205_p4), [#allocation6], 16  }
  0x14   : > { %1102 = vsyncadd (%p1205_p4), [#allocation6], 4294967280  ;;  %p363_p7 = scmp.lt.s32.totalorder %s1105_s27, 1  ;;  %vm386_vm0 = vcmask 261120   ;;  %v1119_v3 = vmov 32.0   ;;  %v1120_v15 = vmov 31.0  }
  0x15   : > { %999 = vrcp.f32 %v1119_v3  ;;  %v929_v20 = vld [vmem:[%s1319_s4 + $0x8] sm:$0xff]  ;;  %v928_v21 = vld [vmem:[%s1319_s4] sm:$0xff]  ;;  %s1121_s20 = smov 96   ;;  %s1122_s21 = smov 104   ;;  %vm491_vm9 = vcmask 64512   ;;  %vm528_vm10 = vcmask 1043456  }
  0x16   : > { %s1331_s27 = smov (!%p363_p7, %s1105_s27), 1  ;;  %1001 = vrcp.f32 %v1120_v15  ;;  %477 = vmatpush.bf16.msra.mxu0 %v929_v20  ;;  %v995_v41 = vld [vmem:[%s1317_s2] ss:$0 sm:$0xff]  ;;  %s1123_s22 = smov 120   ;;  %vm607_vm11 = vcmask 130112   ;;  %vm669_vm12 = vcmask 195712  }
  0x17   : > { %s898_s24 = sshll.u32 %s1331_s27, 2  ;;  %v996_v48 = vld [vmem:[%s1318_s3] ss:$0 sm:$0xff]  ;;  %s1124_s23 = smov 88   ;;  %vm731_vm13 = vcmask 261312   ;;  %vm774_vm14 = vcmask 257024  }
  0x18   : > { %s369_s30 = scalar_lea.vmem %s1315_s0, %s898_s24  ;;  %v997_v53 = vld [vmem:[%s1320_s5] ss:$0 sm:$0xff]  ;;  %s1125_s25 = smov 72  }
  0x19   : > { %v382_v0 = vld [vmem:[%s369_s30] sm:$0xf]  ;;  %s1126_s26 = smov 80   ;;  %s1127_s30 = smov 112  }
  0x1a   : > { %v1239_v1 = vunpack.c.l.bf16 %v382_v0  ;;  %478 = vmatpush.bf16.msra.mxu0 %v928_v21  ;;  %s1128_s12 = smov 64   ;;  %s1129_s13 = smov 56  }
  0x1b   : > { %v1000_v4 = vpop.eup %999  ;;  %s1130_s14 = smov 40   ;;  %s1131_s15 = smov 48  }
  0x1c   : > { %v387_v2 = vsel %vm386_vm0, %v1239_v1, 0.0  ;;  %v391_v5 = vmul.f32 32.0, %v1000_v4  ;;  %vm395_vm1 = vweird.f32 %v1000_v4  ;;  %v1002_v16 = vpop.eup %1001  ;;  %s1132_s16 = smov 8   ;;  %s1133_s17 = smov 24  }
  0x1d   : > { %388 = vadd.xlane.f32.xlu0 %v387_v2  ;;  %v404_v17 = vmul.f32 31.0, %v1002_v16  ;;  %vm408_vm2 = vweird.f32 %v1002_v16  ;;  %s1134_s18 = smov 16  }
  0x1e   : > { %v392_v6 = vsub.f32 1.0, %v391_v5 }
  0x1f   : > { %v405_v18 = vsub.f32 1.0, %v404_v17 }
  0x20   : > { %v393_v7 = vmul.f32 %v1000_v4, %v392_v6 }
  0x21   : > { %v406_v19 = vmul.f32 %v1002_v16, %v405_v18 }
  0x22   : > { %v394_v8 = vadd.f32 %v1000_v4, %v393_v7 }
  0x23   : > { %v407_v22 = vadd.f32 %v1002_v16, %v406_v19 }
  0x24   : > { %v396_v9 = vsel %vm395_vm1, %v1000_v4, %v394_v8  ;;  %v485_v8 = vld [vmem:[%s1316_s1] sm:$0xff] }
  0x25   : > { %v409_v23 = vsel %vm408_vm2, %v1002_v16, %v407_v22 }
  0x90   : > { %v389_v10 = vpop.xlane.xlu0 %388 }
  0x91   : > { %v397_v11 = vmul.f32 %v396_v9, %v389_v10 }
  0x93   : > { %v398_v12 = vsub.f32 %v1239_v1, %v397_v11 }
  0x95   : > { %v399_v13 = vmul.f32 %v398_v12, %v398_v12  ;;  %v426_v46 = vmul.f32 %v995_v41, %v398_v12 }
  0x97   : > { %v400_v14 = vsel %vm386_vm0, %v399_v13, 0.0 }
  0x98   : > { %401 = vadd.xlane.f32.xlu0 %v400_v14 }
 0x10b   : > { %v402_v24 = vpop.xlane.xlu0 %401 }
 0x10c   : > { %v410_v25 = vmul.f32 %v409_v23, %v402_v24 }
 0x10e   : > { %1003 = vrsqrt.f32 %v410_v25  ;;  %vm418_vm3 = vcmp.eq.f32.partialorder %v410_v25, inf  ;;  %v421_v33 = vand.u32 2147483648, %v410_v25  ;;  %vm420_vm4 = vcmp.eq.f32.partialorder %v410_v25, 0.0 }
 0x114   : > { %v1004_v26 = vpop.eup %1003 }
 0x115   : > { %v412_v27 = vmul.f32 %v1004_v26, %v410_v25 }
 0x117   : > { %v413_v28 = vmul.f32 %v1004_v26, %v412_v27 }
 0x119   : > { %v414_v29 = vmul.f32 0.5, %v413_v28 }
 0x11b   : > { %v415_v30 = vsub.f32 1.5, %v414_v29 }
 0x11d   : > { %v416_v31 = vmul.f32 %v1004_v26, %v415_v30 }
 0x11f   : > { %v417_v32 = vmul.f32 %v416_v31, %v410_v25 }
 0x121   : > { %v419_v34 = vsel %vm418_vm3, %v410_v25, %v417_v32 }
 0x122   : > { %v422_v35 = vsel %vm420_vm4, %v421_v33, %v419_v34 }
 0x123   : > { %v427_v36 = vadd.f32 1e-06, %v422_v35 }
 0x125   : > { %1005 = vrcp.f32 %v427_v36  ;;  %v439_v40 = vand.u32 2147483648, %v427_v36  ;;  %v437_v43 = vand.u32 2147483647, %v427_v36  ;;  %vm433_vm6 = vweird.f32 %v427_v36 }
 0x127   : > { %v440_v45 = vor.u32 1.1754944e-38, %v439_v40  ;;  %vm438_vm8 = vcmp.eq.f32.partialorder %v437_v43, 8.507059e+37 }
 0x12b   : > { %v1006_v37 = vpop.eup %1005 }
 0x12c   : > { %v429_v38 = vmul.f32 %v1006_v37, %v427_v36  ;;  %vm434_vm5 = vweird.f32 %v1006_v37 }
 0x12d   : > { %vm435_vm7 = vmor %vm433_vm6, %vm434_vm5 }
 0x12e   : > { %v430_v39 = vsub.f32 1.0, %v429_v38 }
 0x130   : > { %v431_v42 = vmul.f32 %v1006_v37, %v430_v39 }
 0x132   : > { %v432_v44 = vadd.f32 %v1006_v37, %v431_v42 }
 0x134   : > { %v436_v47 = vsel %vm435_vm7, %v1006_v37, %v432_v44 }
 0x135   : > { %v441_v49 = vsel %vm438_vm8, %v440_v45, %v436_v47 }
 0x136   : > { %v442_v50 = vmul.f32 %v441_v49, %v426_v46 }
 0x138   : > { %v446_v51 = vadd.f32 %v996_v48, %v442_v50 }
 0x13a   : > { %v447_v52 = vpack.c.bf16 %v446_v51, %v446_v51 }
 0x13c   : > { %908 = vmatmul.msk.bf16.vlgmr.msra.gmra.mxu0 %vm386_vm0, %v447_v52 }
 0x1b9   : > { %v480_v54 = vpop.f32.mrf.mxu0 }
 0x1ba   : > { %v481_v55 = vadd.f32 %v997_v53, %v480_v54 }
 0x1bc   : > { %v484_v56 = vmul.f32 0.35355338, %v481_v55  ;;  %v1261_v57 = vpack.c.bf16 %v481_v55, %v481_v55 }
 0x1be   : > { %v486_v58 = vpack.c.bf16 %v484_v56, %v484_v56  ;;  %489 = vrot.lane.b32.xlu1 %v1261_v57, %s1121_s20 }
 0x1c0   : > { %671 = vrot.lane.b32.xlu0 %v486_v58, %s1122_s21  ;;  %547 = vrot.lane.b32.xlu2 %v486_v58, %s1123_s22  ;;  %s380_s21 = scalar_lea.vmem %s1323_s8, %s898_s24 }
 0x1c1   : > { %v482_v59 = vpop.f32.mrf.mxu0 }
 0x1c6   : > { %549 = vrot.lane.b32.xlu1 %v1261_v57, %s1124_s23 }
 0x1c8   : > { %673 = vrot.lane.b32.xlu2 %v1261_v57, %s1125_s25 }
 0x1ce   : > { %611 = vrot.lane.b32.xlu1 %v1261_v57, %s1126_s26 }
 0x1d0   : > { %609 = vrot.lane.b32.xlu2 %v486_v58, %s1127_s30 }
 0x21a   : > { %v548_v60 = vpop.permute.xlu2 %547 }
 0x222   : > { %v674_v63 = vpop.permute.xlu2 %673 }
 0x223   : > { %v679_v3 = vsel %vm491_vm9, %v674_v63, 0 }
 0x22a   : > { %v610_v6 = vpop.permute.xlu2 %609 }
 0x230   : > { %v490_v61 = vpop.permute.xlu1 %489 }
 0x231   : > { %v496_v62 = vsel %vm491_vm9, %v490_v61, 0 }
 0x232   : > { %505 = vmatpush.bf16.xpose.msra.mxu1 %v496_v62  ;;  %v672_v7 = vpop.permute.xlu0 %671 }
 0x238   : > { %v550_v0 = vpop.permute.xlu1 %549 }
 0x239   : > { %909 = vmatmul.msk.bf16.vlgmr.msra.gmra.mxu1 %vm491_vm9, %v486_v58  ;;  %v555_v2 = vsel %vm491_vm9, %v550_v0, 0 }
 0x23a   : > { %564 = vmatpush.bf16.xpose.msra.mxu3 %v555_v2 }
 0x240   : > { %v612_v4 = vpop.permute.xlu1 %611 }
 0x241   : > { %911 = vmatmul.msk.bf16.vlgmr.msra.gmra.mxu3 %vm491_vm9, %v548_v60  ;;  %v617_v5 = vsel %vm491_vm9, %v612_v4, 0 }
 0x242   : > { %688 = vmatpush.bf16.xpose.msrb.mxu3 %v679_v3  ;;  %626 = vmatpush.bf16.xpose.msrb.mxu0 %v617_v5 }
 0x249   : > { %913 = vmatmul.msk.bf16.vlgmr.msrb.gmra.mxu0 %vm491_vm9, %v610_v6 }
 0x251   : > { %915 = vmatmul.msk.bf16.vlgmr.msrb.gmra.mxu3 %vm491_vm9, %v672_v7 }
 0x2b6   : > { %v507_v9 = vpop.f32.mrf.mxu1 }
 0x2b7   : > { %v508_v10 = vadd.f32 %v507_v9, %v485_v8 }
 0x2b9   : > { %v511_v11 = vsel %vm491_vm9, %v508_v10, -inf }
 0x2ba   : > { %512 = vmax.xlane.f32.xlu1 %v511_v11 }
 0x2be   : > { %v509_v12 = vpop.f32.mrf.mxu1 }
 0x2c4   : > { %v566_v13 = vpop.f32.mrf.mxu3 }
 0x2c5   : > { %v567_v14 = vadd.f32 %v566_v13, %v485_v8 }
 0x2c6   : > { %v628_v15 = vpop.f32.mrf.mxu0 }
 0x2c7   : > { %v570_v16 = vsel %vm491_vm9, %v567_v14, -inf  ;;  %v629_v17 = vadd.f32 %v628_v15, %v485_v8  ;;  %v930_v15 = vld [vmem:[#allocation3] sm:$0xff] }
 0x2c8   : > { %571 = vmax.xlane.f32.xlu2 %v570_v16 }
 0x2c9   : > { %v632_v20 = vsel %vm491_vm9, %v629_v17, -inf }
 0x2cc   : > { %v568_v18 = vpop.f32.mrf.mxu3 }
 0x2ce   : > { %v630_v19 = vpop.f32.mrf.mxu0 }
 0x2d0   : > { %633 = vmax.xlane.f32.xlu2 %v632_v20 }
 0x2d4   : > { %v690_v21 = vpop.f32.mrf.mxu3 }
 0x2d5   : > { %v691_v22 = vadd.f32 %v690_v21, %v485_v8  ;;  %v998_v21 = vld [vmem:[#allocation5] ss:$0 sm:$0xff] }
 0x2d7   : > { %v694_v23 = vsel %vm491_vm9, %v691_v22, -inf }
 0x2d8   : > { %695 = vmax.xlane.f32.xlu0 %v694_v23 }
 0x2dc   : > { %v692_v24 = vpop.f32.mrf.mxu3 }
 0x2e8   : > { %523 = vrot.lane.b32.xlu2 %v1261_v57, %s1128_s12 }
 0x2ec   : > { %582 = vrot.lane.b32.xlu0 %v1261_v57, %s1129_s13 }
 0x2f0   : > { %706 = vrot.lane.b32.xlu2 %v1261_v57, %s1130_s14 }
 0x2f4   : > { %644 = vrot.lane.b32.xlu0 %v1261_v57, %s1131_s15 }
 0x32d   : > { %v513_v25 = vpop.xlane.xlu1 %512 }
 0x32e   : > { %v514_v26 = vsub.f32 %v508_v10, %v513_v25 }
 0x330   : > { %v515_v27 = vmul.f32 1.442695, %v514_v26 }
 0x332   : > { %1007 = vpow2.f32 %v515_v27 }
 0x338   : > { %v1008_v28 = vpop.eup %1007 }
 0x339   : > { %v517_v29 = vsel %vm491_vm9, %v1008_v28, 0.0 }
 0x33a   : > { %518 = vadd.xlane.f32.xlu1 %v517_v29 }
 0x33b   : > { %v572_v30 = vpop.xlane.xlu2 %571 }
 0x33c   : > { %v573_v31 = vsub.f32 %v567_v14, %v572_v30  ;;  %v931_v14 = vld [vmem:[#allocation3 + $0x8] sm:$0xff] }
 0x33d   : > { %760 = vmatpush.bf16.msra.mxu0 %v931_v14 }
 0x33e   : > { %v574_v32 = vmul.f32 1.442695, %v573_v31 }
 0x340   : > { %1009 = vpow2.f32 %v574_v32 }
 0x341   : > { %761 = vmatpush.bf16.msra.mxu0 %v930_v15 }
 0x343   : > { %v634_v33 = vpop.xlane.xlu2 %633 }
 0x344   : > { %v635_v40 = vsub.f32 %v629_v17, %v634_v33 }
 0x346   : > { %v1010_v34 = vpop.eup %1009  ;;  %v636_v42 = vmul.f32 1.442695, %v635_v40 }
 0x347   : > { %v576_v35 = vsel %vm491_vm9, %v1010_v34, 0.0 }
 0x348   : > { %577 = vadd.xlane.f32.xlu1 %v576_v35 }
 0x34b   : > { %v696_v36 = vpop.xlane.xlu0 %695  ;;  %v524_v37 = vpop.permute.xlu2 %523 }
 0x34c   : > { %v697_v38 = vsub.f32 %v691_v22, %v696_v36  ;;  %v530_v39 = vsel %vm528_vm10, %v524_v37, 0 }
 0x34d   : > { %539 = vmatpush.bf16.msra.mxu2 %v530_v39 }
 0x34e   : > { %v698_v41 = vmul.f32 1.442695, %v697_v38 }
 0x350   : > { %1011 = vpow2.f32 %v698_v41 }
 0x351   : > { %1013 = vpow2.f32 %v636_v42 }
 0x353   : > { %v707_v54 = vpop.permute.xlu2 %706 }
 0x354   : > { %v712_v56 = vsel %vm528_vm10, %v707_v54, 0 }
 0x356   : > { %v1012_v43 = vpop.eup %1011 }
 0x357   : > { %v700_v44 = vsel %vm491_vm9, %v1012_v43, 0.0  ;;  %v1014_v45 = vpop.eup %1013 }
 0x358   : > { %701 = vadd.xlane.f32.xlu1 %v700_v44  ;;  %v638_v48 = vsel %vm491_vm9, %v1014_v45, 0.0 }
 0x35e   : > { %v583_v46 = vpop.permute.xlu0 %582 }
 0x35f   : > { %v588_v47 = vsel %vm528_vm10, %v583_v46, 0 }
 0x360   : > { %597 = vmatpush.bf16.msrb.mxu2 %v588_v47  ;;  %639 = vadd.xlane.f32.xlu1 %v638_v48 }
 0x366   : > { %v645_v49 = vpop.permute.xlu0 %644 }
 0x367   : > { %v650_v50 = vsel %vm528_vm10, %v645_v49, 0 }
 0x368   : > { %659 = vmatpush.bf16.msrb.mxu1 %v650_v50 }
 0x3ad   : > { %v519_v51 = vpop.xlane.xlu1 %518 }
 0x3ae   : > { %1015 = vrcp.f32 %v519_v51 }
 0x3b4   : > { %v1016_v52 = vpop.eup %1015 }
 0x3b5   : > { %v521_v53 = vmul.f32 %v1016_v52, %v1008_v28 }
 0x3b7   : > { %v522_v55 = vpack.c.bf16 %v521_v53, %v521_v53 }
 0x3b9   : > { %910 = vmatmul.msk.bf16.vlgmr.msra.gmra.mxu2 %vm491_vm9, %v522_v55 }
 0x3ba   : > { %721 = vmatpush.bf16.msra.mxu2 %v712_v56 }
 0x3bb   : > { %v578_v57 = vpop.xlane.xlu1 %577 }
 0x3bc   : > { %1017 = vrcp.f32 %v578_v57 }
 0x3c2   : > { %v1018_v58 = vpop.eup %1017 }
 0x3c3   : > { %v580_v59 = vmul.f32 %v1018_v58, %v1010_v34 }
 0x3c5   : > { %v581_v60 = vpack.c.bf16 %v580_v59, %v580_v59 }
 0x3c9   : > { %912 = vmatmul.msk.bf16.vlgmr.msrb.gmra.mxu2 %vm491_vm9, %v581_v60 }
 0x3cb   : > { %v702_v61 = vpop.xlane.xlu1 %701 }
 0x3cc   : > { %1019 = vrcp.f32 %v702_v61 }
 0x3d2   : > { %v1020_v62 = vpop.eup %1019 }
 0x3d3   : > { %v704_v63 = vmul.f32 %v1020_v62, %v1012_v43  ;;  %v640_v0 = vpop.xlane.xlu1 %639 }
 0x3d4   : > { %1021 = vrcp.f32 %v640_v0 }
 0x3d5   : > { %v705_v2 = vpack.c.bf16 %v704_v63, %v704_v63 }
 0x3d9   : > { %916 = vmatmul.msk.bf16.vlgmr.msra.gmra.mxu2 %vm491_vm9, %v705_v2 }
 0x3da   : > { %v1022_v3 = vpop.eup %1021 }
 0x3db   : > { %v642_v4 = vmul.f32 %v1022_v3, %v1014_v45 }
 0x3dd   : > { %v643_v5 = vpack.c.bf16 %v642_v4, %v642_v4 }
 0x3df   : > { %914 = vmatmul.msk.bf16.vlgmr.msrb.gmra.mxu1 %vm491_vm9, %v643_v5 }
 0x43c   : > { %v541_v6 = vpop.f32.mrf.mxu2 }
 0x43d   : > { %545 = vst.msk [vmem:[#allocation2] sm:$0xff] %vm491_vm9, %v541_v6 }
 0x444   : > { %v543_v7 = vpop.f32.mrf.mxu2 }
 0x44c   : > { %v599_v8 = vpop.f32.mrf.mxu2 }
 0x44d   : > { %604 = vrot.lane.b32.xlu1 %v599_v8, %s1132_s16 }
 0x454   : > { %v601_v9 = vpop.f32.mrf.mxu2 }
 0x45c   : > { %v661_v10 = vpop.f32.mrf.mxu1  ;;  %v723_v11 = vpop.f32.mrf.mxu2 }
 0x45d   : > { %728 = vrot.lane.b32.xlu0 %v723_v11, %s1133_s17  ;;  %666 = vrot.lane.b32.xlu2 %v661_v10, %s1134_s18 }
 0x464   : > { %v663_v12 = vpop.f32.mrf.mxu1  ;;  %v725_v13 = vpop.f32.mrf.mxu2 }
 0x4b7   : > { %v667_v17 = vpop.permute.xlu2 %666 }
 0x4bf   : > { %v605_v16 = vpop.permute.xlu1 %604 }
 0x4c0   : > { %608 = vst.msk [vmem:[#allocation2] sm:$0xff] %vm607_vm11, %v605_v16 }
 0x4c1   : > { %670 = vst.msk [vmem:[#allocation2] sm:$0xff] %vm669_vm12, %v667_v17 }
 0x4cf   : > { %v729_v18 = vpop.permute.xlu0 %728 }
 0x4d0   : > { %732 = vst.msk [vmem:[#allocation2] sm:$0xff] %vm731_vm13, %v729_v18 }
 0x4d7   : > { %v733_v19 = vld [vmem:[#allocation2] sm:$0xff] }
 0x4d8   : > { %v734_v20 = vpack.c.bf16 %v733_v19, %v733_v19 }
 0x4da   : > { %925 = vmatmul.msk.bf16.vlgmr.msra.gmra.mxu0 %vm386_vm0, %v734_v20 }
 0x557   : > { %v763_v22 = vpop.f32.mrf.mxu0 }
 0x558   : > { %v767_v23 = vadd.f32 %v763_v22, %v1239_v1 }
 0x55a   : > { %v772_v24 = vadd.f32 %v998_v21, %v767_v23 }
 0x55c   : > { %v773_v25 = vpack.c.bf16 %v772_v24, %v772_v24 }
 0x55e   : > { %775 = vst.msk [vmem:[%s380_s21] sm:$0xf] %vm774_vm14, %v773_v25 }
 0x55f   : > { %v765_v26 = vpop.f32.mrf.mxu0 }
 0x560 PF: > { %s20_s29 = sadd.s32 1, %s1113_s29   ;;  %s1326_s27 = smov %s1109_s28 }
 0x561   : > { %p17_p8 = scmp.ge.s32.totalorder %s20_s29, 4   ;;  %s1327_s28 = smov %s1329_s9 }
 0x563   :  { %19 = sbr.rel (!%p17_p8) target bundleno = 3 (0x3), region = 94 }
 0x568   :  { %801 = vsyncpa [#allocation4], 1 }
 0x569   :  { %803 = vsyncpa [#allocation4 + $0x1], 1 }
 0x56a   :  { %804 = vsyncpa [#allocation6], 1 }

// kernel: decoder_forward.11
= control target key start
LH: loop header
LB: loop body
LE: loop exit
PB: predicated region body
PF: predicated region fallthrough
CT: control target
= control target key end

     0   :  { %vm40_vm0 = vcmask 261120   ;;  %s584_s0 = inlined_call_operand.vmem [shape: bf16[16,32], index: 0, kind: input, shape index: {}]   ;;  %s585_s1 = inlined_call_operand.vmem [shape: f32[1,32], index: 1, kind: input, shape index: {}]   ;;  %s586_s2 = inlined_call_operand.vmem [shape: f32[1,32], index: 2, kind: input, shape index: {}]   ;;  %s587_s3 = inlined_call_operand.vmem [shape: bf16[32,64], index: 3, kind: input, shape index: {}]   ;;  %s588_s4 = inlined_call_operand.vmem [shape: f32[1,64], index: 4, kind: input, shape index: {}]   ;;  %s589_s5 = inlined_call_operand.vmem [shape: bf16[64,32], index: 5, kind: input, shape index: {}]   ;;  %s590_s6 = inlined_call_operand.vmem [shape: f32[1,32], index: 6, kind: input, shape index: {}]   ;;  %s591_s7 = inlined_call_operand.vmem [shape: f32[1,32], index: 7, kind: input, shape index: {}]   ;;  %s592_s8 = inlined_call_operand.vmem [shape: f32[1,32], index: 8, kind: input, shape index: {}]   ;;  %s593_s9 = inlined_call_operand.hbm [shape: f32[16,32], index: 9, kind: output, shape index: {}]  }
   0x1   :  { %v379_v0 = vld [vmem:[%s584_s0] sm:$0xff]  }
   0x2   :  { %v497_v1 = vunpack.c.l.bf16 %v379_v0 }
   0x3   :  { %14 = vsyncpa [#allocation3], 0  ;;  %v501_v3 = vunpack.c.h.bf16 %v379_v0  ;;  %v439_v5 = vmov 32.0   ;;  %v440_v22 = vmov 31.0   ;;  %v373_v29 = vld [vmem:[%s587_s3 + $0x8] sm:$0xff]  ;;  %v372_v31 = vld [vmem:[%s587_s3] sm:$0xff] }
   0x4   :  { %v41_v2 = vsel %vm40_vm0, %v497_v1, 0.0  ;;  %393 = vrcp.f32 %v439_v5  ;;  %171 = vmatpush.bf16.msra.mxu0 %v373_v29  ;;  %v374_v29 = vld [vmem:[%s589_s5] sm:$0xff]  ;;  %vm218_vm15 = vcmask 523264   ;;  %s334_s30 = sshll.u32 %s593_s9, 4  ;;  %s442_s10 = smov 128   ;;  %s335_s30 = int_to_ptr.hbm [resolvable:$true] %s334_s30 }
   0x5   :  { %42 = vadd.xlane.f32.xlu0 %v41_v2  ;;  %v44_v4 = vsel %vm40_vm0, %v501_v3, 0.0  ;;  %395 = vrcp.f32 %v440_v22  ;;  %s443_s0 = smov 8  }
   0x8   :  { %172 = vmatpush.bf16.msra.mxu0 %v372_v31  ;;  %v389_v31 = vld [vmem:[%s588_s4] ss:$0 sm:$0xff] }
   0xa   :  { %v394_v6 = vpop.eup %393 }
   0xb   :  { %v48_v7 = vmul.f32 32.0, %v394_v6  ;;  %vm52_vm1 = vweird.f32 %v394_v6  ;;  %v396_v23 = vpop.eup %395 }
   0xc   :  { %v67_v24 = vmul.f32 31.0, %v396_v23  ;;  %vm71_vm2 = vweird.f32 %v396_v23 }
   0xd   :  { %45 = vadd.xlane.f32.xlu0 %v44_v4  ;;  %v49_v8 = vsub.f32 1.0, %v48_v7  ;;  %v387_v4 = vld [vmem:[%s585_s1] ss:$0 sm:$0xff] }
   0xe   :  { %v68_v25 = vsub.f32 1.0, %v67_v24 }
   0xf   :  { %v50_v9 = vmul.f32 %v394_v6, %v49_v8 }
  0x10   :  { %v69_v26 = vmul.f32 %v396_v23, %v68_v25 }
  0x11   :  { %v51_v10 = vadd.f32 %v394_v6, %v50_v9 }
  0x12   :  { %v70_v27 = vadd.f32 %v396_v23, %v69_v26 }
  0x13   :  { %v505_v11 = vsel %vm52_vm1, %v394_v6, %v51_v10 }
  0x14   :  { %v521_v28 = vsel %vm71_vm2, %v396_v23, %v70_v27  ;;  %v375_v27 = vld [vmem:[%s589_s5 + $0x8] sm:$0xff] }
  0x78   :  { %v43_v12 = vpop.xlane.xlu0 %42 }
  0x79   :  { %v54_v13 = vmul.f32 %v505_v11, %v43_v12 }
  0x7b   :  { %v509_v14 = vsub.f32 %v497_v1, %v54_v13 }
  0x7d   :  { %v58_v15 = vmul.f32 %v509_v14, %v509_v14  ;;  %v102_v13 = vmul.f32 %v387_v4, %v509_v14  ;;  %v377_v14 = vld [vmem:[%s589_s5 + $0x18] sm:$0xff] }
  0x7e   :  { %226 = vmatpush.bf16.msra.mxu1 %v377_v14 }
  0x7f   :  { %v60_v16 = vsel %vm40_vm0, %v58_v15, 0.0 }
  0x80   :  { %61 = vadd.xlane.f32.xlu1 %v60_v16  ;;  %v46_v17 = vpop.xlane.xlu0 %45 }
  0x81   :  { %v55_v18 = vmul.f32 %v505_v11, %v46_v17 }
  0x83   :  { %v516_v19 = vsub.f32 %v501_v3, %v55_v18 }
  0x85   :  { %v59_v20 = vmul.f32 %v516_v19, %v516_v19  ;;  %v103_v17 = vmul.f32 %v387_v4, %v516_v19  ;;  %v376_v19 = vld [vmem:[%s589_s5 + $0x10] sm:$0xff] }
  0x86   :  { %227 = vmatpush.bf16.msra.mxu1 %v376_v19 }
  0x87   :  { %v63_v21 = vsel %vm40_vm0, %v59_v20, 0.0 }
  0x88   :  { %64 = vadd.xlane.f32.xlu1 %v63_v21  ;;  %v388_v21 = vld [vmem:[%s586_s2] ss:$0 sm:$0xff] }
  0x8a   :  { %228 = vmatpush.bf16.msra.mxu1 %v375_v27 }
  0x8e   :  { %229 = vmatpush.bf16.msra.mxu1 %v374_v29 }
  0xf3   :  { %v62_v30 = vpop.xlane.xlu1 %61 }
  0xf4   :  { %v73_v32 = vmul.f32 %v521_v28, %v62_v30 }
  0xf6   :  { %397 = vrsqrt.f32 %v73_v32  ;;  %vm82_vm3 = vcmp.eq.f32.partialorder %v73_v32, inf  ;;  %v85_v45 = vand.u32 2147483648, %v73_v32  ;;  %vm84_vm4 = vcmp.eq.f32.partialorder %v73_v32, 0.0 }
  0xfb   :  { %v65_v33 = vpop.xlane.xlu1 %64 }
  0xfc   :  { %v398_v34 = vpop.eup %397  ;;  %v74_v35 = vmul.f32 %v521_v28, %v65_v33 }
  0xfd   :  { %v76_v36 = vmul.f32 %v398_v34, %v73_v32 }
  0xfe   :  { %399 = vrsqrt.f32 %v74_v35  ;;  %vm94_vm5 = vcmp.eq.f32.partialorder %v74_v35, inf  ;;  %v97_v53 = vand.u32 2147483648, %v74_v35  ;;  %vm96_vm6 = vcmp.eq.f32.partialorder %v74_v35, 0.0 }
  0xff   :  { %v77_v37 = vmul.f32 %v398_v34, %v76_v36 }
 0x101   :  { %v78_v38 = vmul.f32 0.5, %v77_v37 }
 0x103   :  { %v79_v39 = vsub.f32 1.5, %v78_v38  ;;  %v390_v38 = vld [vmem:[%s590_s6] ss:$0 sm:$0xff] }
 0x104   :  { %v400_v40 = vpop.eup %399 }
 0x105   :  { %v80_v41 = vmul.f32 %v398_v34, %v79_v39  ;;  %v88_v42 = vmul.f32 %v400_v40, %v74_v35 }
 0x107   :  { %v81_v43 = vmul.f32 %v80_v41, %v73_v32  ;;  %v89_v44 = vmul.f32 %v400_v40, %v88_v42 }
 0x109   :  { %v83_v46 = vsel %vm82_vm3, %v73_v32, %v81_v43  ;;  %v90_v47 = vmul.f32 0.5, %v89_v44 }
 0x10a   :  { %v86_v48 = vsel %vm84_vm4, %v85_v45, %v83_v46 }
 0x10b   :  { %v91_v49 = vsub.f32 1.5, %v90_v47  ;;  %v104_v50 = vadd.f32 1e-06, %v86_v48 }
 0x10d   :  { %v92_v51 = vmul.f32 %v400_v40, %v91_v49  ;;  %401 = vrcp.f32 %v104_v50  ;;  %v117_v63 = vand.u32 2147483648, %v104_v50  ;;  %vm111_vm8 = vweird.f32 %v104_v50 }
 0x10e   :  { %v115_v0 = vand.u32 2147483647, %v104_v50 }
 0x10f   :  { %v93_v52 = vmul.f32 %v92_v51, %v74_v35  ;;  %v118_v7 = vor.u32 1.1754944e-38, %v117_v63 }
 0x110   :  { %vm116_vm10 = vcmp.eq.f32.partialorder %v115_v0, 8.507059e+37 }
 0x111   :  { %v95_v54 = vsel %vm94_vm5, %v74_v35, %v93_v52 }
 0x112   :  { %v98_v55 = vsel %vm96_vm6, %v97_v53, %v95_v54 }
 0x113   :  { %v402_v56 = vpop.eup %401  ;;  %v105_v57 = vadd.f32 1e-06, %v98_v55 }
 0x114   :  { %v107_v58 = vmul.f32 %v402_v56, %v104_v50  ;;  %vm112_vm7 = vweird.f32 %v402_v56 }
 0x115   :  { %403 = vrcp.f32 %v105_v57  ;;  %vm113_vm9 = vmor %vm111_vm8, %vm112_vm7  ;;  %v132_v8 = vand.u32 2147483648, %v105_v57  ;;  %v130_v10 = vand.u32 2147483647, %v105_v57  ;;  %vm126_vm12 = vweird.f32 %v105_v57 }
 0x116   :  { %v108_v59 = vsub.f32 1.0, %v107_v58 }
 0x117   :  { %v133_v16 = vor.u32 1.1754944e-38, %v132_v8  ;;  %vm131_vm14 = vcmp.eq.f32.partialorder %v130_v10, 8.507059e+37 }
 0x118   :  { %v109_v60 = vmul.f32 %v402_v56, %v108_v59 }
 0x11a   :  { %v110_v61 = vadd.f32 %v402_v56, %v109_v60 }
 0x11b   :  { %v404_v62 = vpop.eup %403 }
 0x11c   :  { %v122_v2 = vmul.f32 %v404_v62, %v105_v57  ;;  %v114_v5 = vsel %vm113_vm9, %v402_v56, %v110_v61  ;;  %vm127_vm11 = vweird.f32 %v404_v62 }
 0x11d   :  { %v119_v12 = vsel %vm116_vm10, %v118_v7, %v114_v5  ;;  %vm128_vm13 = vmor %vm126_vm12, %vm127_vm11 }
 0x11e   :  { %v123_v6 = vsub.f32 1.0, %v122_v2  ;;  %v120_v18 = vmul.f32 %v119_v12, %v102_v13 }
 0x120   :  { %v124_v9 = vmul.f32 %v404_v62, %v123_v6  ;;  %v139_v24 = vadd.f32 %v388_v21, %v120_v18 }
 0x122   :  { %v125_v15 = vadd.f32 %v404_v62, %v124_v9 }
 0x124   :  { %v129_v20 = vsel %vm128_vm13, %v404_v62, %v125_v15 }
 0x125   :  { %v134_v22 = vsel %vm131_vm14, %v133_v16, %v129_v20 }
 0x126   :  { %v135_v23 = vmul.f32 %v134_v22, %v103_v17 }
 0x128   :  { %v140_v25 = vadd.f32 %v388_v21, %v135_v23 }
 0x12a   :  { %v141_v26 = vpack.c.bf16 %v140_v25, %v139_v24  ;;  %v391_v24 = vld [vmem:[%s591_s7] ss:$0 sm:$0xff]  ;;  %s441_s7 = smov [#allocation2]  }
 0x12c   :  { %354 = vmatmul.msk.bf16.vlgmr.msra.gmra.mxu0 %vm40_vm0, %v141_v26 }
 0x1a9   :  { %v174_v30 = vpop.f32.mrf.mxu0 }
 0x1aa   :  { %v175_v32 = vadd.f32 %v389_v31, %v174_v30 }
 0x1ac   :  { %v179_v35 = vmax.f32 %v175_v32, 0.0  ;;  %v392_v32 = vld [vmem:[%s592_s8] ss:$0 sm:$0xff]  ;;  %s332_s8 = sshll.u32 %s441_s7, 4  ;;  %s333_s8 = int_to_ptr.vmem [resolvable:$true] %s332_s8 }
 0x1b1   :  { %v176_v33 = vpop.f32.mrf.mxu0 }
 0x1b2   :  { %v177_v34 = vadd.f32 %v389_v31, %v176_v33 }
 0x1b4   :  { %v180_v36 = vmax.f32 %v177_v34, 0.0 }
 0x1b6   :  { %v181_v37 = vpack.c.bf16 %v180_v36, %v179_v35 }
 0x1b8   :  { %371 = vmatmul.msk.bf16.vlgmr.msra.gmra.mxu1 %vm218_vm15, %v181_v37 }
 0x235   :  { %v231_v39 = vpop.f32.mrf.mxu1 }
 0x236   :  { %v232_v40 = vadd.f32 %v390_v38, %v231_v39 }
 0x238   :  { %v236_v41 = vadd.f32 %v497_v1, %v232_v40 }
 0x23a   :  { %v240_v42 = vsel %vm40_vm0, %v236_v41, 0.0 }
 0x23b   :  { %241 = vadd.xlane.f32.xlu2 %v240_v42 }
 0x23d   :  { %v233_v43 = vpop.f32.mrf.mxu1 }
 0x23e   :  { %v234_v44 = vadd.f32 %v390_v38, %v233_v43 }
 0x240   :  { %v237_v45 = vadd.f32 %v501_v3, %v234_v44 }
 0x242   :  { %v243_v46 = vsel %vm40_vm0, %v237_v45, 0.0 }
 0x243   :  { %244 = vadd.xlane.f32.xlu2 %v243_v46 }
 0x2ae   :  { %v242_v47 = vpop.xlane.xlu2 %241 }
 0x2af   :  { %v246_v48 = vmul.f32 %v242_v47, %v505_v11 }
 0x2b1   :  { %v248_v49 = vsub.f32 %v236_v41, %v246_v48 }
 0x2b3   :  { %v250_v50 = vmul.f32 %v248_v49, %v248_v49  ;;  %v287_v29 = vmul.f32 %v391_v24, %v248_v49 }
 0x2b5   :  { %v252_v51 = vsel %vm40_vm0, %v250_v50, 0.0 }
 0x2b6   :  { %253 = vadd.xlane.f32.xlu0 %v252_v51  ;;  %v245_v52 = vpop.xlane.xlu2 %244 }
 0x2b7   :  { %v247_v1 = vmul.f32 %v245_v52, %v505_v11 }
 0x2b9   :  { %v565_v53 = vsub.f32 %v237_v45, %v247_v1 }
 0x2bb   :  { %v251_v54 = vmul.f32 %v565_v53, %v565_v53  ;;  %v288_v42 = vmul.f32 %v391_v24, %v565_v53 }
 0x2bd   :  { %v255_v3 = vsel %vm40_vm0, %v251_v54, 0.0 }
 0x2be   :  { %256 = vadd.xlane.f32.xlu1 %v255_v3 }
 0x329   :  { %v254_v55 = vpop.xlane.xlu0 %253 }
 0x32a   :  { %v258_v56 = vmul.f32 %v254_v55, %v521_v28 }
 0x32c   :  { %405 = vrsqrt.f32 %v258_v56  ;;  %vm267_vm1 = vcmp.eq.f32.partialorder %v258_v56, inf  ;;  %v270_v6 = vand.u32 2147483648, %v258_v56  ;;  %vm269_vm2 = vcmp.eq.f32.partialorder %v258_v56, 0.0 }
 0x331   :  { %v257_v57 = vpop.xlane.xlu1 %256 }
 0x332   :  { %v406_v58 = vpop.eup %405  ;;  %v259_v59 = vmul.f32 %v257_v57, %v521_v28 }
 0x333   :  { %v261_v60 = vmul.f32 %v406_v58, %v258_v56 }
 0x334   :  { %407 = vrsqrt.f32 %v259_v59  ;;  %vm279_vm3 = vcmp.eq.f32.partialorder %v259_v59, inf  ;;  %v282_v15 = vand.u32 2147483648, %v259_v59  ;;  %vm281_vm4 = vcmp.eq.f32.partialorder %v259_v59, 0.0 }
 0x335   :  { %v262_v61 = vmul.f32 %v406_v58, %v261_v60 }
 0x337   :  { %v263_v11 = vmul.f32 0.5, %v262_v61 }
 0x339   :  { %v264_v62 = vsub.f32 1.5, %v263_v11 }
 0x33a   :  { %v408_v63 = vpop.eup %407 }
 0x33b   :  { %v265_v0 = vmul.f32 %v406_v58, %v264_v62  ;;  %v273_v2 = vmul.f32 %v408_v63, %v259_v59 }
 0x33d   :  { %v266_v4 = vmul.f32 %v265_v0, %v258_v56  ;;  %v274_v5 = vmul.f32 %v408_v63, %v273_v2 }
 0x33f   :  { %v268_v7 = vsel %vm267_vm1, %v258_v56, %v266_v4  ;;  %v275_v8 = vmul.f32 0.5, %v274_v5 }
 0x340   :  { %v271_v9 = vsel %vm269_vm2, %v270_v6, %v268_v7 }
 0x341   :  { %v289_v10 = vadd.f32 1e-06, %v271_v9  ;;  %v276_v12 = vsub.f32 1.5, %v275_v8 }
 0x343   :  { %409 = vrcp.f32 %v289_v10  ;;  %v277_v28 = vmul.f32 %v408_v63, %v276_v12  ;;  %v302_v23 = vand.u32 2147483648, %v289_v10  ;;  %v300_v26 = vand.u32 2147483647, %v289_v10 }
 0x344   :  { %vm296_vm6 = vweird.f32 %v289_v10 }
 0x345   :  { %v278_v13 = vmul.f32 %v277_v28, %v259_v59  ;;  %v303_v27 = vor.u32 1.1754944e-38, %v302_v23  ;;  %vm301_vm8 = vcmp.eq.f32.partialorder %v300_v26, 8.507059e+37 }
 0x347   :  { %v280_v16 = vsel %vm279_vm3, %v259_v59, %v278_v13 }
 0x348   :  { %v283_v17 = vsel %vm281_vm4, %v282_v15, %v280_v16 }
 0x349   :  { %v410_v18 = vpop.eup %409  ;;  %v290_v20 = vadd.f32 1e-06, %v283_v17 }
 0x34a   :  { %v292_v21 = vmul.f32 %v410_v18, %v289_v10  ;;  %vm297_vm5 = vweird.f32 %v410_v18 }
 0x34b   :  { %411 = vrcp.f32 %v290_v20  ;;  %vm298_vm7 = vmor %vm296_vm6, %vm297_vm5  ;;  %v317_v36 = vand.u32 2147483648, %v290_v20  ;;  %v315_v38 = vand.u32 2147483647, %v290_v20  ;;  %vm311_vm10 = vweird.f32 %v290_v20 }
 0x34c   :  { %v293_v22 = vsub.f32 1.0, %v292_v21 }
 0x34d   :  { %v318_v41 = vor.u32 1.1754944e-38, %v317_v36  ;;  %vm316_vm12 = vcmp.eq.f32.partialorder %v315_v38, 8.507059e+37 }
 0x34e   :  { %v294_v25 = vmul.f32 %v410_v18, %v293_v22 }
 0x350   :  { %v295_v14 = vadd.f32 %v410_v18, %v294_v25 }
 0x351   :  { %v412_v19 = vpop.eup %411 }
 0x352   :  { %v299_v30 = vsel %vm298_vm7, %v410_v18, %v295_v14  ;;  %v307_v31 = vmul.f32 %v412_v19, %v290_v20  ;;  %vm312_vm9 = vweird.f32 %v412_v19 }
 0x353   :  { %v304_v33 = vsel %vm301_vm8, %v303_v27, %v299_v30  ;;  %vm313_vm11 = vmor %vm311_vm10, %vm312_vm9 }
 0x354   :  { %v305_v34 = vmul.f32 %v304_v33, %v287_v29  ;;  %v308_v35 = vsub.f32 1.0, %v307_v31 }
 0x356   :  { %v309_v37 = vmul.f32 %v412_v19, %v308_v35  ;;  %v324_v39 = vadd.f32 %v392_v32, %v305_v34 }
 0x358   :  { %v310_v40 = vadd.f32 %v412_v19, %v309_v37  ;;  %326 = vst.msk [vmem:[#allocation2] sm:$0xff] %vm40_vm0, %v324_v39 }
 0x35a   :  { %v314_v43 = vsel %vm313_vm11, %v412_v19, %v310_v40 }
 0x35b   :  { %v319_v44 = vsel %vm316_vm12, %v318_v41, %v314_v43 }
 0x35c   :  { %v320_v45 = vmul.f32 %v319_v44, %v288_v42 }
 0x35e   :  { %v325_v46 = vadd.f32 %v392_v32, %v320_v45 }
 0x360   :  { %327 = vst.msk [vmem:[#allocation2 + $0x8] sm:$0xff] %vm40_vm0, %v325_v46 }
 0x361   :  { %340 = dma.vmem_to_hbm [thread:$0]  %s333_s8, 256, %s335_s30, [#allocation3], %s442_s10, %s442_s10, %s443_s0  }
 0x362   :  { %437 = dma.done.wait [#allocation3], 256  }
 0x363   :  { %438 = vsyncadd [#allocation3], 4294967040 }
 0x364   :  { %345 = vsyncpa [#allocation3], 1 }

// kernel: decoder_forward.10
= control target key start
LH: loop header
LB: loop body
LE: loop exit
PB: predicated region body
PF: predicated region fallthrough
CT: control target
= control target key end

     0   :  { %s1788_s0 = inlined_call_operand.vmem [shape: bf16[2,8,32], index: 0, kind: input, shape index: {}]   ;;  %s1789_s1 = inlined_call_operand.vmem [shape: bf16[2,8,32], index: 1, kind: input, shape index: {}]   ;;  %s1790_s2 = inlined_call_operand.vmem [shape: f32[2,1,8], index: 2, kind: input, shape index: {}]   ;;  %s1791_s3 = inlined_call_operand.vmem [shape: f32[1,32], index: 3, kind: input, shape index: {}]   ;;  %s1792_s4 = inlined_call_operand.hbm [shape: f32[1,32], index: 4, kind: input, shape index: {}]   ;;  %s1793_s5 = inlined_call_operand.vmem [shape: bf16[32,32], index: 5, kind: input, shape index: {}]   ;;  %s1794_s6 = inlined_call_operand.hbm [shape: f32[1,32], index: 6, kind: input, shape index: {}]   ;;  %s1795_s7 = inlined_call_operand.hbm [shape: bf16[32,64], index: 7, kind: input, shape index: {}]   ;;  %s1796_s8 = inlined_call_operand.hbm [shape: f32[1,64], index: 8, kind: input, shape index: {}]   ;;  %s1797_s9 = inlined_call_operand.hbm [shape: bf16[32,32], index: 9, kind: input, shape index: {}]   ;;  %s1798_s10 = inlined_call_operand.hbm [shape: f32[1,32], index: 10, kind: input, shape index: {}]   ;;  %s1799_s11 = inlined_call_operand.vmem [shape: bf16[2,8,32], index: 11, kind: output, shape index: {}]  }
   0x1   :  { %1800 = sst [smem:[#allocation17_spill]] %s1792_s4 }
   0x2   :  { %1801 = sst [smem:[#allocation18_spill]] %s1794_s6 }
   0x3   :  { %1802 = sst [smem:[#allocation19_spill]] %s1795_s7 }
   0x4   :  { %16 = vsyncpa [#allocation4], 0 }
   0x5   :  { %17 = vsyncpa [#allocation6], 0 }
   0x6   :  { %18 = vsyncpa [#allocation9], 0 }
   0x7   :  { %19 = vsyncpa [#allocation12], 0  ;;  %s1617_s17 = smov 0   ;;  %s1619_s18 = smov 0  }
   0x8   :  { %s1621_s19 = smov 0  }
   0x9 LB: > { %s1803_s6 = sld [smem:[#allocation18_spill]]  ;;  %s1125_s23 = sadd.s32 4294967295, %s1535_s19   ;;  %s1535_s19 = sphi %s1621_s19, %s25_s19   ;;  %s1531_s18 = sphi %s1619_s18, %s1810_s18   ;;  %s1527_s17 = sphi %s1617_s17, %s1809_s17  }
   0xa   : > { %p1127_p0 = scmp.ge.s32.totalorder %s1535_s19, 1  ;;  %p318_p1 = scmp.lt.s32.totalorder %s1535_s19, 3 }
   0xb   : > { %p1638_p2 = scmp.eq.s32.totalorder %s1125_s23, 0  ;;  %s1537_s26 = smov [#allocation5]  }
   0xc   : > { %p1642_p3 = pnand %p1127_p0, %p318_p1  ;;  %s350_s27 = sshll.u32 %s1537_s26, 4  ;;  %s351_s27 = int_to_ptr.vmem [resolvable:$true] %s350_s27 }
   0xd   : > { %s374_s30 = sshll.u32 %s1796_s8, 4  ;;  %s1538_s13 = smov [#allocation8]   ;;  %s375_s30 = int_to_ptr.hbm [resolvable:$true] %s374_s30 }
   0xe   : > { %p1212_p4 = pneg %p1642_p3  ;;  %s376_s14 = sshll.u32 %s1538_s13, 4  ;;  %s377_s14 = int_to_ptr.vmem [resolvable:$true] %s376_s14 }
   0xf   : > { %s348_s22 = sshll.u32 %s1803_s6, 4  ;;  %s37_s15 = sadd.s32 1, %s1531_s18  ;;  %s349_s22 = int_to_ptr.hbm [resolvable:$true] %s348_s22 }
  0x10   : > { %p1653_p5 = pnand %p1638_p2, %p1212_p4  ;;  %p39_p6 = scmp.ge.s32.totalorder %s37_s15, 2 }
  0x11   : > { %s1807_s4 = sld [smem:[#allocation17_spill]]  ;;  %s1539_s23 = smov [#allocation3]  }
  0x12   : > { %1218 = dma.hbm_to_vmem [thread:$0]  (!%p1653_p5), %s349_s22, 16, %s351_s27, [#allocation6]  }
  0x13   : > { %1224 = dma.hbm_to_vmem [thread:$0]  (!%p1653_p5), %s375_s30, 16, %s377_s14, [#allocation9]  }
  0x14   : > { %s1812_s15 = smov (%p39_p6, %s37_s15), 0  ;;  %s335_s26 = sshll.u32 %s1539_s23, 4  ;;  %s336_s26 = int_to_ptr.vmem [resolvable:$true] %s335_s26 }
  0x15   : > { %s1808_s7 = sld [smem:[#allocation19_spill]]  ;;  %s1540_s22 = smov [#allocation7]  }
  0x16   : > { %s361_s27 = sshll.u32 %s1540_s22, 4  ;;  %s385_s16 = sshll.u32 %s1797_s9, 4  ;;  %s362_s27 = int_to_ptr.vmem [resolvable:$true] %s361_s27  ;;  %s386_s16 = int_to_ptr.hbm [resolvable:$true] %s385_s16 }
  0x17   : > { %s333_s21 = sshll.u32 %s1807_s4, 4  ;;  %s1541_s20 = smov 64   ;;  %s334_s21 = int_to_ptr.hbm [resolvable:$true] %s333_s21 }
  0x18   : > { %1215 = dma.hbm_to_vmem [thread:$0]  (!%p1653_p5), %s334_s21, 16, %s336_s26, [#allocation4]  }
  0x19   : > { %s1542_s4 = smov 4   ;;  %s1543_s23 = smov [#allocation10]  }
  0x1a   : > { %s387_s28 = sshll.u32 %s1543_s23, 4  ;;  %s1544_s21 = smov [#allocation11]   ;;  %s388_s28 = int_to_ptr.vmem [resolvable:$true] %s387_s28 }
  0x1b   : > { %s359_s13 = sshll.u32 %s1808_s7, 4  ;;  %s400_s7 = sshll.u32 %s1798_s10, 4  ;;  %s360_s13 = int_to_ptr.hbm [resolvable:$true] %s359_s13  ;;  %s401_s7 = int_to_ptr.hbm [resolvable:$true] %s400_s7 }
  0x1c   : > { %1221 = dma.hbm_to_vmem [thread:$0]  (!%p1653_p5), %s360_s13, 256, %s362_s27, [#allocation6], %s1541_s20, %s1541_s20, %s1542_s4  }
  0x1d   : > { %1227 = dma.hbm_to_vmem [thread:$0]  (!%p1653_p5), %s386_s16, 256, %s388_s28, [#allocation9], %s1541_s20, %s1541_s20, %s1542_s4  }
  0x1e   : > { %s402_s26 = sshll.u32 %s1544_s21, 4  ;;  %438 = sbr.rel (%p1642_p3) target bundleno = 1680 (0x690), region = 64  ;;  %s403_s26 = int_to_ptr.vmem [resolvable:$true] %s402_s26 }
  0x1f   : > { %1230 = dma.hbm_to_vmem [thread:$0]  (!%p1653_p5), %s401_s7, 16, %s403_s26, [#allocation12]  }
  0x23   : > { %1510 = dma.done.wait (%p1638_p2), [#allocation4], 16  }
  0x24   : > { %1512 = vsyncadd (%p1638_p2), [#allocation4], 4294967280 }
  0x25   : > { %1514 = dma.done.wait (%p1638_p2), [#allocation6], 272  }
  0x26   : > { %1516 = vsyncadd (%p1638_p2), [#allocation6], 4294967024 }
  0x27   : > { %1518 = dma.done.wait (%p1638_p2), [#allocation9], 272  }
  0x28   : > { %1520 = vsyncadd (%p1638_p2), [#allocation9], 4294967024 }
  0x29   : > { %1522 = dma.done.wait (%p1638_p2), [#allocation12], 16  }
  0x2a   : > { %1524 = vsyncadd (%p1638_p2), [#allocation12], 4294967280  ;;  %p515_p7 = scmp.lt.s32.totalorder %s1527_s17, 1  ;;  %vm541_vm0 = vcmask 261120   ;;  %v1545_v3 = vmov 32.0   ;;  %v1546_v15 = vmov 31.0  }
  0x2b   : > { %1293 = vrcp.f32 %v1545_v3  ;;  %v1185_v19 = vld [vmem:[#allocation7 + $0x8] sm:$0xff]  ;;  %v1184_v21 = vld [vmem:[#allocation7] sm:$0xff]  ;;  %v1182_v24 = vld [vmem:[%s1793_s5] sm:$0xff]  ;;  %s1547_s23 = smov 96   ;;  %s1548_s28 = smov 120   ;;  %vm683_vm9 = vcmask 64512  }
  0x2c   : > { %s1814_s17 = smov (!%p515_p7, %s1527_s17), 1  ;;  %1295 = vrcp.f32 %v1546_v15  ;;  %670 = vmatpush.bf16.msra.mxu1 %v1185_v19  ;;  %v1183_v22 = vld [vmem:[%s1793_s5 + $0x8] sm:$0xff]  ;;  %v1287_v44 = vld [vmem:[%s1791_s3] ss:$0 sm:$0xff]  ;;  %v1289_v56 = vld [vmem:[#allocation8] ss:$0 sm:$0xff] }
  0x2d   : > { %s1707_s4 = sshll.u32 %s1814_s17, 2  ;;  %633 = vmatpush.bf16.msra.mxu0 %v1183_v22  ;;  %v1288_v51 = vld [vmem:[#allocation3] ss:$0 sm:$0xff]  ;;  %s1549_s29 = smov 104   ;;  %v1290_v62 = vld [vmem:[#allocation5] ss:$0 sm:$0xff] }
  0x2e   : > { %s521_s25 = scalar_lea.vmem %s1788_s0, %s1707_s4  ;;  %s525_s13 = scalar_lea.vmem %s1789_s1, %s1707_s4  ;;  %vm721_vm10 = vcmask 1043456   ;;  %vm800_vm11 = vcmask 130112   ;;  %vm862_vm12 = vcmask 195712   ;;  %vm924_vm13 = vcmask 261312  }
  0x2f   : > { %v537_v0 = vld [vmem:[%s521_s25] sm:$0xf]  ;;  %s528_s6 = scalar_lea.vmem %s1790_s2, %s1814_s17  ;;  %s1550_s7 = smov 112   ;;  %vm967_vm14 = vcmask 257024  }
  0x30   : > { %v1713_v1 = vunpack.c.l.bf16 %v537_v0  ;;  %671 = vmatpush.bf16.msra.mxu1 %v1184_v21  ;;  %v602_v23 = vld [vmem:[%s525_s13] sm:$0xf]  ;;  %s1551_s17 = smov 88   ;;  %s1552_s25 = smov 80  }
  0x31   : > { %v1294_v4 = vpop.eup %1293  ;;  %634 = vmatpush.bf16.msra.mxu0 %v1182_v24  ;;  %s1553_s24 = smov 72   ;;  %s1554_s12 = smov 8  }
  0x32   : > { %v542_v2 = vsel %vm541_vm0, %v1713_v1, 0.0  ;;  %v546_v5 = vmul.f32 32.0, %v1294_v4  ;;  %vm550_vm1 = vweird.f32 %v1294_v4  ;;  %v1296_v16 = vpop.eup %1295  ;;  %s1555_s13 = smov 16   ;;  %s1556_s22 = smov 24  }
  0x33   : > { %543 = vadd.xlane.f32.xlu0 %v542_v2  ;;  %v559_v17 = vmul.f32 31.0, %v1296_v16  ;;  %vm563_vm2 = vweird.f32 %v1296_v16  ;;  %1162 = vmatmul.msk.bf16.vlgmr.msra.gmra.mxu1 %vm541_vm0, %v602_v23  ;;  %s535_s14 = scalar_lea.vmem %s1799_s11, %s1707_s4 }
  0x34   : > { %v547_v6 = vsub.f32 1.0, %v546_v5 }
  0x35   : > { %v560_v18 = vsub.f32 1.0, %v559_v17 }
  0x36   : > { %v548_v7 = vmul.f32 %v1294_v4, %v547_v6 }
  0x37   : > { %v561_v20 = vmul.f32 %v1296_v16, %v560_v18 }
  0x38   : > { %v549_v8 = vadd.f32 %v1294_v4, %v548_v7 }
  0x39   : > { %v562_v25 = vadd.f32 %v1296_v16, %v561_v20 }
  0x3a   : > { %v551_v9 = vsel %vm550_vm1, %v1294_v4, %v549_v8 }
  0x3b   : > { %v564_v26 = vsel %vm563_vm2, %v1296_v16, %v562_v25 }
  0xa6   : > { %v544_v10 = vpop.xlane.xlu0 %543 }
  0xa7   : > { %v552_v11 = vmul.f32 %v551_v9, %v544_v10  ;;  %v1291_v9 = vld [vmem:[%s528_s6] ss:$0 sm:$0xff] }
  0xa9   : > { %v553_v12 = vsub.f32 %v1713_v1, %v552_v11 }
  0xab   : > { %v554_v13 = vmul.f32 %v553_v12, %v553_v12  ;;  %v581_v49 = vmul.f32 %v1287_v44, %v553_v12 }
  0xad   : > { %v555_v14 = vsel %vm541_vm0, %v554_v13, 0.0 }
  0xae   : > { %556 = vadd.xlane.f32.xlu0 %v555_v14 }
  0xb0   : > { %v673_v57 = vpop.f32.mrf.mxu1 }
  0xb1   : > { %v674_v58 = vadd.f32 %v1289_v56, %v673_v57 }
  0xb3   : > { %v1734_v59 = vpack.c.bf16 %v674_v58, %v674_v58 }
  0xb5   : > { %716 = vrot.lane.b32.xlu2 %v1734_v59, %s1547_s23  ;;  %v688_v61 = vsel %vm683_vm9, %v1734_v59, 0 }
  0xb6   : > { %697 = vmatpush.bf16.xpose.msra.mxu2 %v688_v61 }
  0xb8   : > { %v675_v60 = vpop.f32.mrf.mxu1 }
  0xbd   : > { %742 = vrot.lane.b32.xlu2 %v1734_v59, %s1548_s28 }
  0xc5   : > { %866 = vrot.lane.b32.xlu2 %v1734_v59, %s1549_s29 }
 0x10f   : > { %v717_v5 = vpop.permute.xlu2 %716 }
 0x110   : > { %v723_v6 = vsel %vm721_vm10, %v717_v5, 0 }
 0x111   : > { %732 = vmatpush.bf16.msra.mxu3 %v723_v6 }
 0x117   : > { %v743_v7 = vpop.permute.xlu2 %742 }
 0x118   : > { %v748_v8 = vsel %vm683_vm9, %v743_v7, 0 }
 0x119   : > { %757 = vmatpush.bf16.xpose.msrb.mxu3 %v748_v8 }
 0x11f   : > { %v867_v22 = vpop.permute.xlu2 %866 }
 0x120   : > { %v872_v24 = vsel %vm683_vm9, %v867_v22, 0 }
 0x121   : > { %v557_v27 = vpop.xlane.xlu0 %556 }
 0x122   : > { %v565_v28 = vmul.f32 %v564_v26, %v557_v27 }
 0x124   : > { %1297 = vrsqrt.f32 %v565_v28  ;;  %vm573_vm3 = vcmp.eq.f32.partialorder %v565_v28, inf  ;;  %v576_v36 = vand.u32 2147483648, %v565_v28  ;;  %vm575_vm4 = vcmp.eq.f32.partialorder %v565_v28, 0.0 }
 0x12a   : > { %v1298_v29 = vpop.eup %1297 }
 0x12b   : > { %v567_v30 = vmul.f32 %v1298_v29, %v565_v28 }
 0x12d   : > { %v568_v31 = vmul.f32 %v1298_v29, %v567_v30 }
 0x12f   : > { %v569_v32 = vmul.f32 0.5, %v568_v31 }
 0x131   : > { %v570_v33 = vsub.f32 1.5, %v569_v32 }
 0x133   : > { %v571_v34 = vmul.f32 %v1298_v29, %v570_v33 }
 0x135   : > { %v572_v35 = vmul.f32 %v571_v34, %v565_v28 }
 0x137   : > { %v574_v37 = vsel %vm573_vm3, %v565_v28, %v572_v35 }
 0x138   : > { %v577_v38 = vsel %vm575_vm4, %v576_v36, %v574_v37 }
 0x139   : > { %v582_v39 = vadd.f32 1e-06, %v577_v38 }
 0x13b   : > { %1299 = vrcp.f32 %v582_v39  ;;  %v594_v43 = vand.u32 2147483648, %v582_v39  ;;  %v592_v46 = vand.u32 2147483647, %v582_v39  ;;  %vm588_vm6 = vweird.f32 %v582_v39 }
 0x13d   : > { %v595_v48 = vor.u32 1.1754944e-38, %v594_v43  ;;  %vm593_vm8 = vcmp.eq.f32.partialorder %v592_v46, 8.507059e+37 }
 0x141   : > { %v1300_v40 = vpop.eup %1299 }
 0x142   : > { %v584_v41 = vmul.f32 %v1300_v40, %v582_v39  ;;  %vm589_vm5 = vweird.f32 %v1300_v40 }
 0x143   : > { %vm590_vm7 = vmor %vm588_vm6, %vm589_vm5 }
 0x144   : > { %v585_v42 = vsub.f32 1.0, %v584_v41 }
 0x146   : > { %v586_v45 = vmul.f32 %v1300_v40, %v585_v42 }
 0x148   : > { %v587_v47 = vadd.f32 %v1300_v40, %v586_v45 }
 0x14a   : > { %v591_v50 = vsel %vm590_vm7, %v1300_v40, %v587_v47 }
 0x14b   : > { %v596_v52 = vsel %vm593_vm8, %v595_v48, %v591_v50 }
 0x14c   : > { %v597_v53 = vmul.f32 %v596_v52, %v581_v49 }
 0x14e   : > { %v601_v54 = vadd.f32 %v1288_v51, %v597_v53 }
 0x150   : > { %v603_v55 = vpack.c.bf16 %v601_v54, %v601_v54 }
 0x152   : > { %1153 = vmatmul.msk.bf16.vlgmr.msra.gmra.mxu0 %vm541_vm0, %v603_v55 }
 0x1cf   : > { %v636_v63 = vpop.f32.mrf.mxu0 }
 0x1d0   : > { %v637_v0 = vadd.f32 %v1290_v62, %v636_v63 }
 0x1d2   : > { %v640_v2 = vmul.f32 0.35355338, %v637_v0 }
 0x1d4   : > { %v678_v3 = vpack.c.bf16 %v640_v2, %v640_v2 }
 0x1d6   : > { %802 = vrot.lane.b32.xlu2 %v678_v3, %s1550_s7  ;;  %740 = vrot.lane.b32.xlu0 %v678_v3, %s1548_s28 }
 0x1d7   : > { %1163 = vmatmul.msk.bf16.vlgmr.msra.gmra.mxu2 %vm683_vm9, %v678_v3  ;;  %v638_v4 = vpop.f32.mrf.mxu0 }
 0x1de   : > { %864 = vrot.lane.b32.xlu2 %v678_v3, %s1549_s29 }
 0x230   : > { %v803_v28 = vpop.permute.xlu2 %802 }
 0x238   : > { %v865_v29 = vpop.permute.xlu2 %864 }
 0x248   : > { %v741_v27 = vpop.permute.xlu0 %740 }
 0x25a   : > { %v699_v10 = vpop.f32.mrf.mxu2 }
 0x25b   : > { %v700_v11 = vadd.f32 %v1291_v9, %v699_v10 }
 0x25d   : > { %v703_v12 = vsel %vm683_vm9, %v700_v11, -inf }
 0x25e   : > { %704 = vmax.xlane.f32.xlu1 %v703_v12 }
 0x262   : > { %v701_v13 = vpop.f32.mrf.mxu2 }
 0x2d1   : > { %v705_v14 = vpop.xlane.xlu1 %704 }
 0x2d2   : > { %v706_v15 = vsub.f32 %v700_v11, %v705_v14 }
 0x2d4   : > { %v707_v16 = vmul.f32 1.442695, %v706_v15 }
 0x2d6   : > { %1301 = vpow2.f32 %v707_v16 }
 0x2dc   : > { %v1302_v17 = vpop.eup %1301 }
 0x2dd   : > { %v709_v18 = vsel %vm683_vm9, %v1302_v17, 0.0 }
 0x2de   : > { %710 = vadd.xlane.f32.xlu1 %v709_v18 }
 0x2f7   : > { %804 = vrot.lane.b32.xlu1 %v1734_v59, %s1550_s7 }
 0x351   : > { %v711_v19 = vpop.xlane.xlu1 %710 }
 0x352   : > { %1303 = vrcp.f32 %v711_v19 }
 0x358   : > { %v1304_v20 = vpop.eup %1303 }
 0x359   : > { %v713_v21 = vmul.f32 %v1304_v20, %v1302_v17 }
 0x35b   : > { %v714_v23 = vpack.c.bf16 %v713_v21, %v713_v21  ;;  %v1187_v21 = vld [vmem:[#allocation10 + $0x8] sm:$0xff] }
 0x35d   : > { %1164 = vmatmul.msk.bf16.vlgmr.msra.gmra.mxu3 %vm683_vm9, %v714_v23  ;;  %v1186_v23 = vld [vmem:[#allocation10] sm:$0xff] }
 0x35e   : > { %881 = vmatpush.bf16.xpose.msra.mxu3 %v872_v24 }
 0x369   : > { %v805_v25 = vpop.permute.xlu1 %804 }
 0x36a   : > { %v810_v26 = vsel %vm683_vm9, %v805_v25, 0 }
 0x36b   : > { %819 = vmatpush.bf16.xpose.msrb.mxu1 %v810_v26 }
 0x36d   : > { %1165 = vmatmul.msk.bf16.vlgmr.msrb.gmra.mxu3 %vm683_vm9, %v741_v27  ;;  %v1292_v27 = vld [vmem:[#allocation11] ss:$0 sm:$0xff] }
 0x372   : > { %1167 = vmatmul.msk.bf16.vlgmr.msrb.gmra.mxu1 %vm683_vm9, %v803_v28 }
 0x373   : > { %953 = vmatpush.bf16.msra.mxu1 %v1187_v21 }
 0x377   : > { %954 = vmatpush.bf16.msra.mxu1 %v1186_v23 }
 0x37d   : > { %1169 = vmatmul.msk.bf16.vlgmr.msra.gmra.mxu3 %vm683_vm9, %v865_v29 }
 0x3e0   : > { %v734_v30 = vpop.f32.mrf.mxu3 }
 0x3e1   : > { %738 = vst.msk [vmem:[#allocation2] sm:$0xff] %vm683_vm9, %v734_v30 }
 0x3e8   : > { %v736_v31 = vpop.f32.mrf.mxu3 }
 0x3ef   : > { %v821_v32 = vpop.f32.mrf.mxu1 }
 0x3f0   : > { %v822_v33 = vadd.f32 %v1291_v9, %v821_v32  ;;  %v759_v34 = vpop.f32.mrf.mxu3 }
 0x3f1   : > { %v760_v35 = vadd.f32 %v1291_v9, %v759_v34 }
 0x3f2   : > { %v825_v36 = vsel %vm683_vm9, %v822_v33, -inf }
 0x3f3   : > { %826 = vmax.xlane.f32.xlu2 %v825_v36  ;;  %v763_v37 = vsel %vm683_vm9, %v760_v35, -inf }
 0x3f4   : > { %764 = vmax.xlane.f32.xlu0 %v763_v37 }
 0x3f7   : > { %v823_v38 = vpop.f32.mrf.mxu1 }
 0x3f8   : > { %v761_v39 = vpop.f32.mrf.mxu3 }
 0x400   : > { %v883_v40 = vpop.f32.mrf.mxu3 }
 0x401   : > { %v884_v41 = vadd.f32 %v1291_v9, %v883_v40 }
 0x403   : > { %v887_v42 = vsel %vm683_vm9, %v884_v41, -inf }
 0x404   : > { %888 = vmax.xlane.f32.xlu1 %v887_v42 }
 0x408   : > { %v885_v43 = vpop.f32.mrf.mxu3 }
 0x40b   : > { %775 = vrot.lane.b32.xlu2 %v1734_v59, %s1551_s17 }
 0x466   : > { %v827_v44 = vpop.xlane.xlu2 %826 }
 0x467   : > { %v828_v45 = vsub.f32 %v822_v33, %v827_v44  ;;  %v765_v46 = vpop.xlane.xlu0 %764 }
 0x468   : > { %v766_v47 = vsub.f32 %v760_v35, %v765_v46 }
 0x469   : > { %v829_v48 = vmul.f32 1.442695, %v828_v45 }
 0x46a   : > { %v767_v49 = vmul.f32 1.442695, %v766_v47 }
 0x46b   : > { %1305 = vpow2.f32 %v829_v48 }
 0x46c   : > { %1307 = vpow2.f32 %v767_v49 }
 0x46e   : > { %v776_v50 = vpop.permute.xlu2 %775 }
 0x46f   : > { %v781_v51 = vsel %vm721_vm10, %v776_v50, 0 }
 0x470   : > { %790 = vmatpush.bf16.msrb.mxu0 %v781_v51 }
 0x471   : > { %v1306_v52 = vpop.eup %1305 }
 0x472   : > { %v1308_v53 = vpop.eup %1307  ;;  %v831_v54 = vsel %vm683_vm9, %v1306_v52, 0.0 }
 0x473   : > { %832 = vadd.xlane.f32.xlu1 %v831_v54  ;;  %v769_v55 = vsel %vm683_vm9, %v1308_v53, 0.0 }
 0x474   : > { %770 = vadd.xlane.f32.xlu0 %v769_v55 }
 0x477   : > { %v889_v56 = vpop.xlane.xlu1 %888 }
 0x478   : > { %v890_v57 = vsub.f32 %v884_v41, %v889_v56 }
 0x47a   : > { %v891_v58 = vmul.f32 1.442695, %v890_v57 }
 0x47c   : > { %1309 = vpow2.f32 %v891_v58 }
 0x482   : > { %v1310_v60 = vpop.eup %1309 }
 0x483   : > { %v893_v61 = vsel %vm683_vm9, %v1310_v60, 0.0 }
 0x484   : > { %894 = vadd.xlane.f32.xlu0 %v893_v61 }
 0x48c   : > { %837 = vrot.lane.b32.xlu1 %v1734_v59, %s1552_s25 }
 0x498   : > { %899 = vrot.lane.b32.xlu0 %v1734_v59, %s1553_s24 }
 0x4e6   : > { %v833_v2 = vpop.xlane.xlu1 %832 }
 0x4e7   : > { %v771_v62 = vpop.xlane.xlu0 %770 }
 0x4e8   : > { %1311 = vrcp.f32 %v771_v62 }
 0x4e9   : > { %1313 = vrcp.f32 %v833_v2 }
 0x4ee   : > { %v1312_v63 = vpop.eup %1311 }
 0x4ef   : > { %v773_v0 = vmul.f32 %v1312_v63, %v1308_v53  ;;  %v1314_v4 = vpop.eup %1313 }
 0x4f0   : > { %v835_v5 = vmul.f32 %v1314_v4, %v1306_v52 }
 0x4f1   : > { %v774_v3 = vpack.c.bf16 %v773_v0, %v773_v0 }
 0x4f2   : > { %v836_v9 = vpack.c.bf16 %v835_v5, %v835_v5 }
 0x4f3   : > { %1166 = vmatmul.msk.bf16.vlgmr.msrb.gmra.mxu0 %vm683_vm9, %v774_v3 }
 0x4f7   : > { %v895_v6 = vpop.xlane.xlu0 %894 }
 0x4f8   : > { %1315 = vrcp.f32 %v895_v6 }
 0x4fe   : > { %v838_v7 = vpop.permute.xlu1 %837  ;;  %v1316_v59 = vpop.eup %1315 }
 0x4ff   : > { %v843_v8 = vsel %vm721_vm10, %v838_v7, 0  ;;  %v897_v10 = vmul.f32 %v1316_v59, %v1310_v60 }
 0x500   : > { %852 = vmatpush.bf16.msrb.mxu2 %v843_v8 }
 0x501   : > { %v898_v13 = vpack.c.bf16 %v897_v10, %v897_v10 }
 0x503   : > { %1168 = vmatmul.msk.bf16.vlgmr.msrb.gmra.mxu2 %vm683_vm9, %v836_v9 }
 0x50a   : > { %v900_v11 = vpop.permute.xlu0 %899 }
 0x50b   : > { %v905_v12 = vsel %vm721_vm10, %v900_v11, 0 }
 0x50c   : > { %914 = vmatpush.bf16.msra.mxu0 %v905_v12 }
 0x50f   : > { %1170 = vmatmul.msk.bf16.vlgmr.msra.gmra.mxu0 %vm683_vm9, %v898_v13 }
 0x570   : > { %v792_v14 = vpop.f32.mrf.mxu0 }
 0x571   : > { %797 = vrot.lane.b32.xlu2 %v792_v14, %s1554_s12 }
 0x578   : > { %v794_v15 = vpop.f32.mrf.mxu0 }
 0x586   : > { %v854_v16 = vpop.f32.mrf.mxu2 }
 0x587   : > { %859 = vrot.lane.b32.xlu2 %v854_v16, %s1555_s13 }
 0x58c   : > { %v916_v17 = vpop.f32.mrf.mxu0 }
 0x58d   : > { %921 = vrot.lane.b32.xlu0 %v916_v17, %s1556_s22 }
 0x58e   : > { %v856_v18 = vpop.f32.mrf.mxu2 }
 0x594   : > { %v918_v19 = vpop.f32.mrf.mxu0 }
 0x5cb   : > { %v798_v20 = vpop.permute.xlu2 %797 }
 0x5cc   : > { %801 = vst.msk [vmem:[#allocation2] sm:$0xff] %vm800_vm11, %v798_v20 }
 0x5e1   : > { %v860_v22 = vpop.permute.xlu2 %859 }
 0x5e2   : > { %863 = vst.msk [vmem:[#allocation2] sm:$0xff] %vm862_vm12, %v860_v22 }
 0x5ff   : > { %v922_v24 = vpop.permute.xlu0 %921 }
 0x600   : > { %925 = vst.msk [vmem:[#allocation2] sm:$0xff] %vm924_vm13, %v922_v24 }
 0x607   : > { %v926_v25 = vld [vmem:[#allocation2] sm:$0xff] }
 0x608   : > { %v927_v26 = vpack.c.bf16 %v926_v25, %v926_v25 }
 0x60a   : > { %1179 = vmatmul.msk.bf16.vlgmr.msra.gmra.mxu1 %vm541_vm0, %v927_v26 }
 0x687   : > { %v956_v28 = vpop.f32.mrf.mxu1 }
 0x688   : > { %v960_v29 = vadd.f32 %v956_v28, %v1713_v1 }
 0x68a   : > { %v965_v30 = vadd.f32 %v1292_v27, %v960_v29 }
 0x68c   : > { %v966_v31 = vpack.c.bf16 %v965_v30, %v965_v30 }
 0x68e   : > { %968 = vst.msk [vmem:[%s535_s14] sm:$0xf] %vm967_vm14, %v966_v31 }
 0x68f   : > { %v958_v32 = vpop.f32.mrf.mxu1 }
 0x690 PF: > { %s25_s19 = sadd.s32 1, %s1535_s19   ;;  %s1809_s17 = smov %s1531_s18 }
 0x691   : > { %p22_p8 = scmp.ge.s32.totalorder %s25_s19, 4   ;;  %s1810_s18 = smov %s1812_s15 }
 0x693   :  { %24 = sbr.rel (!%p22_p8) target bundleno = 9 (0x9), region = 125 }
 0x698   :  { %994 = vsyncpa [#allocation4], 1 }
 0x699   :  { %996 = vsyncpa [#allocation4 + $0x1], 1 }
 0x69a   :  { %997 = vsyncpa [#allocation6], 1 }
 0x69b   :  { %998 = vsyncpa [#allocation9], 1 }
 0x69c   :  { %999 = vsyncpa [#allocation12], 1 }

</bundles_post_ra>
